<compile_context>
chip_gen: v5e
topology: v5e:2x2
jax: 0.10.0
libtpu: 0.0.40
codegen_flags: <defaults>
</compile_context>

<pallas_src>
import math

import jax
import jax.numpy as jnp
from jax import lax
from jax.experimental import pallas as pl
from jax.experimental.pallas import tpu as pltpu


_LANES = 512                     # lane width of a slab row (multiple of 128)
_SUBLANES = 8                    # sublanes per minimal slab
_SLAB = _SUBLANES * _LANES       # 4096 edges per minimal slab


def _ipow(x, n: int):
    """x**n for static integer n >= 1 via exponentiation by squaring."""
    result = None
    base = x
    while n:
        if n & 1:
            result = base if result is None else result * base
        n >>= 1
        if n:
            base = base * base
    return result


def _make_edge_kernel(cutoff: float, p: int, n_basis: int, reseed_every: int = 8):
    """Pallas kernel closed over static cutoff / polynomial degree / basis count."""
    c0 = 0.5 * (p + 1) * (p + 2)   # 55 for p=9
    c1 = float(p * (p + 2))        # 99 for p=9
    c2 = 0.5 * p * (p + 1)         # 45 for p=9
    inv_cutoff = 1.0 / float(cutoff)
    pi = math.pi

    def kernel(disp_ref, dist_ref, dir_ref):
        dx = disp_ref[0]                                  # (tile_rows, LANES)
        dy = disp_ref[1]
        dz = disp_ref[2]

        # --- ScaledNorm via rsqrt (+1 Newton step keeps ~f32 accuracy) ---
        d2 = dx * dx + dy * dy + dz * dz
        d2_safe = jnp.where(d2 > 0.0, d2, 1.0)            # guard padded lanes
        inv_d = lax.rsqrt(d2_safe)
        inv_d = inv_d * (1.5 - 0.5 * d2_safe * inv_d * inv_d)

        dir_ref[0] = dx * inv_d                           # unit direction
        dir_ref[1] = dy * inv_d
        dir_ref[2] = dz * inv_d

        d = d2 * inv_d                                    # |disp| (0 on padded lanes)
        x = d * inv_cutoff                                # scaled distance in [0, 1)
        inv_x = cutoff * inv_d                            # 1/x (finite on padded lanes)

        # --- PolynomialCutoff, Horner form: 1 - x^p * (c0 - x*(c1 - c2*x)) ---
        xp = _ipow(x, p)
        env = 1.0 - xp * (c0 - x * (c1 - c2 * x))
        scale = env * inv_x                               # envelope(x) / x

        # --- RadialBessel: sin(k*pi*x)/x, k=1..n_basis, via angle-addition
        #     recurrence; re-seeded with a direct sin/cos every `reseed_every`
        #     rows (accuracy + breaks the serial chain for ILP).  Each row is
        #     stored as it is produced: no concat, tiny live set.
        theta = pi * x
        s1 = jnp.sin(theta)
        cos1 = jnp.cos(theta)
        dist_ref[0] = (s1 * scale).astype(dist_ref.dtype)
        sk, ck = s1, cos1
        for j in range(1, n_basis):
            if j % reseed_every == 0:
                ang = float(j + 1) * theta                # row j <-> frequency k=j+1
                sk = jnp.sin(ang)
                ck = jnp.cos(ang)
            else:
                sk, ck = sk * cos1 + ck * s1, ck * cos1 - sk * s1
            dist_ref[j] = (sk * scale).astype(dist_ref.dtype)

    return kernel


def edge_embedding(pos, cutoff: float, n_basis: int = 20, p: int = 9,
                   dist_dtype=jnp.float32):
    """JAX/Pallas equivalent of EdgeEmbedding.forward (no cell, no batch)."""
    pos = jnp.asarray(pos, jnp.float32)
    n_node = pos.shape[0]

    # ---------- RadiusGraph (plain JAX; dynamic shapes live outside the kernel) ----
    # TODO(synk): replace with a fixed-capacity, statically shaped edge list so the
    # whole path can be jitted (boolean indexing forces eager shapes here).
    idx = jnp.arange(n_node)
    row, col = jnp.meshgrid(idx, idx, indexing="ij")
    row = row.reshape(-1)
    col = col.reshape(-1)
    keep = row != col
    row = row[keep]
    col = col[keep]
    disp = pos[row] - pos[col]                            # (E_all, 3)
    within = jnp.linalg.norm(disp, axis=1) < cutoff
    row = row[within]
    col = col[within]
    disp = disp[within]                                   # (E, 3)
    edge_index = jnp.stack([row, col], axis=0)            # (2, E)

    n_edge = int(disp.shape[0])

    # ---------- (sublane, lane)-dense slab layout for the kernel -----------------
    # edge e -> (row = e // LANES, lane = e % LANES); rows padded so every vreg
    # is fully occupied.  Slab count bucketed to a power of two -> fewer
    # recompiles across distinct edge counts.
    n_slab = -(-max(n_edge, 1) // _SLAB)
    n_slab = 1 << (n_slab - 1).bit_length()
    rows_total = n_slab * _SUBLANES
    e_pad = rows_total * _LANES

    # Tile choice: large tiles (16k edges) for DMA efficiency, but keep >= 2
    # grid steps whenever possible so v7x's second TensorCore gets work.
    max_tile_slabs = 4                                    # 4 * 4096 = 16384 edges/tile
    tile_slabs = min(max_tile_slabs, max(n_slab // 2, 1))
    tile_rows = tile_slabs * _SUBLANES
    grid = (n_slab // tile_slabs,)

    disp_slab = (jnp.zeros((3, e_pad), jnp.float32)
                 .at[:, :n_edge].set(disp.T)
                 .reshape(3, rows_total, _LANES))

    kernel = _make_edge_kernel(float(cutoff), int(p), int(n_basis))

    n_reseed = (n_basis - 1) // 8
    cost = pl.CostEstimate(
        flops=int(190 * e_pad),
        transcendentals=int((3 + 2 * n_reseed) * e_pad),  # rsqrt + sin/cos + reseeds
        bytes_accessed=int((3 * 4 + 3 * 4
                            + n_basis * jnp.dtype(dist_dtype).itemsize) * e_pad),
    )

    dist_slab, dir_slab = pl.pallas_call(
        kernel,
        out_shape=(
            jax.ShapeDtypeStruct((n_basis, rows_total, _LANES), dist_dtype),
            jax.ShapeDtypeStruct((3, rows_total, _LANES), jnp.float32),
        ),
        grid=grid,
        in_specs=[pl.BlockSpec((3, tile_rows, _LANES), lambda i: (0, i, 0))],
        out_specs=(
            pl.BlockSpec((n_basis, tile_rows, _LANES), lambda i: (0, i, 0)),
            pl.BlockSpec((3, tile_rows, _LANES), lambda i: (0, i, 0)),
        ),
        compiler_params=pltpu.CompilerParams(
            dimension_semantics=("parallel",)),
        cost_estimate=cost,
    )(disp_slab)

    dist_edge = dist_slab.reshape(n_basis, e_pad)[:, :n_edge].T   # (E, n_basis)
    dir_edge = dir_slab.reshape(3, e_pad)[:, :n_edge].T           # (E, 3)
    return dist_edge, dir_edge, edge_index


def _reference(pos, cutoff, n_basis=20, p=9):
    """Pure-jnp reference matching the PyTorch module semantics."""
    pos = jnp.asarray(pos, jnp.float32)
    n_node = pos.shape[0]
    idx = jnp.arange(n_node)
    row, col = jnp.meshgrid(idx, idx, indexing="ij")
    row = row.reshape(-1)
    col = col.reshape(-1)
    keep = row != col
    row, col = row[keep], col[keep]
    disp = pos[row] - pos[col]
    within = jnp.linalg.norm(disp, axis=1) < cutoff
    row, col, disp = row[within], col[within], disp[within]
    dist = jnp.linalg.norm(disp, axis=-1, keepdims=True)
    direction = disp / dist
    x = dist / cutoff
    env = (1.0
           - 0.5 * (p + 1) * (p + 2) * x ** p
           + p * (p + 2) * x ** (p + 1)
           - 0.5 * p * (p + 1) * x ** (p + 2))
    freqs = jnp.arange(1, n_basis + 1, dtype=jnp.float32) * jnp.pi
    bessel = jnp.sin(freqs * x) / x
    return env * bessel, direction, jnp.stack([row, col], axis=0)


def _check(pos, cutoff, n_basis):
    dist_edge, dir_edge, edge_index = edge_embedding(pos, cutoff, n_basis=n_basis)
    jax.block_until_ready((dist_edge, dir_edge, edge_index))
    ref_dist, ref_dir, ref_idx = _reference(pos, cutoff, n_basis=n_basis)
    assert dist_edge.shape == ref_dist.shape
    assert dir_edge.shape == ref_dir.shape
    # dist tolerance 1e-4: the reference's own sin(k*pi*x) argument reduction at
    # k*pi*x ~ 63 already carries ~1e-5 absolute error; the re-seeded recurrence
    # stays within that envelope.
    assert jnp.allclose(dist_edge, ref_dist, atol=1e-4, rtol=1e-4)
    assert jnp.allclose(dir_edge, ref_dir, atol=1e-5, rtol=1e-5)
    assert jnp.array_equal(edge_index, ref_idx)


if __name__ == "__main__":
    key = jax.random.PRNGKey(0)
    cutoff = 5.0
    n_basis = 20

    # Small case (single grid step).
    k1, k2 = jax.random.split(key)
    pos_small = jax.random.uniform(k1, (8, 3), jnp.float32, minval=-3.0, maxval=3.0)
    _check(pos_small, cutoff, n_basis)

    # Larger case (exercises multiple grid steps / tile indexing).
    pos_large = jax.random.uniform(k2, (80, 3), jnp.float32, minval=-3.0, maxval=3.0)
    _check(pos_large, cutoff, n_basis)

    print("KERNEL_OK")
</pallas_src>

<mosaic_0001>
module attributes {stable_mosaic.version = 11 : i64} {
  func.func @kernel(%arg0: i32, %arg1: memref<3x8x512xf32, #tpu.memory_space<vmem>>, %arg2: memref<20x8x512xf32, #tpu.memory_space<vmem>>, %arg3: memref<3x8x512xf32, #tpu.memory_space<vmem>>) attributes {dimension_semantics = [#tpu.dimension_semantics<parallel>], iteration_bounds = array<i64: 1>, scalar_prefetch = 0 : i64, scratch_operands = 0 : i64, tpu.core_type = #tpu.core_type<tc>, window_params = [{transform_indices = @transform_0, window_bounds = array<i64: 3, 8, 512>}, {transform_indices = @transform_1, window_bounds = array<i64: 20, 8, 512>}, {transform_indices = @transform_2, window_bounds = array<i64: 3, 8, 512>}]} {
    %c0 = arith.constant 0 : index
    %c0_0 = arith.constant 0 : index
    %c0_1 = arith.constant 0 : index
    %0 = vector.load %arg1[%c0, %c0_0, %c0_1] : memref<3x8x512xf32, #tpu.memory_space<vmem>>, vector<1x8x512xf32>
    %1 = vector.shape_cast %0 : vector<1x8x512xf32> to vector<8x512xf32>
    %c1 = arith.constant 1 : index
    %c0_2 = arith.constant 0 : index
    %c0_3 = arith.constant 0 : index
    %2 = vector.load %arg1[%c1, %c0_2, %c0_3] : memref<3x8x512xf32, #tpu.memory_space<vmem>>, vector<1x8x512xf32>
    %3 = vector.shape_cast %2 : vector<1x8x512xf32> to vector<8x512xf32>
    %c2 = arith.constant 2 : index
    %c0_4 = arith.constant 0 : index
    %c0_5 = arith.constant 0 : index
    %4 = vector.load %arg1[%c2, %c0_4, %c0_5] : memref<3x8x512xf32, #tpu.memory_space<vmem>>, vector<1x8x512xf32>
    %5 = vector.shape_cast %4 : vector<1x8x512xf32> to vector<8x512xf32>
    %6 = arith.mulf %1, %1 : vector<8x512xf32>
    %7 = arith.mulf %3, %3 : vector<8x512xf32>
    %8 = arith.addf %6, %7 : vector<8x512xf32>
    %9 = arith.mulf %5, %5 : vector<8x512xf32>
    %10 = arith.addf %8, %9 : vector<8x512xf32>
    %cst = arith.constant 0.000000e+00 : f32
    %11 = vector.broadcast %cst : f32 to vector<8x512xf32>
    %12 = arith.cmpf ogt, %10, %11 : vector<8x512xf32>
    %cst_6 = arith.constant 1.000000e+00 : f32
    %13 = vector.broadcast %cst_6 : f32 to vector<8x512xf32>
    %14 = arith.select %12, %10, %13 : vector<8x512xi1>, vector<8x512xf32>
    %15 = math.rsqrt %14 : vector<8x512xf32>
    %cst_7 = arith.constant 5.000000e-01 : f32
    %16 = vector.broadcast %cst_7 : f32 to vector<8x512xf32>
    %17 = arith.mulf %16, %14 : vector<8x512xf32>
    %18 = arith.mulf %17, %15 : vector<8x512xf32>
    %19 = arith.mulf %18, %15 : vector<8x512xf32>
    %cst_8 = arith.constant 1.500000e+00 : f32
    %20 = vector.broadcast %cst_8 : f32 to vector<8x512xf32>
    %21 = arith.subf %20, %19 : vector<8x512xf32>
    %22 = arith.mulf %15, %21 : vector<8x512xf32>
    %23 = arith.mulf %1, %22 : vector<8x512xf32>
    %c0_9 = arith.constant 0 : index
    %c0_10 = arith.constant 0 : index
    %c0_11 = arith.constant 0 : index
    %24 = vector.load %arg3[%c0_9, %c0_10, %c0_11] : memref<3x8x512xf32, #tpu.memory_space<vmem>>, vector<1x8x512xf32>
    %25 = vector.shape_cast %24 : vector<1x8x512xf32> to vector<8x512xf32>
    %26 = vector.shape_cast %23 : vector<8x512xf32> to vector<1x8x512xf32>
    tpu.vector_store %arg3[%c0_9, %c0_10, %c0_11], %26 {strides = array<i32>} : memref<3x8x512xf32, #tpu.memory_space<vmem>>, vector<1x8x512xf32>,
    %27 = arith.mulf %3, %22 : vector<8x512xf32>
    %c1_12 = arith.constant 1 : index
    %c0_13 = arith.constant 0 : index
    %c0_14 = arith.constant 0 : index
    %28 = vector.load %arg3[%c1_12, %c0_13, %c0_14] : memref<3x8x512xf32, #tpu.memory_space<vmem>>, vector<1x8x512xf32>
    %29 = vector.shape_cast %28 : vector<1x8x512xf32> to vector<8x512xf32>
    %30 = vector.shape_cast %27 : vector<8x512xf32> to vector<1x8x512xf32>
    tpu.vector_store %arg3[%c1_12, %c0_13, %c0_14], %30 {strides = array<i32>} : memref<3x8x512xf32, #tpu.memory_space<vmem>>, vector<1x8x512xf32>,
    %31 = arith.mulf %5, %22 : vector<8x512xf32>
    %c2_15 = arith.constant 2 : index
    %c0_16 = arith.constant 0 : index
    %c0_17 = arith.constant 0 : index
    %32 = vector.load %arg3[%c2_15, %c0_16, %c0_17] : memref<3x8x512xf32, #tpu.memory_space<vmem>>, vector<1x8x512xf32>
    %33 = vector.shape_cast %32 : vector<1x8x512xf32> to vector<8x512xf32>
    %34 = vector.shape_cast %31 : vector<8x512xf32> to vector<1x8x512xf32>
    tpu.vector_store %arg3[%c2_15, %c0_16, %c0_17], %34 {strides = array<i32>} : memref<3x8x512xf32, #tpu.memory_space<vmem>>, vector<1x8x512xf32>,
    %35 = arith.mulf %10, %22 : vector<8x512xf32>
    %cst_18 = arith.constant 2.000000e-01 : f32
    %36 = vector.broadcast %cst_18 : f32 to vector<8x512xf32>
    %37 = arith.mulf %35, %36 : vector<8x512xf32>
    %cst_19 = arith.constant 5.000000e+00 : f32
    %38 = vector.broadcast %cst_19 : f32 to vector<8x512xf32>
    %39 = arith.mulf %38, %22 : vector<8x512xf32>
    %40 = arith.mulf %37, %37 : vector<8x512xf32>
    %41 = arith.mulf %40, %40 : vector<8x512xf32>
    %42 = arith.mulf %41, %41 : vector<8x512xf32>
    %43 = arith.mulf %37, %42 : vector<8x512xf32>
    %cst_20 = arith.constant 4.500000e+01 : f32
    %44 = vector.broadcast %cst_20 : f32 to vector<8x512xf32>
    %45 = arith.mulf %44, %37 : vector<8x512xf32>
    %cst_21 = arith.constant 9.900000e+01 : f32
    %46 = vector.broadcast %cst_21 : f32 to vector<8x512xf32>
    %47 = arith.subf %46, %45 : vector<8x512xf32>
    %48 = arith.mulf %37, %47 : vector<8x512xf32>
    %cst_22 = arith.constant 5.500000e+01 : f32
    %49 = vector.broadcast %cst_22 : f32 to vector<8x512xf32>
    %50 = arith.subf %49, %48 : vector<8x512xf32>
    %51 = arith.mulf %43, %50 : vector<8x512xf32>
    %cst_23 = arith.constant 1.000000e+00 : f32
    %52 = vector.broadcast %cst_23 : f32 to vector<8x512xf32>
    %53 = arith.subf %52, %51 : vector<8x512xf32>
    %54 = arith.mulf %53, %39 : vector<8x512xf32>
    %cst_24 = arith.constant 3.14159274 : f32
    %55 = vector.broadcast %cst_24 : f32 to vector<8x512xf32>
    %56 = arith.mulf %55, %37 : vector<8x512xf32>
    %57 = math.sin %56 : vector<8x512xf32>
    %58 = math.cos %56 : vector<8x512xf32>
    %59 = arith.mulf %57, %54 : vector<8x512xf32>
    %c0_25 = arith.constant 0 : index
    %c0_26 = arith.constant 0 : index
    %c0_27 = arith.constant 0 : index
    %60 = vector.load %arg2[%c0_25, %c0_26, %c0_27] : memref<20x8x512xf32, #tpu.memory_space<vmem>>, vector<1x8x512xf32>
    %61 = vector.shape_cast %60 : vector<1x8x512xf32> to vector<8x512xf32>
    %62 = vector.shape_cast %59 : vector<8x512xf32> to vector<1x8x512xf32>
    tpu.vector_store %arg2[%c0_25, %c0_26, %c0_27], %62 {strides = array<i32>} : memref<20x8x512xf32, #tpu.memory_space<vmem>>, vector<1x8x512xf32>,
    %63 = arith.mulf %57, %58 : vector<8x512xf32>
    %64 = arith.mulf %58, %57 : vector<8x512xf32>
    %65 = arith.addf %63, %64 : vector<8x512xf32>
    %66 = arith.mulf %58, %58 : vector<8x512xf32>
    %67 = arith.mulf %57, %57 : vector<8x512xf32>
    %68 = arith.subf %66, %67 : vector<8x512xf32>
    %69 = arith.mulf %65, %54 : vector<8x512xf32>
    %c1_28 = arith.constant 1 : index
    %c0_29 = arith.constant 0 : index
    %c0_30 = arith.constant 0 : index
    %70 = vector.load %arg2[%c1_28, %c0_29, %c0_30] : memref<20x8x512xf32, #tpu.memory_space<vmem>>, vector<1x8x512xf32>
    %71 = vector.shape_cast %70 : vector<1x8x512xf32> to vector<8x512xf32>
    %72 = vector.shape_cast %69 : vector<8x512xf32> to vector<1x8x512xf32>
    tpu.vector_store %arg2[%c1_28, %c0_29, %c0_30], %72 {strides = array<i32>} : memref<20x8x512xf32, #tpu.memory_space<vmem>>, vector<1x8x512xf32>,
    %73 = arith.mulf %65, %58 : vector<8x512xf32>
    %74 = arith.mulf %68, %57 : vector<8x512xf32>
    %75 = arith.addf %73, %74 : vector<8x512xf32>
    %76 = arith.mulf %68, %58 : vector<8x512xf32>
    %77 = arith.mulf %65, %57 : vector<8x512xf32>
    %78 = arith.subf %76, %77 : vector<8x512xf32>
    %79 = arith.mulf %75, %54 : vector<8x512xf32>
    %c2_31 = arith.constant 2 : index
    %c0_32 = arith.constant 0 : index
    %c0_33 = arith.constant 0 : index
    %80 = vector.load %arg2[%c2_31, %c0_32, %c0_33] : memref<20x8x512xf32, #tpu.memory_space<vmem>>, vector<1x8x512xf32>
    %81 = vector.shape_cast %80 : vector<1x8x512xf32> to vector<8x512xf32>
    %82 = vector.shape_cast %79 : vector<8x512xf32> to vector<1x8x512xf32>
    tpu.vector_store %arg2[%c2_31, %c0_32, %c0_33], %82 {strides = array<i32>} : memref<20x8x512xf32, #tpu.memory_space<vmem>>, vector<1x8x512xf32>,
    %83 = arith.mulf %75, %58 : vector<8x512xf32>
    %84 = arith.mulf %78, %57 : vector<8x512xf32>
    %85 = arith.addf %83, %84 : vector<8x512xf32>
    %86 = arith.mulf %78, %58 : vector<8x512xf32>
    %87 = arith.mulf %75, %57 : vector<8x512xf32>
    %88 = arith.subf %86, %87 : vector<8x512xf32>
    %89 = arith.mulf %85, %54 : vector<8x512xf32>
    %c3 = arith.constant 3 : index
    %c0_34 = arith.constant 0 : index
    %c0_35 = arith.constant 0 : index
    %90 = vector.load %arg2[%c3, %c0_34, %c0_35] : memref<20x8x512xf32, #tpu.memory_space<vmem>>, vector<1x8x512xf32>
    %91 = vector.shape_cast %90 : vector<1x8x512xf32> to vector<8x512xf32>
    %92 = vector.shape_cast %89 : vector<8x512xf32> to vector<1x8x512xf32>
    tpu.vector_store %arg2[%c3, %c0_34, %c0_35], %92 {strides = array<i32>} : memref<20x8x512xf32, #tpu.memory_space<vmem>>, vector<1x8x512xf32>,
    %93 = arith.mulf %85, %58 : vector<8x512xf32>
    %94 = arith.mulf %88, %57 : vector<8x512xf32>
    %95 = arith.addf %93, %94 : vector<8x512xf32>
    %96 = arith.mulf %88, %58 : vector<8x512xf32>
    %97 = arith.mulf %85, %57 : vector<8x512xf32>
    %98 = arith.subf %96, %97 : vector<8x512xf32>
    %99 = arith.mulf %95, %54 : vector<8x512xf32>
    %c4 = arith.constant 4 : index
    %c0_36 = arith.constant 0 : index
    %c0_37 = arith.constant 0 : index
    %100 = vector.load %arg2[%c4, %c0_36, %c0_37] : memref<20x8x512xf32, #tpu.memory_space<vmem>>, vector<1x8x512xf32>
    %101 = vector.shape_cast %100 : vector<1x8x512xf32> to vector<8x512xf32>
    %102 = vector.shape_cast %99 : vector<8x512xf32> to vector<1x8x512xf32>
    tpu.vector_store %arg2[%c4, %c0_36, %c0_37], %102 {strides = array<i32>} : memref<20x8x512xf32, #tpu.memory_space<vmem>>, vector<1x8x512xf32>,
    %103 = arith.mulf %95, %58 : vector<8x512xf32>
    %104 = arith.mulf %98, %57 : vector<8x512xf32>
    %105 = arith.addf %103, %104 : vector<8x512xf32>
    %106 = arith.mulf %98, %58 : vector<8x512xf32>
    %107 = arith.mulf %95, %57 : vector<8x512xf32>
    %108 = arith.subf %106, %107 : vector<8x512xf32>
    %109 = arith.mulf %105, %54 : vector<8x512xf32>
    %c5 = arith.constant 5 : index
    %c0_38 = arith.constant 0 : index
    %c0_39 = arith.constant 0 : index
    %110 = vector.load %arg2[%c5, %c0_38, %c0_39] : memref<20x8x512xf32, #tpu.memory_space<vmem>>, vector<1x8x512xf32>
    %111 = vector.shape_cast %110 : vector<1x8x512xf32> to vector<8x512xf32>
    %112 = vector.shape_cast %109 : vector<8x512xf32> to vector<1x8x512xf32>
    tpu.vector_store %arg2[%c5, %c0_38, %c0_39], %112 {strides = array<i32>} : memref<20x8x512xf32, #tpu.memory_space<vmem>>, vector<1x8x512xf32>,
    %113 = arith.mulf %105, %58 : vector<8x512xf32>
    %114 = arith.mulf %108, %57 : vector<8x512xf32>
    %115 = arith.addf %113, %114 : vector<8x512xf32>
    %116 = arith.mulf %108, %58 : vector<8x512xf32>
    %117 = arith.mulf %105, %57 : vector<8x512xf32>
    %118 = arith.subf %116, %117 : vector<8x512xf32>
    %119 = arith.mulf %115, %54 : vector<8x512xf32>
    %c6 = arith.constant 6 : index
    %c0_40 = arith.constant 0 : index
    %c0_41 = arith.constant 0 : index
    %120 = vector.load %arg2[%c6, %c0_40, %c0_41] : memref<20x8x512xf32, #tpu.memory_space<vmem>>, vector<1x8x512xf32>
    %121 = vector.shape_cast %120 : vector<1x8x512xf32> to vector<8x512xf32>
    %122 = vector.shape_cast %119 : vector<8x512xf32> to vector<1x8x512xf32>
    tpu.vector_store %arg2[%c6, %c0_40, %c0_41], %122 {strides = array<i32>} : memref<20x8x512xf32, #tpu.memory_space<vmem>>, vector<1x8x512xf32>,
    %123 = arith.mulf %115, %58 : vector<8x512xf32>
    %124 = arith.mulf %118, %57 : vector<8x512xf32>
    %125 = arith.addf %123, %124 : vector<8x512xf32>
    %126 = arith.mulf %125, %54 : vector<8x512xf32>
    %c7 = arith.constant 7 : index
    %c0_42 = arith.constant 0 : index
    %c0_43 = arith.constant 0 : index
    %127 = vector.load %arg2[%c7, %c0_42, %c0_43] : memref<20x8x512xf32, #tpu.memory_space<vmem>>, vector<1x8x512xf32>
    %128 = vector.shape_cast %127 : vector<1x8x512xf32> to vector<8x512xf32>
    %129 = vector.shape_cast %126 : vector<8x512xf32> to vector<1x8x512xf32>
    tpu.vector_store %arg2[%c7, %c0_42, %c0_43], %129 {strides = array<i32>} : memref<20x8x512xf32, #tpu.memory_space<vmem>>, vector<1x8x512xf32>,
    %cst_44 = arith.constant 9.000000e+00 : f32
    %130 = vector.broadcast %cst_44 : f32 to vector<8x512xf32>
    %131 = arith.mulf %130, %56 : vector<8x512xf32>
    %132 = math.sin %131 : vector<8x512xf32>
    %133 = math.cos %131 : vector<8x512xf32>
    %134 = arith.mulf %132, %54 : vector<8x512xf32>
    %c8 = arith.constant 8 : index
    %c0_45 = arith.constant 0 : index
    %c0_46 = arith.constant 0 : index
    %135 = vector.load %arg2[%c8, %c0_45, %c0_46] : memref<20x8x512xf32, #tpu.memory_space<vmem>>, vector<1x8x512xf32>
    %136 = vector.shape_cast %135 : vector<1x8x512xf32> to vector<8x512xf32>
    %137 = vector.shape_cast %134 : vector<8x512xf32> to vector<1x8x512xf32>
    tpu.vector_store %arg2[%c8, %c0_45, %c0_46], %137 {strides = array<i32>} : memref<20x8x512xf32, #tpu.memory_space<vmem>>, vector<1x8x512xf32>,
    %138 = arith.mulf %132, %58 : vector<8x512xf32>
    %139 = arith.mulf %133, %57 : vector<8x512xf32>
    %140 = arith.addf %138, %139 : vector<8x512xf32>
    %141 = arith.mulf %133, %58 : vector<8x512xf32>
    %142 = arith.mulf %132, %57 : vector<8x512xf32>
    %143 = arith.subf %141, %142 : vector<8x512xf32>
    %144 = arith.mulf %140, %54 : vector<8x512xf32>
    %c9 = arith.constant 9 : index
    %c0_47 = arith.constant 0 : index
    %c0_48 = arith.constant 0 : index
    %145 = vector.load %arg2[%c9, %c0_47, %c0_48] : memref<20x8x512xf32, #tpu.memory_space<vmem>>, vector<1x8x512xf32>
    %146 = vector.shape_cast %145 : vector<1x8x512xf32> to vector<8x512xf32>
    %147 = vector.shape_cast %144 : vector<8x512xf32> to vector<1x8x512xf32>
    tpu.vector_store %arg2[%c9, %c0_47, %c0_48], %147 {strides = array<i32>} : memref<20x8x512xf32, #tpu.memory_space<vmem>>, vector<1x8x512xf32>,
    %148 = arith.mulf %140, %58 : vector<8x512xf32>
    %149 = arith.mulf %143, %57 : vector<8x512xf32>
    %150 = arith.addf %148, %149 : vector<8x512xf32>
    %151 = arith.mulf %143, %58 : vector<8x512xf32>
    %152 = arith.mulf %140, %57 : vector<8x512xf32>
    %153 = arith.subf %151, %152 : vector<8x512xf32>
    %154 = arith.mulf %150, %54 : vector<8x512xf32>
    %c10 = arith.constant 10 : index
    %c0_49 = arith.constant 0 : index
    %c0_50 = arith.constant 0 : index
    %155 = vector.load %arg2[%c10, %c0_49, %c0_50] : memref<20x8x512xf32, #tpu.memory_space<vmem>>, vector<1x8x512xf32>
    %156 = vector.shape_cast %155 : vector<1x8x512xf32> to vector<8x512xf32>
    %157 = vector.shape_cast %154 : vector<8x512xf32> to vector<1x8x512xf32>
    tpu.vector_store %arg2[%c10, %c0_49, %c0_50], %157 {strides = array<i32>} : memref<20x8x512xf32, #tpu.memory_space<vmem>>, vector<1x8x512xf32>,
    %158 = arith.mulf %150, %58 : vector<8x512xf32>
    %159 = arith.mulf %153, %57 : vector<8x512xf32>
    %160 = arith.addf %158, %159 : vector<8x512xf32>
    %161 = arith.mulf %153, %58 : vector<8x512xf32>
    %162 = arith.mulf %150, %57 : vector<8x512xf32>
    %163 = arith.subf %161, %162 : vector<8x512xf32>
    %164 = arith.mulf %160, %54 : vector<8x512xf32>
    %c11 = arith.constant 11 : index
    %c0_51 = arith.constant 0 : index
    %c0_52 = arith.constant 0 : index
    %165 = vector.load %arg2[%c11, %c0_51, %c0_52] : memref<20x8x512xf32, #tpu.memory_space<vmem>>, vector<1x8x512xf32>
    %166 = vector.shape_cast %165 : vector<1x8x512xf32> to vector<8x512xf32>
    %167 = vector.shape_cast %164 : vector<8x512xf32> to vector<1x8x512xf32>
    tpu.vector_store %arg2[%c11, %c0_51, %c0_52], %167 {strides = array<i32>} : memref<20x8x512xf32, #tpu.memory_space<vmem>>, vector<1x8x512xf32>,
    %168 = arith.mulf %160, %58 : vector<8x512xf32>
    %169 = arith.mulf %163, %57 : vector<8x512xf32>
    %170 = arith.addf %168, %169 : vector<8x512xf32>
    %171 = arith.mulf %163, %58 : vector<8x512xf32>
    %172 = arith.mulf %160, %57 : vector<8x512xf32>
    %173 = arith.subf %171, %172 : vector<8x512xf32>
    %174 = arith.mulf %170, %54 : vector<8x512xf32>
    %c12 = arith.constant 12 : index
    %c0_53 = arith.constant 0 : index
    %c0_54 = arith.constant 0 : index
    %175 = vector.load %arg2[%c12, %c0_53, %c0_54] : memref<20x8x512xf32, #tpu.memory_space<vmem>>, vector<1x8x512xf32>
    %176 = vector.shape_cast %175 : vector<1x8x512xf32> to vector<8x512xf32>
    %177 = vector.shape_cast %174 : vector<8x512xf32> to vector<1x8x512xf32>
    tpu.vector_store %arg2[%c12, %c0_53, %c0_54], %177 {strides = array<i32>} : memref<20x8x512xf32, #tpu.memory_space<vmem>>, vector<1x8x512xf32>,
    %178 = arith.mulf %170, %58 : vector<8x512xf32>
    %179 = arith.mulf %173, %57 : vector<8x512xf32>
    %180 = arith.addf %178, %179 : vector<8x512xf32>
    %181 = arith.mulf %173, %58 : vector<8x512xf32>
    %182 = arith.mulf %170, %57 : vector<8x512xf32>
    %183 = arith.subf %181, %182 : vector<8x512xf32>
    %184 = arith.mulf %180, %54 : vector<8x512xf32>
    %c13 = arith.constant 13 : index
    %c0_55 = arith.constant 0 : index
    %c0_56 = arith.constant 0 : index
    %185 = vector.load %arg2[%c13, %c0_55, %c0_56] : memref<20x8x512xf32, #tpu.memory_space<vmem>>, vector<1x8x512xf32>
    %186 = vector.shape_cast %185 : vector<1x8x512xf32> to vector<8x512xf32>
    %187 = vector.shape_cast %184 : vector<8x512xf32> to vector<1x8x512xf32>
    tpu.vector_store %arg2[%c13, %c0_55, %c0_56], %187 {strides = array<i32>} : memref<20x8x512xf32, #tpu.memory_space<vmem>>, vector<1x8x512xf32>,
    %188 = arith.mulf %180, %58 : vector<8x512xf32>
    %189 = arith.mulf %183, %57 : vector<8x512xf32>
    %190 = arith.addf %188, %189 : vector<8x512xf32>
    %191 = arith.mulf %183, %58 : vector<8x512xf32>
    %192 = arith.mulf %180, %57 : vector<8x512xf32>
    %193 = arith.subf %191, %192 : vector<8x512xf32>
    %194 = arith.mulf %190, %54 : vector<8x512xf32>
    %c14 = arith.constant 14 : index
    %c0_57 = arith.constant 0 : index
    %c0_58 = arith.constant 0 : index
    %195 = vector.load %arg2[%c14, %c0_57, %c0_58] : memref<20x8x512xf32, #tpu.memory_space<vmem>>, vector<1x8x512xf32>
    %196 = vector.shape_cast %195 : vector<1x8x512xf32> to vector<8x512xf32>
    %197 = vector.shape_cast %194 : vector<8x512xf32> to vector<1x8x512xf32>
    tpu.vector_store %arg2[%c14, %c0_57, %c0_58], %197 {strides = array<i32>} : memref<20x8x512xf32, #tpu.memory_space<vmem>>, vector<1x8x512xf32>,
    %198 = arith.mulf %190, %58 : vector<8x512xf32>
    %199 = arith.mulf %193, %57 : vector<8x512xf32>
    %200 = arith.addf %198, %199 : vector<8x512xf32>
    %201 = arith.mulf %200, %54 : vector<8x512xf32>
    %c15 = arith.constant 15 : index
    %c0_59 = arith.constant 0 : index
    %c0_60 = arith.constant 0 : index
    %202 = vector.load %arg2[%c15, %c0_59, %c0_60] : memref<20x8x512xf32, #tpu.memory_space<vmem>>, vector<1x8x512xf32>
    %203 = vector.shape_cast %202 : vector<1x8x512xf32> to vector<8x512xf32>
    %204 = vector.shape_cast %201 : vector<8x512xf32> to vector<1x8x512xf32>
    tpu.vector_store %arg2[%c15, %c0_59, %c0_60], %204 {strides = array<i32>} : memref<20x8x512xf32, #tpu.memory_space<vmem>>, vector<1x8x512xf32>,
    %cst_61 = arith.constant 1.700000e+01 : f32
    %205 = vector.broadcast %cst_61 : f32 to vector<8x512xf32>
    %206 = arith.mulf %205, %56 : vector<8x512xf32>
    %207 = math.sin %206 : vector<8x512xf32>
    %208 = math.cos %206 : vector<8x512xf32>
    %209 = arith.mulf %207, %54 : vector<8x512xf32>
    %c16 = arith.constant 16 : index
    %c0_62 = arith.constant 0 : index
    %c0_63 = arith.constant 0 : index
    %210 = vector.load %arg2[%c16, %c0_62, %c0_63] : memref<20x8x512xf32, #tpu.memory_space<vmem>>, vector<1x8x512xf32>
    %211 = vector.shape_cast %210 : vector<1x8x512xf32> to vector<8x512xf32>
    %212 = vector.shape_cast %209 : vector<8x512xf32> to vector<1x8x512xf32>
    tpu.vector_store %arg2[%c16, %c0_62, %c0_63], %212 {strides = array<i32>} : memref<20x8x512xf32, #tpu.memory_space<vmem>>, vector<1x8x512xf32>,
    %213 = arith.mulf %207, %58 : vector<8x512xf32>
    %214 = arith.mulf %208, %57 : vector<8x512xf32>
    %215 = arith.addf %213, %214 : vector<8x512xf32>
    %216 = arith.mulf %208, %58 : vector<8x512xf32>
    %217 = arith.mulf %207, %57 : vector<8x512xf32>
    %218 = arith.subf %216, %217 : vector<8x512xf32>
    %219 = arith.mulf %215, %54 : vector<8x512xf32>
    %c17 = arith.constant 17 : index
    %c0_64 = arith.constant 0 : index
    %c0_65 = arith.constant 0 : index
    %220 = vector.load %arg2[%c17, %c0_64, %c0_65] : memref<20x8x512xf32, #tpu.memory_space<vmem>>, vector<1x8x512xf32>
    %221 = vector.shape_cast %220 : vector<1x8x512xf32> to vector<8x512xf32>
    %222 = vector.shape_cast %219 : vector<8x512xf32> to vector<1x8x512xf32>
    tpu.vector_store %arg2[%c17, %c0_64, %c0_65], %222 {strides = array<i32>} : memref<20x8x512xf32, #tpu.memory_space<vmem>>, vector<1x8x512xf32>,
    %223 = arith.mulf %215, %58 : vector<8x512xf32>
    %224 = arith.mulf %218, %57 : vector<8x512xf32>
    %225 = arith.addf %223, %224 : vector<8x512xf32>
    %226 = arith.mulf %218, %58 : vector<8x512xf32>
    %227 = arith.mulf %215, %57 : vector<8x512xf32>
    %228 = arith.subf %226, %227 : vector<8x512xf32>
    %229 = arith.mulf %225, %54 : vector<8x512xf32>
    %c18 = arith.constant 18 : index
    %c0_66 = arith.constant 0 : index
    %c0_67 = arith.constant 0 : index
    %230 = vector.load %arg2[%c18, %c0_66, %c0_67] : memref<20x8x512xf32, #tpu.memory_space<vmem>>, vector<1x8x512xf32>
    %231 = vector.shape_cast %230 : vector<1x8x512xf32> to vector<8x512xf32>
    %232 = vector.shape_cast %229 : vector<8x512xf32> to vector<1x8x512xf32>
    tpu.vector_store %arg2[%c18, %c0_66, %c0_67], %232 {strides = array<i32>} : memref<20x8x512xf32, #tpu.memory_space<vmem>>, vector<1x8x512xf32>,
    %233 = arith.mulf %225, %58 : vector<8x512xf32>
    %234 = arith.mulf %228, %57 : vector<8x512xf32>
    %235 = arith.addf %233, %234 : vector<8x512xf32>
    %236 = arith.mulf %235, %54 : vector<8x512xf32>
    %c19 = arith.constant 19 : index
    %c0_68 = arith.constant 0 : index
    %c0_69 = arith.constant 0 : index
    %237 = vector.load %arg2[%c19, %c0_68, %c0_69] : memref<20x8x512xf32, #tpu.memory_space<vmem>>, vector<1x8x512xf32>
    %238 = vector.shape_cast %237 : vector<1x8x512xf32> to vector<8x512xf32>
    %239 = vector.shape_cast %236 : vector<8x512xf32> to vector<1x8x512xf32>
    tpu.vector_store %arg2[%c19, %c0_68, %c0_69], %239 {strides = array<i32>} : memref<20x8x512xf32, #tpu.memory_space<vmem>>, vector<1x8x512xf32>,
    return
  }
  func.func @transform_0(%arg0: i32) -> (i32, i32, i32) {
    %c0_i32 = arith.constant 0 : i32
    %c0_i32_0 = arith.constant 0 : i32
    %c0_i32_1 = arith.constant 0 : i32
    return %c0_i32, %arg0, %c0_i32_0 : i32, i32, i32
  }
  func.func @transform_1(%arg0: i32) -> (i32, i32, i32) {
    %c0_i32 = arith.constant 0 : i32
    %c0_i32_0 = arith.constant 0 : i32
    %c0_i32_1 = arith.constant 0 : i32
    return %c0_i32, %arg0, %c0_i32_0 : i32, i32, i32
  }
  func.func @transform_2(%arg0: i32) -> (i32, i32, i32) {
    %c0_i32 = arith.constant 0 : i32
    %c0_i32_0 = arith.constant 0 : i32
    %c0_i32_1 = arith.constant 0 : i32
    return %c0_i32, %arg0, %c0_i32_0 : i32, i32, i32
  }
}

</mosaic_0001>

<bundles_post_ra>
// kernel: tpu_custom_call.1
= control target key start
LH: loop header
LB: loop body
LE: loop exit
PB: predicated region body
PF: predicated region fallthrough
CT: control target
= control target key end

     0   :  { %8 = vsyncpa [#allocation3], 0  ;;  %s6845_s0 = inlined_call_operand.hbm [shape: f32[3,8,512], index: 0, kind: input, shape index: {}]   ;;  %s6846_s1 = inlined_call_operand.hbm [shape: f32[20,8,512], index: 1, kind: output, shape index: {0}]   ;;  %s6847_s2 = inlined_call_operand.hbm [shape: f32[3,8,512], index: 2, kind: output, shape index: {1}]  }
   0x1   :  { %9 = vsyncpa [#allocation4], 0 }
   0x2   :  { %10 = vsyncpa [#allocation7], 0  ;;  %s15_s11 = sshll.u32 %s6845_s0, 4  ;;  %s4692_s12 = smov [#allocation2]   ;;  %s16_s11 = int_to_ptr.hbm [resolvable:$true] %s15_s11 }
   0x3   :  { %s17_s13 = sshll.u32 %s4692_s12, 4  ;;  %s4693_s14 = smov 512   ;;  %s18_s13 = int_to_ptr.vmem [resolvable:$true] %s17_s13 }
   0x4   :  { %s4694_s15 = smov 32  }
   0x5   :  { %23 = dma.hbm_to_vmem [thread:$0]  %s16_s11, 1536, %s18_s13, [#allocation3], %s4693_s14, %s4693_s14, %s4694_s15  }
   0x6   :  { %4686 = dma.done.wait [#allocation3], 1536  }
   0x7   :  { %4687 = vsyncadd [#allocation3], 4294965760  ;;  %v4725_v0 = vld [vmem:[#allocation2] sm:$0xff]  ;;  %v4729_v6 = vld [vmem:[#allocation2 + $0x8] sm:$0xff]  ;;  %s4702_s0 = smov [#allocation6]   ;;  %s4498_s19 = sshll.u32 %s6847_s2, 4  ;;  %s4499_s19 = int_to_ptr.hbm [resolvable:$true] %s4498_s19 }
   0x8   :  { %v33_v1 = vld [vmem:[#allocation2 + $0x20] sm:$0xff]  ;;  %v42_v3 = vmul.f32 %v4725_v0, %v4725_v0  ;;  %v34_v7 = vld [vmem:[#allocation2 + $0x28] sm:$0xff]  ;;  %v43_v9 = vmul.f32 %v4729_v6, %v4729_v6  ;;  %v4733_v12 = vld [vmem:[#allocation2 + $0x10] sm:$0xff]  ;;  %s4496_s16 = sshll.u32 %s4702_s0, 4  ;;  %s4703_s2 = smov [#allocation5]   ;;  %s4497_s16 = int_to_ptr.vmem [resolvable:$true] %s4496_s16 }
   0x9   :  { %v38_v2 = vld [vmem:[#allocation2 + $0x40] sm:$0xff]  ;;  %v46_v4 = vmul.f32 %v33_v1, %v33_v1  ;;  %v39_v8 = vld [vmem:[#allocation2 + $0x48] sm:$0xff]  ;;  %v47_v10 = vmul.f32 %v34_v7, %v34_v7  ;;  %v35_v13 = vld [vmem:[#allocation2 + $0x30] sm:$0xff]  ;;  %v44_v16 = vmul.f32 %v4733_v12, %v4733_v12  ;;  %s4483_s20 = sshll.u32 %s4703_s2, 4  ;;  %s4485_s23 = sshll.u32 %s6846_s1, 4  ;;  %s4484_s20 = int_to_ptr.vmem [resolvable:$true] %s4483_s20  ;;  %s4486_s23 = int_to_ptr.hbm [resolvable:$true] %s4485_s23 }
   0xa   :  { %v54_v5 = vmul.f32 %v38_v2, %v38_v2  ;;  %v55_v11 = vmul.f32 %v39_v8, %v39_v8  ;;  %v40_v14 = vld [vmem:[#allocation2 + $0x50] sm:$0xff]  ;;  %v48_v17 = vmul.f32 %v35_v13, %v35_v13 }
   0xb   :  { %v50_v15 = vadd.f32 %v46_v4, %v42_v3  ;;  %v56_v18 = vmul.f32 %v40_v14, %v40_v14  ;;  %v51_v19 = vadd.f32 %v47_v10, %v43_v9 }
   0xc   :  { %v52_v21 = vadd.f32 %v48_v17, %v44_v16 }
   0xd   :  { %v58_v20 = vadd.f32 %v54_v5, %v50_v15  ;;  %v59_v22 = vadd.f32 %v55_v11, %v51_v19 }
   0xe   :  { %v60_v23 = vadd.f32 %v56_v18, %v52_v21 }
   0xf   :  { %vm62_vm0 = vcmp.gt.f32.partialorder %v58_v20, 0.0  ;;  %vm63_vm1 = vcmp.gt.f32.partialorder %v59_v22, 0.0 }
  0x10   :  { %v66_v24 = vsel %vm62_vm0, %v58_v20, 1.0  ;;  %v67_v25 = vsel %vm63_vm1, %v59_v22, 1.0  ;;  %vm64_vm2 = vcmp.gt.f32.partialorder %v60_v23, 0.0 }
  0x11   :  { %4600 = vrsqrt.f32 %v66_v24  ;;  %v68_v26 = vsel %vm64_vm2, %v60_v23, 1.0  ;;  %vm76_vm3 = vweird.f32 %v66_v24  ;;  %vm86_vm5 = vweird.f32 %v67_v25 }
  0x12   :  { %4602 = vrsqrt.f32 %v67_v25  ;;  %v110_v39 = vmul.f32 0.5, %v66_v24  ;;  %vm96_vm8 = vweird.f32 %v68_v26  ;;  %v111_v43 = vmul.f32 0.5, %v67_v25 }
  0x13   :  { %4604 = vrsqrt.f32 %v68_v26  ;;  %v112_v47 = vmul.f32 0.5, %v68_v26 }
  0x17   :  { %v4601_v27 = vpop.eup %4600 }
  0x18   :  { %v4603_v28 = vpop.eup %4602  ;;  %v71_v29 = vmul.f32 %v4601_v27, %v66_v24  ;;  %vm77_vm4 = vweird.f32 %v4601_v27 }
  0x19   :  { %v81_v30 = vmul.f32 %v4603_v28, %v67_v25  ;;  %v4605_v31 = vpop.eup %4604  ;;  %vm87_vm6 = vweird.f32 %v4603_v28  ;;  %vm78_vm7 = vmor %vm76_vm3, %vm77_vm4 }
  0x1a   :  { %v72_v32 = vmul.f32 %v4601_v27, %v71_v29  ;;  %v91_v34 = vmul.f32 %v4605_v31, %v68_v26  ;;  %vm97_vm9 = vweird.f32 %v4605_v31  ;;  %vm88_vm10 = vmor %vm86_vm5, %vm87_vm6 }
  0x1b   :  { %v82_v33 = vmul.f32 %v4603_v28, %v81_v30  ;;  %vm98_vm11 = vmor %vm96_vm8, %vm97_vm9 }
  0x1c   :  { %v73_v35 = vmul.f32 0.5, %v72_v32  ;;  %v92_v37 = vmul.f32 %v4605_v31, %v91_v34  ;;  %v6854_v34 = vmov 683565275  }
  0x1d   :  { %v83_v36 = vmul.f32 0.5, %v82_v33 }
  0x1e   :  { %v74_v38 = vsub.f32 1.5, %v73_v35  ;;  %v93_v41 = vmul.f32 0.5, %v92_v37 }
  0x1f   :  { %v84_v40 = vsub.f32 1.5, %v83_v36  ;;  %v6852_v36 = vmov 2475754826  }
  0x20   :  { %v75_v42 = vmul.f32 %v4601_v27, %v74_v38  ;;  %v94_v45 = vsub.f32 1.5, %v93_v41  ;;  %v6859_v38 = vmov 2131351028  }
  0x21   :  { %v85_v44 = vmul.f32 %v4603_v28, %v84_v40  ;;  %v6857_v40 = vmov 2102212464  }
  0x22   :  { %v79_v46 = vsel %vm78_vm7, %v4601_v27, %v75_v42  ;;  %v95_v50 = vmul.f32 %v4605_v31, %v94_v45  ;;  %v6863_v42 = vmov 920167782  }
  0x23   :  { %v114_v48 = vmul.f32 %v110_v39, %v79_v46  ;;  %v89_v49 = vsel %vm88_vm10, %v4603_v28, %v85_v44 }
  0x24   :  { %v115_v51 = vmul.f32 %v111_v43, %v89_v49  ;;  %v99_v53 = vsel %vm98_vm11, %v4605_v31, %v95_v50 }
  0x25   :  { %v118_v52 = vmul.f32 %v114_v48, %v79_v46  ;;  %v116_v55 = vmul.f32 %v112_v47, %v99_v53 }
  0x26   :  { %v119_v54 = vmul.f32 %v115_v51, %v89_v49  ;;  %v6861_v51 = vmov 1326507024  }
  0x27   :  { %v122_v56 = vsub.f32 1.5, %v118_v52  ;;  %v120_v58 = vmul.f32 %v116_v55, %v99_v53 }
  0x28   :  { %v123_v57 = vsub.f32 1.5, %v119_v54 }
  0x29   :  { %v4737_v59 = vmul.f32 %v122_v56, %v79_v46  ;;  %v124_v61 = vsub.f32 1.5, %v120_v58 }
  0x2a   :  { %v4739_v60 = vmul.f32 %v123_v57, %v89_v49 }
  0x2b   :  { %v130_v62 = vmul.f32 %v4737_v59, %v4725_v0  ;;  %v156_v63 = vmul.f32 %v4737_v59, %v58_v20  ;;  %v4745_v2 = vmul.f32 %v124_v61, %v99_v53 }
  0x2c   :  { %v157_v1 = vmul.f32 %v4739_v60, %v59_v22 }
  0x2d   :  { %134 = vst [vmem:[#allocation6] sm:$0xff] %v130_v62  ;;  %v4747_v3 = vmul.f32 0.2, %v156_v63  ;;  %v158_v7 = vmul.f32 %v4745_v2, %v60_v23 }
  0x2e   :  { %v4749_v4 = vmul.f32 0.2, %v157_v1 }
  0x2f   :  { %v4752_v5 = vmul.f32 3.1415927, %v4747_v3  ;;  %v4764_v14 = vmul.f32 0.2, %v158_v7 }
  0x30   :  { %v4756_v8 = vmul.f32 3.1415927, %v4749_v4 }
  0x31   :  { %6882 = vst [vmem:[#allocation11_spill] sm:$0xff] %v4752_v5  ;;  %v216_v0 = vand.u32 2147483647, %v4752_v5  ;;  %v219_v9 = vand.u32 2139095040, %v4752_v5  ;;  %v4769_v21 = vmul.f32 3.1415927, %v4764_v14 }
  0x32   :  { %v374_v10 = vand.u32 2139095040, %v4756_v8  ;;  %v371_v13 = vand.u32 2147483647, %v4756_v8 }
  0x33   :  { %v223_v11 = vand.u32 8388607, %v216_v0  ;;  %v220_v15 = vshrl.u32 %v219_v9, 23  ;;  %6883 = vst [vmem:[#allocation12_spill] sm:$0xff] %v4769_v21  ;;  %v529_v24 = vand.u32 2139095040, %v4769_v21 }
  0x34   :  { %v375_v16 = vshrl.u32 %v374_v10, 23  ;;  %v378_v20 = vand.u32 8388607, %v371_v13 }
  0x35   :  { %v4516_v17 = vadd.s32 4294967169, %v220_v15  ;;  %v224_v19 = vor.u32 8388608, %v223_v11  ;;  %v4778_v32 = vshrl.u32 %v529_v24, 23 }
  0x36   :  { %v4519_v18 = vadd.s32 4294967169, %v375_v16  ;;  %v379_v27 = vor.u32 8388608, %v378_v20 }
  0x37   :  { %v226_v22 = vadd.s32 1, %v4516_v17  ;;  %v4772_v26 = vshll.u32 %v224_v19, 8 }
  0x38   :  { %v381_v23 = vadd.s32 1, %v4519_v18  ;;  %v4786_v45 = vshll.u32 %v379_v27, 8 }
  0x39   :  { %vm227_vm12 = vcmp.gt.s32.totalorder %v226_v22, 0  ;;  %v265_v44 = vand.u32 65535, %v4772_v26  ;;  %v266_v49 = vshrl.u32 %v4772_v26, 16 }
  0x3a   :  { %vm382_vm13 = vcmp.gt.s32.totalorder %v381_v23, 0  ;;  %v228_v25 = vsel %vm227_vm12, %v226_v22, 0 }
  0x3b   :  { %v383_v28 = vsel %vm382_vm13, %v381_v23, 0  ;;  %v230_v29 = vand.u32 31, %v228_v25  ;;  %v4774_v30 = vshrl.u32 %v228_v25, 5 }
  0x3c   :  { %v4776_v31 = vand.u32 31, %v383_v28  ;;  %v4806_v1 = vshrl.u32 %v383_v28, 5 }
  0x3d   :  { %v231_v33 = vsub.s32 32, %v230_v29  ;;  %v233_v35 = vshll.u32 %v6854_v34, %v230_v29  ;;  %v236_v37 = vshll.u32 %v6852_v36, %v230_v29  ;;  %v239_v39 = vshll.u32 %v6859_v38, %v230_v29 }
  0x3e   :  { %v242_v41 = vshll.u32 %v6857_v40, %v230_v29  ;;  %v245_v43 = vshll.u32 %v6863_v42, %v230_v29  ;;  %vm248_vm14 = vcmp.lt.s32.totalorder %v4774_v30, 1  ;;  %vm251_vm15 = vcmp.lt.s32.totalorder %v4774_v30, 4 }
  0x3f   :  { %v234_v46 = vshrl.u32 %v6852_v36, %v231_v33  ;;  %v237_v47 = vshrl.u32 %v6859_v38, %v231_v33  ;;  %v240_v48 = vshrl.u32 %v6857_v40, %v231_v33  ;;  %v243_v50 = vshrl.u32 %v6863_v42, %v231_v33 }
  0x40   :  { %v246_v52 = vshrl.u32 %v6861_v51, %v231_v33  ;;  %v4797_v56 = vsub.s32 32, %v4776_v31  ;;  %v232_v57 = vshrl.u32 %v6854_v34, %v231_v33  ;;  %vm250_vm0 = vcmp.lt.s32.totalorder %v4774_v30, 3 }
  0x41   :  { %v235_v53 = vor.u32 %v234_v46, %v233_v35  ;;  %v238_v54 = vor.u32 %v237_v47, %v236_v37  ;;  %v241_v55 = vor.u32 %v240_v48, %v239_v39  ;;  %v244_v58 = vor.u32 %v243_v50, %v242_v41 }
  0x42   :  { %v247_v61 = vor.u32 %v246_v52, %v245_v43  ;;  %vm249_vm1 = vcmp.lt.s32.totalorder %v4774_v30, 2  ;;  %v388_v10 = vshll.u32 %v6854_v34, %v4776_v31  ;;  %v391_v11 = vshll.u32 %v6852_v36, %v4776_v31 }
  0x43   :  { %v256_v62 = vsel %vm248_vm14, %v235_v53, %v238_v54  ;;  %v260_v63 = vsel %vm248_vm14, %v238_v54, %v241_v55  ;;  %v257_v7 = vsel %vm251_vm15, %v244_v58, 920167782  ;;  %v253_v15 = vsel %vm251_vm15, %v241_v55, 2102212464 }
  0x44   :  { %v261_v9 = vsel %vm251_vm15, %v247_v61, 1326507024  ;;  %v258_v16 = vsel %vm250_vm0, %v241_v55, %v257_v7  ;;  %v389_v18 = vshrl.u32 %v6852_v36, %v4797_v56  ;;  %v252_v19 = vsel %vm248_vm14, %v232_v57, %v235_v53 }
  0x45   :  { %v262_v17 = vsel %vm250_vm0, %v244_v58, %v261_v9  ;;  %v259_v20 = vsel %vm249_vm1, %v256_v62, %v258_v16  ;;  %v392_v23 = vshrl.u32 %v6859_v38, %v4797_v56  ;;  %v254_v29 = vsel %vm250_vm0, %v238_v54, %v253_v15 }
  0x46   :  { %v263_v22 = vsel %vm249_vm1, %v260_v63, %v262_v17  ;;  %v289_v27 = vand.u32 65535, %v259_v20  ;;  %v290_v28 = vshrl.u32 %v259_v20, 16  ;;  %v4834_v33 = vor.u32 %v389_v18, %v388_v10 }
  0x47   :  { %v267_v24 = vand.u32 65535, %v263_v22  ;;  %v268_v25 = vshrl.u32 %v263_v22, 16  ;;  %v4836_v35 = vor.u32 %v392_v23, %v391_v11  ;;  %v394_v37 = vshll.u32 %v6859_v38, %v4776_v31 }
  0x48   :  { %v395_v46 = vshrl.u32 %v6857_v40, %v4797_v56  ;;  %v291_v48 = vmul.u32 %v289_v27, %v265_v44  ;;  %v292_v50 = vmul.u32 %v290_v28, %v265_v44  ;;  %v293_v52 = vmul.u32 %v289_v27, %v266_v49 }
  0x49   :  { %v269_v39 = vmul.u32 %v267_v24, %v265_v44  ;;  %v270_v41 = vmul.u32 %v268_v25, %v265_v44  ;;  %v271_v43 = vmul.u32 %v267_v24, %v266_v49  ;;  %v272_v47 = vmul.u32 %v268_v25, %v266_v49 }
  0x4a   :  { %v294_v57 = vmul.u32 %v290_v28, %v266_v49  ;;  %v295_v61 = vshll.u32 %v292_v50, 16  ;;  %v296_v62 = vshrl.u32 %v292_v50, 16  ;;  %v297_v63 = vshll.u32 %v293_v52, 16 }
  0x4b   :  { %v273_v53 = vshll.u32 %v270_v41, 16  ;;  %v274_v55 = vshrl.u32 %v270_v41, 16  ;;  %v275_v54 = vshll.u32 %v271_v43, 16  ;;  %v276_v58 = vshrl.u32 %v271_v43, 16 }
  0x4c   :  { %v298_v9 = vshrl.u32 %v293_v52, 16  ;;  %v397_v10 = vshll.u32 %v6857_v40, %v4776_v31  ;;  %v6850_v11 = vmov 0   ;;  %vm299_vm3 = vc.u32 %v291_v48, %v295_v61 }
  0x4d   :  { %vm277_vm2 = vc.u32 %v269_v39, %v273_v53  ;;  %v279_v7 = vadd.s32 %v273_v53, %v269_v39  ;;  %v301_v44 = vadd.s32 %v295_v61, %v291_v48  ;;  %v398_v16 = vshrl.u32 %v6863_v42, %v4797_v56 }
  0x4e   :  { %v278_v15 = vsel %vm277_vm2, 1, %v6850_v11  ;;  %v300_v49 = vsel %vm299_vm3, 1, %v6850_v11  ;;  %v400_v18 = vshll.u32 %v6863_v42, %v4776_v31  ;;  %v396_v23 = vor.u32 %v395_v46, %v394_v37 }
  0x4f   :  { %v280_v17 = vadd.s32 %v278_v15, %v272_v47  ;;  %vm281_vm4 = vc.u32 %v279_v7, %v275_v54  ;;  %v302_v22 = vadd.s32 %v300_v49, %v294_v57  ;;  %vm303_vm5 = vc.u32 %v301_v44, %v297_v63 }
  0x50   :  { %v282_v20 = vsel %vm281_vm4, 1, %v6850_v11  ;;  %v304_v25 = vsel %vm303_vm5, 1, %v6850_v11  ;;  %v399_v27 = vor.u32 %v398_v16, %v397_v10  ;;  %v401_v28 = vshrl.u32 %v6861_v51, %v4797_v56 }
  0x51   :  { %v284_v24 = vadd.s32 %v282_v20, %v280_v17  ;;  %v4854_v39 = vadd.s32 %v301_v44, %v297_v63  ;;  %v306_v41 = vadd.s32 %v304_v25, %v302_v22  ;;  %vm403_vm6 = vcmp.lt.s32.totalorder %v4806_v1, 1 }
  0x52   :  { %vm405_vm7 = vcmp.lt.s32.totalorder %v4806_v1, 3  ;;  %v402_v43 = vor.u32 %v401_v28, %v400_v18  ;;  %vm404_vm8 = vcmp.lt.s32.totalorder %v4806_v1, 2  ;;  %vm406_vm9 = vcmp.lt.s32.totalorder %v4806_v1, 4 }
  0x53   :  { %v285_v31 = vadd.s32 %v284_v24, %v274_v55  ;;  %v255_v37 = vsel %vm249_vm1, %v252_v19, %v254_v29  ;;  %v307_v46 = vadd.s32 %v306_v41, %v296_v62  ;;  %v411_v47 = vsel %vm403_vm6, %v4834_v33, %v4836_v35 }
  0x54   :  { %v412_v48 = vsel %vm406_vm9, %v399_v27, 920167782  ;;  %v415_v53 = vsel %vm403_vm6, %v4836_v35, %v396_v23  ;;  %v420_v30 = vand.u32 65535, %v4786_v45  ;;  %v416_v55 = vsel %vm406_vm9, %v402_v43, 1326507024 }
  0x55   :  { %v4868_v50 = vadd.s32 %v285_v31, %v276_v58  ;;  %v413_v52 = vsel %vm405_vm7, %v396_v23, %v412_v48  ;;  %v308_v19 = vadd.s32 %v307_v46, %v298_v9  ;;  %v421_v54 = vshrl.u32 %v4786_v45, 16 }
  0x56   :  { %v414_v29 = vsel %vm404_vm8, %v411_v47, %v413_v52  ;;  %v309_v57 = vmul.u32 %v4772_v26, %v255_v37  ;;  %v417_v58 = vsel %vm405_vm7, %v399_v27, %v416_v55  ;;  %v4522_v9 = vadd.s32 4294967169, %v4778_v32 }
  0x57   :  { %vm311_vm10 = vc.u32 %v4868_v50, %v4854_v39  ;;  %v444_v61 = vand.u32 65535, %v414_v29  ;;  %v312_v62 = vadd.s32 1, %v308_v19  ;;  %v418_v63 = vsel %vm404_vm8, %v415_v53, %v417_v58 }
  0x58   :  { %v445_v7 = vshrl.u32 %v414_v29, 16  ;;  %v422_v10 = vand.u32 65535, %v418_v63  ;;  %v423_v15 = vshrl.u32 %v418_v63, 16  ;;  %v387_v26 = vshrl.u32 %v6854_v34, %v4797_v56 }
  0x59   :  { %v313_v44 = vsel %vm311_vm10, %v312_v62, %v308_v19  ;;  %v448_v17 = vmul.u32 %v444_v61, %v421_v54  ;;  %v446_v22 = vmul.u32 %v444_v61, %v420_v30  ;;  %v536_v27 = vadd.s32 1, %v4522_v9 }
  0x5a   :  { %v447_v16 = vmul.u32 %v445_v7, %v420_v30  ;;  %v314_v49 = vadd.s32 %v313_v44, %v309_v57  ;;  %v424_v18 = vmul.u32 %v422_v10, %v420_v30  ;;  %v425_v20 = vmul.u32 %v423_v15, %v420_v30 }
  0x5b   :  { %v426_v24 = vmul.u32 %v422_v10, %v421_v54  ;;  %v408_v41 = vsel %vm406_vm9, %v396_v23, 2102212464  ;;  %v427_v32 = vmul.u32 %v423_v15, %v421_v54  ;;  %v407_v43 = vsel %vm403_vm6, %v387_v26, %v4834_v33 }
  0x5c   :  { %v450_v25 = vshll.u32 %v447_v16, 16  ;;  %v315_v28 = vadd.s32 536870912, %v314_v49  ;;  %v428_v31 = vshll.u32 %v425_v20, 16  ;;  %v449_v37 = vmul.u32 %v445_v7, %v421_v54 }
  0x5d   :  { %v430_v56 = vshll.u32 %v426_v24, 16  ;;  %v452_v46 = vshll.u32 %v448_v17, 16  ;;  %v409_v52 = vsel %vm405_vm7, %v4836_v35, %v408_v41  ;;  %v429_v33 = vshrl.u32 %v425_v20, 16 }
  0x5e   :  { %v4896_v47 = vshrl.u32 %v315_v28, 30  ;;  %vm432_vm11 = vc.u32 %v424_v18, %v428_v31  ;;  %v434_v48 = vadd.s32 %v428_v31, %v424_v18  ;;  %vm454_vm12 = vc.u32 %v446_v22, %v450_v25 }
  0x5f   :  { %v433_v23 = vsel %vm432_vm11, 1, %v6850_v11  ;;  %v455_v53 = vsel %vm454_vm12, 1, %v6850_v11  ;;  %v456_v30 = vadd.s32 %v450_v25, %v446_v22  ;;  %v451_v54 = vshrl.u32 %v447_v16, 16 }
  0x60   :  { %v317_v19 = vshll.u32 %v4896_v47, 30  ;;  %v435_v29 = vadd.s32 %v433_v23, %v427_v32  ;;  %vm436_vm13 = vc.u32 %v434_v48, %v430_v56  ;;  %v457_v57 = vadd.s32 %v455_v53, %v449_v37 }
  0x61   :  { %v437_v55 = vsel %vm436_vm13, 1, %v6850_v11  ;;  %vm458_vm14 = vc.u32 %v456_v30, %v452_v46  ;;  %v431_v61 = vshrl.u32 %v426_v24, 16  ;;  %v453_v63 = vshrl.u32 %v448_v17, 16 }
  0x62   :  { %v318_v58 = vsub.s32 %v314_v49, %v317_v19  ;;  %v439_v62 = vadd.s32 %v437_v55, %v435_v29  ;;  %v459_v35 = vsel %vm458_vm14, 1, %v6850_v11  ;;  %vm537_vm15 = vcmp.gt.s32.totalorder %v536_v27, 0 }
  0x63   :  { %v461_v7 = vadd.s32 %v459_v35, %v457_v57  ;;  %v4906_v15 = vadd.s32 %v456_v30, %v452_v46  ;;  %v410_v44 = vsel %vm404_vm8, %v407_v43, %v409_v52  ;;  %v538_v22 = vsel %vm537_vm15, %v536_v27, 0 }
  0x64   :  { %vm319_vm0 = vcmp.lt.s32.totalorder %v318_v58, 0  ;;  %v320_v9 = vsub.s32 0, %v318_v58  ;;  %v440_v10 = vadd.s32 %v439_v62, %v429_v33  ;;  %v464_v24 = vmul.u32 %v4786_v45, %v410_v44 }
  0x65   :  { %v462_v26 = vadd.s32 %v461_v7, %v451_v54  ;;  %v540_v28 = vand.u32 31, %v538_v22  ;;  %v310_v56 = vadd.s32 %v4854_v39, %v4868_v50  ;;  %v526_v45 = vand.u32 2147483647, %v4769_v21 }
  0x66   :  { %v321_v16 = vsel %vm319_vm0, %v320_v9, %v318_v58  ;;  %v4910_v18 = vadd.s32 %v440_v10, %v431_v61  ;;  %v131_v48 = vmul.f32 %v4739_v60, %v4729_v6  ;;  %v4922_v52 = vshrl.u32 %v538_v22, 5 }
  0x67   :  { %v322_v49 = vclz %v321_v16  ;;  %v463_v20 = vadd.s32 %v462_v26, %v453_v63  ;;  %v4915_v43 = vsub.s32 32, %v540_v28  ;;  %v546_v23 = vshll.u32 %v6852_v36, %v540_v28 }
  0x68   :  { %vm466_vm1 = vc.u32 %v4910_v18, %v4906_v15  ;;  %v549_v53 = vshll.u32 %v6859_v38, %v540_v28  ;;  %v555_v50 = vshll.u32 %v6863_v42, %v540_v28  ;;  %135 = vst [vmem:[#allocation6 + $0x8] sm:$0xff] %v131_v48  ;;  %v533_v57 = vand.u32 8388607, %v526_v45 }
  0x69   :  { %v4517_v17 = vadd.s32 4294967294, %v322_v49  ;;  %v467_v25 = vadd.s32 1, %v463_v20  ;;  %v547_v19 = vshrl.u32 %v6859_v38, %v4915_v43  ;;  %v550_v39 = vshrl.u32 %v6857_v40, %v4915_v43 }
  0x6a   :  { %v556_v6 = vshrl.u32 %v6861_v51, %v4915_v43  ;;  %v552_v61 = vshll.u32 %v6857_v40, %v540_v28  ;;  %vm558_vm3 = vcmp.lt.s32.totalorder %v4922_v52, 1  ;;  %v534_v26 = vor.u32 8388608, %v533_v57 }
  0x6b   :  { %vm4518_vm2 = vcmp.lt.s32.totalorder %v4517_v17, 0  ;;  %v468_v41 = vsel %vm466_vm1, %v467_v25, %v463_v20  ;;  %v4939_v35 = vor.u32 %v547_v19, %v546_v23  ;;  %v4941_v63 = vor.u32 %v550_v39, %v549_v53 }
  0x6c   :  { %v325_v32 = vsel %vm4518_vm2, 0, %v4517_v17  ;;  %v469_v1 = vadd.s32 %v468_v41, %v464_v24  ;;  %v557_v10 = vor.u32 %v556_v6, %v555_v50  ;;  %vm561_vm5 = vcmp.lt.s32.totalorder %v4922_v52, 4 }
  0x6d   :  { %v330_v31 = vsub.s32 4294967266, %v325_v32  ;;  %v326_v37 = vsub.s32 32, %v325_v32  ;;  %v327_v33 = vshll.u32 %v318_v58, %v325_v32  ;;  %v553_v58 = vshrl.u32 %v6863_v42, %v4915_v43 }
  0x6e   :  { %v470_v46 = vadd.s32 536870912, %v469_v1  ;;  %vm560_vm6 = vcmp.lt.s32.totalorder %v4922_v52, 3  ;;  %vm559_vm7 = vcmp.lt.s32.totalorder %v4922_v52, 2  ;;  %v570_v20 = vsel %vm558_vm3, %v4939_v35, %v4941_v63 }
  0x6f   :  { %v331_v27 = vadd.s32 127, %v330_v31  ;;  %v328_v29 = vshrl.u32 %v310_v56, %v326_v37  ;;  %v554_v49 = vor.u32 %v553_v58, %v552_v61  ;;  %v571_v25 = vsel %vm561_vm5, %v557_v10, 1326507024 }
  0x70   :  { %v4926_v30 = vshrl.u32 %v470_v46, 30  ;;  %v4957_v32 = vshll.u32 %v534_v26, 8  ;;  %v543_v56 = vshll.u32 %v6854_v34, %v540_v28  ;;  %v544_v46 = vshrl.u32 %v6852_v36, %v4915_v43  ;;  %v4988_v26 = vld [vmem:[#allocation2 + $0x18] sm:$0xff] }
  0x71   :  { %v332_v55 = vshll.u32 %v331_v27, 23  ;;  %v329_v7 = vor.u32 %v328_v29, %v327_v33  ;;  %v572_v41 = vsel %vm560_vm6, %v554_v49, %v571_v25  ;;  %v465_v27 = vadd.s32 %v4906_v15, %v4910_v18 }
  0x72   :  { %v472_v54 = vshll.u32 %v4926_v30, 30  ;;  %v573_v31 = vsel %vm559_vm7, %v570_v20, %v572_v41  ;;  %v4967_v23 = vand.u32 65535, %v4957_v32  ;;  %v168_v19 = vmul.f32 %v4747_v3, %v4747_v3 }
  0x73   :  { %v333_v9 = vor.u32 4788187, %v332_v55  ;;  %v336_v24 = vcvt.s32.f32 %v329_v7  ;;  %v578_v53 = vshrl.u32 %v573_v31, 16  ;;  %v184_v39 = vmul.f32 45.0, %v4747_v3 }
  0x74   :  { %v473_v62 = vsub.s32 %v469_v1, %v472_v54  ;;  %v4973_v29 = vshrl.u32 %v4957_v32, 16  ;;  %v577_v15 = vand.u32 65535, %v573_v31  ;;  %v4975_v6 = vor.u32 %v544_v46, %v543_v56 }
  0x75   :  { %v334_v22 = vand.u32 2147483647, %v333_v9  ;;  %vm218_vm9 = vcmp.lt.s32.totalorder %v4752_v5, 0  ;;  %v4979_v57 = vmul.u32 %v578_v53, %v4967_v23  ;;  %v172_v61 = vmul.f32 %v168_v19, %v168_v19 }
  0x76   :  { %vm474_vm4 = vcmp.lt.s32.totalorder %v473_v62, 0  ;;  %v475_v44 = vsub.s32 0, %v473_v62  ;;  %v188_v58 = vsub.f32 99.0, %v184_v39  ;;  %v132_v10 = vmul.f32 %v4745_v2, %v4733_v12 }
  0x77   :  { %v337_v37 = vmul.f32 %v336_v24, %v334_v22  ;;  %vm4992_vm10 = vcmp.le.f32.partialorder %v216_v0, 0.7853982  ;;  %v579_v12 = vmul.u32 %v577_v15, %v4967_v23  ;;  %v5003_v22 = vld [vmem:[#allocation2 + $0x38] sm:$0xff]  ;;  %v583_v25 = vshll.u32 %v4979_v57, 16 }
  0x78   :  { %v476_v16 = vsel %vm474_vm4, %v475_v44, %v473_v62  ;;  %v4986_v44 = vmul.u32 %v577_v15, %v4973_v29  ;;  %136 = vst [vmem:[#allocation6 + $0x10] sm:$0xff] %v132_v10  ;;  %v176_v41 = vmul.f32 %v172_v61, %v172_v61  ;;  %v45_v31 = vmul.f32 %v4988_v26, %v4988_v26  ;;  %v5025_v15 = vld [vmem:[#allocation2 + $0x58] sm:$0xff] }
  0x79   :  { %v477_v17 = vclz %v476_v16  ;;  %v338_v18 = vxor.u32 2147483648, %v337_v37  ;;  %v49_v46 = vmul.f32 %v5003_v22, %v5003_v22  ;;  %v582_v19 = vmul.u32 %v578_v53, %v4973_v29 }
  0x7a   :  { %vm587_vm11 = vc.u32 %v579_v12, %v583_v25  ;;  %v589_v39 = vadd.s32 %v583_v25, %v579_v12  ;;  %vm373_vm13 = vcmp.lt.s32.totalorder %v4756_v8, 0  ;;  %vm5045_vm14 = vcmp.le.f32.partialorder %v371_v13, 0.7853982 }
  0x7b   :  { %v4520_v1 = vadd.s32 4294967294, %v477_v17  ;;  %v339_v20 = vsel %vm218_vm9, %v338_v18, %v337_v37  ;;  %v180_v18 = vmul.f32 %v176_v41, %v4747_v3  ;;  %v169_v13 = vmul.f32 %v4749_v4, %v4749_v4 }
  0x7c   :  { %v5015_v56 = vsel %vm4992_vm10, %v4752_v5, %v339_v20 }
  0x7d   :  { %vm4521_vm8 = vcmp.lt.s32.totalorder %v4520_v1, 0 }
  0x7e   :  { %v480_v48 = vsel %vm4521_vm8, 0, %v4520_v1  ;;  %v192_v1 = vmul.f32 %v188_v58, %v4747_v3 }
  0x7f   :  { %v481_v50 = vsub.s32 32, %v480_v48  ;;  %v482_v28 = vshll.u32 %v473_v62, %v480_v48  ;;  %v485_v33 = vsub.s32 4294967266, %v480_v48  ;;  %v567_v62 = vsel %vm561_vm5, %v554_v49, 920167782 }
  0x80   :  { %v566_v49 = vsel %vm558_vm3, %v4975_v6, %v4939_v35  ;;  %v568_v0 = vsel %vm560_vm6, %v4941_v63, %v567_v62  ;;  %v53_v62 = vadd.f32 %v49_v46, %v45_v31 }
  0x81   :  { %v483_v55 = vshrl.u32 %v465_v27, %v481_v50  ;;  %v486_v54 = vadd.s32 127, %v485_v33  ;;  %v585_v27 = vshll.u32 %v4986_v44, 16  ;;  %v569_v48 = vsel %vm559_vm7, %v566_v49, %v568_v0 }
  0x82   :  { %v340_v50 = vsub.s32 4, %v4896_v47  ;;  %v588_v33 = vsel %vm587_vm11, 1, %v6850_v11  ;;  %v599_v58 = vand.u32 65535, %v569_v48  ;;  %v600_v53 = vshrl.u32 %v569_v48, 16 }
  0x83   :  { %v484_v7 = vor.u32 %v483_v55, %v482_v28  ;;  %v487_v9 = vshll.u32 %v486_v54, 23  ;;  %v196_v55 = vsub.f32 55.0, %v192_v1  ;;  %v5030_v54 = vmul.f32 %v5015_v56, %v5015_v56 }
  0x84   :  { %vm591_vm12 = vc.u32 %v589_v39, %v585_v27  ;;  %v341_v3 = vsel %vm218_vm9, %v340_v50, %v4896_v47  ;;  %v601_v0 = vmul.u32 %v599_v58, %v4967_v23  ;;  %v602_v47 = vmul.u32 %v600_v53, %v4967_v23 }
  0x85   :  { %v488_v24 = vor.u32 4788187, %v487_v9  ;;  %v491_v17 = vcvt.s32.f32 %v484_v7  ;;  %v590_v7 = vadd.s32 %v588_v33, %v582_v19  ;;  %v57_v9 = vmul.f32 %v5025_v15, %v5025_v15 }
  0x86   :  { %v592_v10 = vsel %vm591_vm12, 1, %v6850_v11  ;;  %v5039_v20 = vmul.f32 %v196_v55, %v180_v18  ;;  %v345_v49 = vmul.f32 -0.001358992, %v5030_v54  ;;  %v352_v12 = vmul.f32 -0.00019511016, %v5030_v54 }
  0x87   :  { %v489_v37 = vand.u32 2147483647, %v488_v24  ;;  %v603_v25 = vmul.u32 %v599_v58, %v4973_v29  ;;  %v343_v41 = vsel %vm4992_vm10, 0, %v341_v3  ;;  %v584_v1 = vshrl.u32 %v4979_v57, 16 }
  0x88   :  { %v594_v31 = vadd.s32 %v592_v10, %v590_v7  ;;  %v542_v27 = vshrl.u32 %v6854_v34, %v4915_v43  ;;  %v604_v46 = vmul.u32 %v600_v53, %v4973_v29  ;;  %v605_v48 = vshll.u32 %v602_v47, 16 }
  0x89   :  { %v492_v28 = vmul.f32 %v491_v17, %v489_v37  ;;  %v5057_v37 = vadd.f32 %v57_v9, %v53_v62  ;;  %v185_v23 = vmul.f32 45.0, %v4749_v4  ;;  %v563_v57 = vsel %vm561_vm5, %v4941_v63, 2102212464 }
  0x8a   :  { %v607_v19 = vshll.u32 %v603_v25, 16  ;;  %v346_v39 = vadd.f32 0.041655596, %v345_v49  ;;  %v353_v50 = vadd.f32 0.008332121, %v352_v12  ;;  %vm609_vm15 = vc.u32 %v601_v0, %v605_v48 }
  0x8b   :  { %v493_v61 = vxor.u32 2147483648, %v492_v28  ;;  %v586_v43 = vshrl.u32 %v4986_v44, 16  ;;  %v595_v29 = vadd.s32 %v594_v31, %v584_v1  ;;  %v610_v33 = vsel %vm609_vm15, 1, %v6850_v11 }
  0x8c   :  { %vm65_vm0 = vcmp.gt.f32.partialorder %v5057_v37, 0.0  ;;  %v606_v55 = vshrl.u32 %v602_v47, 16  ;;  %v562_v63 = vsel %vm558_vm3, %v542_v27, %v4975_v6  ;;  %v564_v44 = vsel %vm560_vm6, %v4939_v35, %v563_v57 }
  0x8d   :  { %v494_v17 = vsel %vm373_vm13, %v493_v61, %v492_v28  ;;  %v611_v28 = vadd.s32 %v605_v48, %v601_v0  ;;  %v612_v61 = vadd.s32 %v610_v33, %v604_v46  ;;  %v69_v53 = vsel %vm65_vm0, %v5057_v37, 1.0 }
  0x8e   :  { %v5068_v16 = vsel %vm5045_vm14, %v4756_v8, %v494_v17  ;;  %v173_v7 = vmul.f32 %v169_v13, %v169_v13  ;;  %v608_v62 = vshrl.u32 %v603_v25, 16  ;;  %4606 = vrsqrt.f32 %v69_v53 }
  0x8f   :  { %v5078_v18 = vmul.f32 %v5068_v16, %v5068_v16  ;;  %vm613_vm1 = vc.u32 %v611_v28, %v607_v19  ;;  %v347_v3 = vmul.f32 %v346_v39, %v5030_v54  ;;  %v354_v10 = vmul.f32 %v353_v50, %v5030_v54 }
  0x90   :  { %v614_v58 = vsel %vm613_vm1, 1, %v6850_v11  ;;  %v5090_v49 = vadd.s32 %v595_v29, %v586_v43  ;;  %v5092_v12 = vadd.s32 %v611_v28, %v607_v19  ;;  %v189_v6 = vsub.f32 99.0, %v185_v23 }
  0x91   :  { %v616_v9 = vadd.s32 %v614_v58, %v612_v61  ;;  %v507_v17 = vmul.f32 -0.00019511016, %v5078_v18  ;;  %v565_v35 = vsel %vm559_vm7, %v562_v63, %v564_v44  ;;  %v164_v47 = vmul.f32 5.0, %v4737_v59 }
  0x92   :  { %v204_v25 = vsub.f32 1.0, %v5039_v20  ;;  %v360_v1 = vadd.s32 3, %v343_v41  ;;  %v177_v31 = vmul.f32 %v173_v7, %v173_v7  ;;  %v495_v13 = vsub.s32 4, %v4926_v30 }
  0x93   :  { %v617_v0 = vadd.s32 %v616_v9, %v606_v55  ;;  %v348_v46 = vadd.f32 -0.4999988, %v347_v3  ;;  %v355_v48 = vadd.f32 -0.16666654, %v354_v10  ;;  %v619_v57 = vmul.u32 %v4957_v32, %v565_v35 }
  0x94   :  { %vm621_vm2 = vc.u32 %v5090_v49, %v5092_v12  ;;  %v4607_v23 = vpop.eup %4606  ;;  %v193_v52 = vmul.f32 %v189_v6, %v4749_v4  ;;  %v500_v19 = vmul.f32 -0.001358992, %v5078_v18  ;;  %v508_v39 = vadd.f32 0.008332121, %v507_v17 }
  0x95   :  { %v618_v27 = vadd.s32 %v617_v0, %v608_v62  ;;  %v5105_v20 = vmul.f32 %v204_v25, %v164_v47  ;;  %v5107_v28 = vand.u32 3, %v360_v1  ;;  %v101_v43 = vmul.f32 %v4607_v23, %v69_v53 }
  0x96   :  { %v5109_v29 = vand.u32 3, %v343_v41  ;;  %v181_v33 = vmul.f32 %v177_v31, %v4749_v4  ;;  %v496_v32 = vsel %vm373_vm13, %v495_v13, %v4926_v30  ;;  %v356_v61 = vmul.f32 %v355_v48, %v5030_v54 }
  0x97   :  { %v622_v50 = vadd.s32 1, %v618_v27  ;;  %6888 = vst [vmem:[#allocation13_spill] sm:$0xff] %v5105_v20  ;;  %v102_v44 = vmul.f32 %v4607_v23, %v101_v43  ;;  %v5117_v58 = vmul.f32 9.0, %v4752_v5  ;;  %v349_v7 = vmul.f32 %v348_v46, %v5030_v54 }
  0x98   :  { %v197_v62 = vsub.f32 55.0, %v193_v52  ;;  %v501_v9 = vadd.f32 0.041655596, %v500_v19  ;;  %v509_v41 = vmul.f32 %v508_v39, %v5078_v18  ;;  %vm106_vm3 = vweird.f32 %v69_v53 }
  0x99   :  { %v623_v55 = vsel %vm621_vm2, %v622_v50, %v618_v27  ;;  %6889 = vst [vmem:[#allocation14_spill] sm:$0xff] %v5117_v58  ;;  %v103_v4 = vmul.f32 0.5, %v102_v44  ;;  %vm107_vm4 = vweird.f32 %v4607_v23  ;;  %vm366_vm5 = vcmp.eq.s32.totalorder %v5107_v28, 2 }
  0x9a   :  { %v624_v63 = vadd.s32 %v623_v55, %v619_v57  ;;  %v498_v30 = vsel %vm5045_vm14, 0, %v496_v32  ;;  %v170_v10 = vmul.f32 %v4764_v14, %v4764_v14  ;;  %v1682_v6 = vand.u32 2139095040, %v5117_v58  ;;  %vm108_vm7 = vmor %vm106_vm3, %vm107_vm4 }
  0x9b   :  { %v357_v17 = vadd.f32 1.0, %v356_v61  ;;  %v186_v54 = vmul.f32 45.0, %v4764_v14  ;;  %v104_v0 = vsub.f32 1.5, %v103_v4  ;;  %v350_v47 = vadd.f32 1.0, %v349_v7 }
  0x9c   :  { %v625_v3 = vadd.s32 536870912, %v624_v63  ;;  %vm363_vm6 = vcmp.eq.s32.totalorder %v5107_v28, 0  ;;  %v201_v25 = vmul.f32 %v197_v62, %v181_v33  ;;  %v113_v1 = vmul.f32 0.5, %v69_v53 }
  0x9d   :  { %v1683_v31 = vshrl.u32 %v1682_v6, 23  ;;  %v502_v24 = vmul.f32 %v501_v9, %v5078_v18  ;;  %v510_v13 = vadd.f32 -0.16666654, %v509_v41  ;;  %v105_v46 = vmul.f32 %v4607_v23, %v104_v0 }
  0x9e   :  { %v5128_v35 = vshrl.u32 %v625_v3, 30  ;;  %vm982_vm8 = vcmp.eq.s32.totalorder %v5109_v29, 0  ;;  %v165_v48 = vmul.f32 5.0, %v4739_v60  ;;  %v174_v57 = vmul.f32 %v170_v10, %v170_v10 }
  0x9f   :  { %v4540_v52 = vadd.s32 4294967169, %v1683_v31  ;;  %v358_v19 = vmul.f32 %v357_v17, %v5015_v56  ;;  %v190_v39 = vsub.f32 99.0, %v186_v54  ;;  %v109_v43 = vsel %vm108_vm7, %v4607_v23, %v105_v46 }
  0xa0   :  { %v627_v27 = vshll.u32 %v5128_v35, 30  ;;  %vm362_vm9 = vcmp.lt.s32.totalorder %v5107_v28, 2  ;;  %v367_v53 = vxor.u32 2147483648, %v350_v47  ;;  %v205_v33 = vsub.f32 1.0, %v201_v25 }
  0xa1   :  { %v515_v32 = vadd.s32 3, %v498_v30  ;;  %v117_v55 = vmul.f32 %v113_v1, %v109_v43  ;;  %v503_v61 = vadd.f32 -0.4999988, %v502_v24  ;;  %v511_v44 = vmul.f32 %v510_v13, %v5078_v18 }
  0xa2   :  { %v5136_v50 = vsub.s32 %v624_v63, %v627_v27  ;;  %vm981_vm11 = vcmp.lt.s32.totalorder %v5109_v29, 2  ;;  %vm985_vm12 = vcmp.eq.s32.totalorder %v5109_v29, 2  ;;  %v1689_v63 = vadd.s32 1, %v4540_v52 }
  0xa3   :  { %v121_v56 = vmul.f32 %v117_v55, %v109_v43  ;;  %v364_v23 = vxor.u32 2147483648, %v358_v19  ;;  %v178_v62 = vmul.f32 %v174_v57, %v174_v57  ;;  %v194_v9 = vmul.f32 %v190_v39, %v4764_v14 }
  0xa4   :  { %vm629_vm10 = vcmp.lt.s32.totalorder %v5136_v50, 0  ;;  %v630_v7 = vsub.s32 0, %v5136_v50  ;;  %vm528_vm13 = vcmp.lt.s32.totalorder %v4769_v21, 0  ;;  %vm359_vm14 = vweird.f32 %v4752_v5 }
  0xa5   :  { %v5148_v3 = vmul.f32 %v205_v33, %v165_v48  ;;  %v5150_v4 = vand.u32 3, %v515_v32  ;;  %v125_v6 = vsub.f32 1.5, %v121_v56  ;;  %v368_v17 = vsel %vm366_vm5, %v367_v53, %v358_v19 }
  0xa6   :  { %v631_v41 = vsel %vm629_vm10, %v630_v7, %v5136_v50  ;;  %v504_v54 = vmul.f32 %v503_v61, %v5078_v18  ;;  %v512_v0 = vadd.f32 1.0, %v511_v44  ;;  %v5155_v25 = vand.u32 3, %v498_v30 }
  0xa7   :  { %6890 = vst [vmem:[#allocation15_spill] sm:$0xff] %v5148_v3  ;;  %v632_v10 = vclz %v631_v41  ;;  %v987_v1 = vsel %vm985_vm12, %v367_v53, %v358_v19  ;;  %vm5161_vm15 = vcmp.le.f32.partialorder %v526_v45, 0.7853982  ;;  %v5165_v13 = vmul.f32 %v125_v6, %v109_v43 }
  0xa8   :  { %vm1690_vm0 = vcmp.gt.s32.totalorder %v1689_v63, 0  ;;  %v365_v27 = vsel %vm363_vm6, %v350_v47, %v364_v23  ;;  %v984_v18 = vsel %vm982_vm8, %v350_v47, %v364_v23  ;;  %v182_v30 = vmul.f32 %v178_v62, %v4764_v14 }
  0xa9   :  { %v4523_v24 = vadd.s32 4294967294, %v632_v10  ;;  %v198_v46 = vsub.f32 55.0, %v194_v9  ;;  %v620_v48 = vadd.s32 %v5092_v12, %v5090_v49  ;;  %v650_v45 = vsub.s32 4, %v5128_v35 }
  0xaa   :  { %v159_v57 = vmul.f32 %v5165_v13, %v5057_v37  ;;  %v505_v52 = vadd.f32 1.0, %v504_v54  ;;  %v513_v19 = vmul.f32 %v512_v0, %v5068_v16  ;;  %vm517_vm2 = vcmp.lt.s32.totalorder %v5150_v4, 2 }
  0xab   :  { %vm4524_vm1 = vcmp.lt.s32.totalorder %v4523_v24, 0  ;;  %v1691_v43 = vsel %vm1690_vm0, %v1689_v63, 0  ;;  %v369_v49 = vsel %vm362_vm9, %v365_v27, %v368_v17  ;;  %vm518_vm3 = vcmp.eq.s32.totalorder %v5150_v4, 0 }
  0xac   :  { %v635_v39 = vsel %vm4524_vm1, 0, %v4523_v24  ;;  %v5180_v33 = vmul.f32 0.2, %v159_v57  ;;  %vm521_vm4 = vcmp.eq.s32.totalorder %v5150_v4, 2  ;;  %vm1136_vm5 = vcmp.eq.s32.totalorder %v5155_v25, 0 }
  0xad   :  { %v636_v47 = vsub.s32 32, %v635_v39  ;;  %v637_v14 = vshll.u32 %v5136_v50, %v635_v39  ;;  %v640_v53 = vsub.s32 4294967266, %v635_v39  ;;  %v988_v37 = vsel %vm981_vm11, %v984_v18, %v987_v1 }
  0xae   :  { %v651_v50 = vsel %vm528_vm13, %v650_v45, %v5128_v35  ;;  %v519_v32 = vxor.u32 2147483648, %v513_v19  ;;  %v522_v55 = vxor.u32 2147483648, %v505_v52  ;;  %v5192_v61 = vmul.f32 %v198_v46, %v182_v30 }
  0xaf   :  { %v638_v16 = vshrl.u32 %v620_v48, %v636_v47  ;;  %v641_v12 = vadd.s32 127, %v640_v53  ;;  %v5194_v28 = vand.u32 31, %v1691_v43  ;;  %v133_v56 = vmul.f32 %v5165_v13, %v4988_v26 }
  0xb0   :  { %v5199_v29 = vmul.f32 3.1415927, %v5180_v33  ;;  %v5203_v63 = vsel %vm359_vm14, nan, %v369_v49  ;;  %vm1139_vm6 = vcmp.eq.s32.totalorder %v5155_v25, 2  ;;  %v5207_v35 = vmul.f32 5.0, %v4745_v2 }
  0xb1   :  { %v639_v44 = vor.u32 %v638_v16, %v637_v14  ;;  %v642_v7 = vshll.u32 %v641_v12, 23  ;;  %6894 = vst [vmem:[#allocation17_spill] sm:$0xff] %v5203_v63  ;;  %v653_v23 = vsel %vm5161_vm15, 0, %v651_v50  ;;  %v6848_v41 = vand.u32 2147483647, %v5117_v58 }
  0xb2   :  { %6893 = vst [vmem:[#allocation16_spill] sm:$0xff] %v5199_v29  ;;  %v684_v26 = vand.u32 2139095040, %v5199_v29  ;;  %v5215_v10 = vsel %vm359_vm14, nan, %v988_v37  ;;  %v520_v6 = vsel %vm518_vm3, %v505_v52, %v519_v32  ;;  %v523_v17 = vsel %vm521_vm4, %v522_v55, %v513_v19 }
  0xb3   :  { %v643_v62 = vor.u32 4788187, %v642_v7  ;;  %v646_v9 = vcvt.s32.f32 %v639_v44  ;;  %137 = vst [vmem:[#allocation6 + $0x18] sm:$0xff] %v133_v56  ;;  %v5222_v54 = vsub.s32 32, %v5194_v28  ;;  %v6849_v24 = vand.u32 2147483647, %v5199_v29 }
  0xb4   :  { %6895 = vst [vmem:[#allocation18_spill] sm:$0xff] %v5215_v10  ;;  %v685_v27 = vshrl.u32 %v684_v26, 23  ;;  %v5228_v18 = vsel %vm1136_vm5, %v505_v52, %v519_v32  ;;  %v5232_v30 = vsel %vm1139_vm6, %v522_v55, %v513_v19  ;;  %v670_v46 = vadd.s32 3, %v653_v23 }
  0xb5   :  { %v644_v1 = vand.u32 2147483647, %v643_v62  ;;  %v171_v48 = vmul.f32 %v5180_v33, %v5180_v33  ;;  %v5238_v45 = vsel %vm517_vm2, %v520_v6, %v523_v17  ;;  %v5242_v47 = vand.u32 8388607, %v6848_v41 }
  0xb6   :  { %v4525_v39 = vadd.s32 4294967169, %v685_v27  ;;  %v1696_v52 = vshll.u32 %v6854_v34, %v5194_v28  ;;  %v1697_v19 = vshrl.u32 %v6852_v36, %v5222_v54  ;;  %v1699_v14 = vshll.u32 %v6852_v36, %v5194_v28 }
  0xb7   :  { %v647_v57 = vmul.f32 %v646_v9, %v644_v1  ;;  %v1700_v4 = vshrl.u32 %v6859_v38, %v5222_v54  ;;  %v187_v49 = vmul.f32 45.0, %v5180_v33  ;;  %v688_v37 = vand.u32 8388607, %v6849_v24 }
  0xb8   :  { %v691_v16 = vadd.s32 1, %v4525_v39  ;;  %v5255_v12 = vand.u32 3, %v670_v46  ;;  %v175_v50 = vmul.f32 %v171_v48, %v171_v48  ;;  %v5257_v32 = vshrl.u32 %v1691_v43, 5 }
  0xb9   :  { %v648_v53 = vxor.u32 2147483648, %v647_v57  ;;  %v1705_v55 = vshll.u32 %v6857_v40, %v5194_v28  ;;  %v5263_v7 = vand.u32 3, %v653_v23  ;;  %v5271_v26 = vor.u32 %v1697_v19, %v1696_v52 }
  0xba   :  { %vm692_vm7 = vcmp.gt.s32.totalorder %v691_v16, 0  ;;  %v5273_v43 = vor.u32 %v1700_v4, %v1699_v14  ;;  %v191_v17 = vsub.f32 99.0, %v187_v49  ;;  %v689_v23 = vor.u32 8388608, %v688_v37 }
  0xbb   :  { %v649_v44 = vsel %vm528_vm13, %v648_v53, %v647_v57  ;;  %v693_v9 = vsel %vm692_vm7, %v691_v16, 0  ;;  %v5279_v27 = vmul.f32 %v175_v50, %v175_v50  ;;  %v1702_v31 = vshll.u32 %v6859_v38, %v5194_v28 }
  0xbc   :  { %v5269_v62 = vsel %vm5161_vm15, %v4769_v21, %v649_v44  ;;  %v695_v1 = vand.u32 31, %v693_v9  ;;  %v5281_v46 = vshrl.u32 %v693_v9, 5  ;;  %v1703_v48 = vshrl.u32 %v6857_v40, %v5222_v54 }
  0xbd   :  { %v5277_v6 = vmul.f32 %v5269_v62, %v5269_v62  ;;  %v5295_v37 = vmul.f32 %v191_v17, %v5180_v33  ;;  %v5298_v50 = vshll.u32 %v689_v23, 8  ;;  %v1706_v44 = vshrl.u32 %v6863_v42, %v5222_v54 }
  0xbe   :  { %v696_v52 = vsub.s32 32, %v695_v1  ;;  %v698_v19 = vshll.u32 %v6854_v34, %v695_v1  ;;  %v701_v14 = vshll.u32 %v6852_v36, %v695_v1  ;;  %v704_v4 = vshll.u32 %v6859_v38, %v695_v1 }
  0xbf   :  { %v655_v57 = vmul.f32 -0.001358992, %v5277_v6  ;;  %v662_v39 = vmul.f32 -0.00019511016, %v5277_v6  ;;  %v707_v53 = vshll.u32 %v6857_v40, %v695_v1  ;;  %v710_v49 = vshll.u32 %v6863_v42, %v695_v1 }
  0xc0   :  { %v699_v16 = vshrl.u32 %v6852_v36, %v696_v52  ;;  %v702_v9 = vshrl.u32 %v6859_v38, %v696_v52  ;;  %v705_v41 = vshrl.u32 %v6857_v40, %v696_v52  ;;  %v708_v0 = vshrl.u32 %v6863_v42, %v696_v52 }
  0xc1   :  { %v711_v24 = vshrl.u32 %v6861_v51, %v696_v52  ;;  %v656_v56 = vadd.f32 0.041655596, %v655_v57  ;;  %v663_v1 = vadd.f32 0.008332121, %v662_v39  ;;  %vm713_vm8 = vcmp.lt.s32.totalorder %v5281_v46, 1 }
  0xc2   :  { %v700_v11 = vor.u32 %v699_v16, %v698_v19  ;;  %v703_v17 = vor.u32 %v702_v9, %v701_v14  ;;  %v706_v36 = vor.u32 %v705_v41, %v704_v4  ;;  %v709_v23 = vor.u32 %v708_v0, %v707_v53 }
  0xc3   :  { %v712_v34 = vor.u32 %v711_v24, %v710_v49  ;;  %vm715_vm9 = vcmp.lt.s32.totalorder %v5281_v46, 3  ;;  %v5308_v5 = vor.u32 %v1703_v48, %v1702_v31  ;;  %v5312_v40 = vshll.u32 %v6863_v42, %v5194_v28 }
  0xc4   :  { %v5316_v38 = vshrl.u32 %v6861_v51, %v5222_v54  ;;  %vm714_vm10 = vcmp.lt.s32.totalorder %v5281_v46, 2  ;;  %vm716_vm11 = vcmp.lt.s32.totalorder %v5281_v46, 4  ;;  %v721_v41 = vsel %vm713_vm8, %v700_v11, %v703_v17 }
  0xc5   :  { %v5322_v0 = vor.u32 %v1706_v44, %v1705_v55  ;;  %v657_v24 = vmul.f32 %v656_v56, %v5277_v6  ;;  %v722_v31 = vsel %vm716_vm11, %v709_v23, 920167782  ;;  %v730_v48 = vand.u32 65535, %v5298_v50 }
  0xc6   :  { %vm1711_vm12 = vcmp.lt.s32.totalorder %v5257_v32, 1  ;;  %v664_v28 = vmul.f32 %v663_v1, %v5277_v6  ;;  %v723_v57 = vsel %vm715_vm9, %v706_v36, %v722_v31  ;;  %v725_v39 = vsel %vm713_vm8, %v703_v17, %v706_v36 }
  0xc7   :  { %v726_v19 = vsel %vm716_vm11, %v712_v34, 1326507024  ;;  %v6896_v14 = vmov 683565275   ;;  %v724_v55 = vsel %vm714_vm10, %v721_v41, %v723_v57  ;;  %v731_v56 = vshrl.u32 %v5298_v50, 16 }
  0xc8   :  { %v697_v4 = vshrl.u32 %v6896_v14, %v696_v52  ;;  %v1710_v53 = vor.u32 %v5316_v38, %v5312_v40  ;;  %v718_v49 = vsel %vm716_vm11, %v706_v36, 2102212464  ;;  %v727_v16 = vsel %vm715_vm9, %v709_v23, %v726_v19 }
  0xc9   :  { %v754_v44 = vand.u32 65535, %v724_v55  ;;  %v755_v9 = vshrl.u32 %v724_v55, 16  ;;  %v658_v1 = vadd.f32 -0.4999988, %v657_v24  ;;  %v728_v34 = vsel %vm714_vm10, %v725_v39, %v727_v16 }
  0xca   :  { %vm1713_vm13 = vcmp.lt.s32.totalorder %v5257_v32, 3  ;;  %vm1714_vm14 = vcmp.lt.s32.totalorder %v5257_v32, 4  ;;  %v665_v52 = vadd.f32 -0.16666654, %v664_v28  ;;  %v732_v41 = vand.u32 65535, %v728_v34 }
  0xcb   :  { %v733_v31 = vshrl.u32 %v728_v34, 16  ;;  %v757_v57 = vmul.u32 %v755_v9, %v730_v48  ;;  %vm1712_vm15 = vcmp.lt.s32.totalorder %v5257_v32, 2  ;;  %v717_v36 = vsel %vm713_vm8, %v697_v4, %v700_v11 }
  0xcc   :  { %v719_v38 = vsel %vm715_vm9, %v703_v17, %v718_v49  ;;  %v1695_v40 = vshrl.u32 %v6896_v14, %v5222_v54  ;;  %v5354_v23 = vsel %vm1714_vm14, %v5308_v5, 2102212464  ;;  %v734_v24 = vmul.u32 %v732_v41, %v730_v48 }
  0xcd   :  { %v735_v28 = vmul.u32 %v733_v31, %v730_v48  ;;  %v736_v39 = vmul.u32 %v732_v41, %v731_v56  ;;  %v758_v19 = vmul.u32 %v754_v44, %v731_v56  ;;  %v756_v55 = vmul.u32 %v754_v44, %v730_v48 }
  0xce   :  { %v760_v16 = vshll.u32 %v757_v57, 16  ;;  %v1719_v11 = vsel %vm1711_vm12, %v5271_v26, %v5273_v43  ;;  %v1720_v54 = vsel %vm1714_vm14, %v5322_v0, 920167782  ;;  %v659_v17 = vmul.f32 %v658_v1, %v5277_v6 }
  0xcf   :  { %v666_v4 = vmul.f32 %v665_v52, %v5277_v6  ;;  %v737_v49 = vmul.u32 %v733_v31, %v731_v56  ;;  %v738_v34 = vshll.u32 %v735_v28, 16  ;;  %v720_v41 = vsel %vm714_vm10, %v717_v36, %v719_v38 }
  0xd0   :  { %v739_v48 = vshrl.u32 %v735_v28, 16  ;;  %v740_v44 = vshll.u32 %v736_v39, 16  ;;  %v759_v51 = vmul.u32 %v755_v9, %v731_v56  ;;  %v741_v42 = vshrl.u32 %v736_v39, 16 }
  0xd1   :  { %vm742_vm0 = vc.u32 %v734_v24, %v738_v34  ;;  %v744_v14 = vadd.s32 %v738_v34, %v734_v24  ;;  %v762_v58 = vshll.u32 %v758_v19, 16  ;;  %v6897_v10 = vmov 0  }
  0xd2   :  { %v743_v3 = vsel %vm742_vm0, 1, %v6897_v10  ;;  %v761_v63 = vshrl.u32 %v757_v57, 16  ;;  %vm764_vm1 = vc.u32 %v756_v55, %v760_v16  ;;  %v766_v20 = vadd.s32 %v760_v16, %v756_v55 }
  0xd3   :  { %v745_v1 = vadd.s32 %v743_v3, %v737_v49  ;;  %vm746_vm2 = vc.u32 %v744_v14, %v740_v44  ;;  %v763_v6 = vshrl.u32 %v758_v19, 16  ;;  %v765_v52 = vsel %vm764_vm1, 1, %v6897_v10 }
  0xd4   :  { %v747_v46 = vsel %vm746_vm2, 1, %v6897_v10  ;;  %v767_v31 = vadd.s32 %v765_v52, %v759_v51  ;;  %vm768_vm3 = vc.u32 %v766_v20, %v762_v58  ;;  %v5370_v36 = vadd.s32 %v766_v20, %v762_v58 }
  0xd5   :  { %v749_v56 = vadd.s32 %v747_v46, %v745_v1  ;;  %v769_v9 = vsel %vm768_vm3, 1, %v6897_v10  ;;  %v1721_v57 = vsel %vm1713_vm13, %v5308_v5, %v1720_v54  ;;  %v1723_v3 = vsel %vm1711_vm12, %v5273_v43, %v5308_v5 }
  0xd6   :  { %v771_v14 = vadd.s32 %v769_v9, %v767_v31  ;;  %v1722_v38 = vsel %vm1712_vm15, %v1719_v11, %v1721_v57  ;;  %v1724_v51 = vsel %vm1714_vm14, %v1710_v53, 1326507024  ;;  %v6898_v20 = vor.u32 8388608, %v5242_v47 }
  0xd7   :  { %v750_v24 = vadd.s32 %v749_v56, %v739_v48  ;;  %v1725_v28 = vsel %vm1713_vm13, %v5322_v0, %v1724_v51  ;;  %v1752_v39 = vand.u32 65535, %v1722_v38  ;;  %v1753_v19 = vshrl.u32 %v1722_v38, 16 }
  0xd8   :  { %v5386_v58 = vshll.u32 %v6898_v20, 8  ;;  %v772_v55 = vadd.s32 %v771_v14, %v761_v63  ;;  %v1726_v5 = vsel %vm1712_vm15, %v1723_v3, %v1725_v28  ;;  %v1715_v47 = vsel %vm1711_vm12, %v1695_v40, %v5271_v26 }
  0xd9   :  { %v5395_v53 = vadd.s32 %v750_v24, %v741_v42  ;;  %v1730_v54 = vand.u32 65535, %v1726_v5  ;;  %v1731_v49 = vshrl.u32 %v1726_v5, 16  ;;  %v5400_v34 = vadd.f32 1.0, %v659_v17 }
  0xda   :  { %v1728_v16 = vand.u32 65535, %v5386_v58  ;;  %v1729_v11 = vshrl.u32 %v5386_v58, 16  ;;  %v773_v0 = vadd.s32 %v772_v55, %v763_v6  ;;  %v774_v44 = vmul.u32 %v5298_v50, %v720_v41 }
  0xdb   :  { %vm776_vm4 = vc.u32 %v5395_v53, %v5370_v36  ;;  %v667_v42 = vadd.f32 1.0, %v666_v4  ;;  %v1717_v26 = vsel %vm1713_vm13, %v5273_v43, %v5354_v23  ;;  %v5411_v20 = vmul.f32 9.0, %v4756_v8 }
  0xdc   :  { %v1755_v48 = vmul.u32 %v1753_v19, %v1728_v16  ;;  %v1756_v63 = vmul.u32 %v1752_v39, %v1729_v11  ;;  %v1732_v1 = vmul.u32 %v1730_v54, %v1728_v16  ;;  %v1733_v52 = vmul.u32 %v1731_v49, %v1728_v16 }
  0xdd   :  { %v777_v46 = vadd.s32 1, %v773_v0  ;;  %v1734_v31 = vmul.u32 %v1730_v54, %v1729_v11  ;;  %v1754_v56 = vmul.u32 %v1752_v39, %v1728_v16  ;;  %v1735_v40 = vmul.u32 %v1731_v49, %v1729_v11 }
  0xde   :  { %v1736_v17 = vshll.u32 %v1733_v52, 16  ;;  %v1758_v6 = vshll.u32 %v1755_v48, 16  ;;  %v1757_v50 = vmul.u32 %v1753_v19, %v1729_v11  ;;  %v1760_v41 = vshll.u32 %v1756_v63, 16 }
  0xdf   :  { %v778_v9 = vsel %vm776_vm4, %v777_v46, %v773_v0  ;;  %v1738_v57 = vshll.u32 %v1734_v31, 16  ;;  %v1737_v14 = vshrl.u32 %v1733_v52, 16  ;;  %v1759_v39 = vshrl.u32 %v1755_v48, 16 }
  0xe0   :  { %v779_v3 = vadd.s32 %v778_v9, %v774_v44  ;;  %vm1740_vm5 = vc.u32 %v1732_v1, %v1736_v17  ;;  %v1742_v38 = vadd.s32 %v1736_v17, %v1732_v1  ;;  %vm1762_vm6 = vc.u32 %v1754_v56, %v1758_v6 }
  0xe1   :  { %v1741_v4 = vsel %vm1740_vm5, 1, %v6897_v10  ;;  %v1764_v51 = vadd.s32 %v1758_v6, %v1754_v56  ;;  %v1763_v23 = vsel %vm1762_vm6, 1, %v6897_v10  ;;  %v1739_v5 = vshrl.u32 %v1734_v31, 16 }
  0xe2   :  { %v780_v24 = vadd.s32 536870912, %v779_v3  ;;  %v1743_v43 = vadd.s32 %v1741_v4, %v1735_v40  ;;  %vm1744_vm7 = vc.u32 %v1742_v38, %v1738_v57  ;;  %v1765_v19 = vadd.s32 %v1763_v23, %v1757_v50 }
  0xe3   :  { %v1745_v28 = vsel %vm1744_vm7, 1, %v6897_v10  ;;  %vm1766_vm8 = vc.u32 %v1764_v51, %v1760_v41  ;;  %vm1135_vm9 = vcmp.lt.s32.totalorder %v5155_v25, 2  ;;  %v668_v54 = vmul.f32 %v667_v42, %v5269_v62 }
  0xe4   :  { %v781_v55 = vshrl.u32 %v780_v24, 30  ;;  %v1747_v16 = vadd.s32 %v1745_v28, %v1743_v43  ;;  %v1767_v11 = vsel %vm1766_vm8, 1, %v6897_v10  ;;  %v1761_v49 = vshrl.u32 %v1756_v63, 16 }
  0xe5   :  { %v1769_v0 = vadd.s32 %v1767_v11, %v1765_v19  ;;  %v1837_v44 = vand.u32 2139095040, %v5411_v20  ;;  %vm672_vm10 = vcmp.lt.s32.totalorder %v5255_v12, 2  ;;  %vm673_vm11 = vcmp.eq.s32.totalorder %v5255_v12, 0 }
  0xe6   :  { %v782_v48 = vshll.u32 %v781_v55, 30  ;;  %v1748_v1 = vadd.s32 %v1747_v16, %v1737_v14  ;;  %v5421_v52 = vadd.s32 %v1764_v51, %v1760_v41  ;;  %v183_v46 = vmul.f32 %v5279_v27, %v5180_v33 }
  0xe7   :  { %v1718_v31 = vsel %vm1712_vm15, %v1715_v47, %v1717_v26  ;;  %v1770_v56 = vadd.s32 %v1769_v0, %v1759_v39  ;;  %v1838_v62 = vshrl.u32 %v1837_v44, 23  ;;  %v199_v63 = vsub.f32 55.0, %v5295_v37 }
  0xe8   :  { %v783_v42 = vsub.s32 %v779_v3, %v782_v48  ;;  %v805_v40 = vsub.s32 4, %v781_v55  ;;  %v5428_v17 = vadd.s32 %v1748_v1, %v1739_v5  ;;  %vm514_vm12 = vweird.f32 %v4756_v8 }
  0xe9   :  { %v674_v6 = vxor.u32 2147483648, %v668_v54  ;;  %vm676_vm13 = vcmp.eq.s32.totalorder %v5255_v12, 2  ;;  %v677_v9 = vxor.u32 2147483648, %v5400_v34  ;;  %v1771_v57 = vadd.s32 %v1770_v56, %v1761_v49 }
  0xea   :  { %vm784_vm14 = vcmp.lt.s32.totalorder %v783_v42, 0  ;;  %v785_v33 = vsub.s32 0, %v783_v42  ;;  %v1772_v32 = vmul.u32 %v5386_v58, %v1718_v31  ;;  %vm1774_vm15 = vc.u32 %v5428_v17, %v5421_v52 }
  0xeb   :  { %vm1293_vm0 = vcmp.eq.s32.totalorder %v5263_v7, 2  ;;  %vm683_vm1 = vcmp.lt.s32.totalorder %v5199_v29, 0  ;;  %v1775_v27 = vadd.s32 1, %v1771_v57  ;;  %v4543_v37 = vadd.s32 4294967169, %v1838_v62 }
  0xec   :  { %vm1290_vm2 = vcmp.eq.s32.totalorder %v5263_v7, 0  ;;  %v203_v47 = vmul.f32 %v199_v63, %v183_v46  ;;  %v786_v26 = vsel %vm784_vm14, %v785_v33, %v783_v42  ;;  %v806_v50 = vsel %vm683_vm1, %v805_v40, %v781_v55  ;;  %v4608_v40 = vld [vmem:[#allocation2 + $0x20] sm:$0xff]  ;;  %v4610_v33 = vld [vmem:[#allocation2 + $0x30] sm:$0xff] }
  0xed   :  { %vm1289_vm3 = vcmp.lt.s32.totalorder %v5263_v7, 2  ;;  %v6899_v58 = vand.u32 2147483647, %v5199_v29  ;;  %v787_v3 = vclz %v786_v26  ;;  %v1776_v14 = vsel %vm1774_vm15, %v1775_v27, %v1771_v57  ;;  %v4612_v26 = vld [vmem:[#allocation2 + $0x48] sm:$0xff] }
  0xee   :  { %v675_v38 = vsel %vm673_vm11, %v5400_v34, %v674_v6  ;;  %v678_v4 = vsel %vm676_vm13, %v677_v9, %v668_v54  ;;  %v1295_v51 = vsel %vm1293_vm0, %v677_v9, %v668_v54  ;;  %v5453_v24 = vadd.s32 %v1776_v14, %v1772_v32  ;;  %v4609_v9 = vld [vmem:[#allocation2 + $0x28] sm:$0xff]  ;;  %v4613_v14 = vld [vmem:[#allocation2 + $0x50] sm:$0xff] }
  0xef   :  { %vm5444_vm4 = vcmp.le.f32.partialorder %v6899_v58, 0.7853982  ;;  %v1292_v43 = vsel %vm1290_vm2, %v5400_v34, %v674_v6  ;;  %v4526_v23 = vadd.s32 4294967294, %v787_v3  ;;  %v1844_v39 = vadd.s32 1, %v4543_v37  ;;  %v4611_v37 = vld [vmem:[#allocation2 + $0x40] sm:$0xff] }
  0xf0   :  { %v808_v28 = vsel %vm5444_vm4, 0, %v806_v50  ;;  %v1142_v19 = vsel %vm1135_vm9, %v5228_v18, %v5232_v30  ;;  %v167_v55 = vmul.f32 5.0, %v5165_v13  ;;  %v207_v5 = vsub.f32 1.0, %v203_v47 }
  0xf1   :  { %v1778_v16 = vadd.s32 536870912, %v5453_v24  ;;  %vm669_vm5 = vweird.f32 %v4769_v21  ;;  %v679_v34 = vsel %vm672_vm10, %v675_v38, %v678_v4  ;;  %v775_v11 = vadd.s32 %v5370_v36, %v5395_v53 }
  0xf2   :  { %vm4527_vm6 = vcmp.lt.s32.totalorder %v4526_v23, 0  ;;  %v1296_v54 = vsel %vm1289_vm3, %v1292_v43, %v1295_v51  ;;  %v825_v25 = vadd.s32 3, %v808_v28  ;;  %vm1845_vm7 = vcmp.gt.s32.totalorder %v1844_v39, 0  ;;  %v6903_v51 = vld [vmem:[#allocation13_spill] sm:$0xff] }
  0xf3   :  { %v790_v49 = vsel %vm4527_vm6, 0, %v4526_v23  ;;  %v5471_v18 = vshrl.u32 %v1778_v16, 30  ;;  %v5476_v12 = vsel %vm514_vm12, nan, %v5238_v45  ;;  %v5480_v36 = vsel %vm514_vm12, nan, %v1142_v19  ;;  %v6904_v43 = vld [vmem:[#allocation17_spill] sm:$0xff] }
  0xf4   :  { %v791_v30 = vsub.s32 32, %v790_v49  ;;  %v792_v0 = vshll.u32 %v783_v42, %v790_v49  ;;  %v795_v44 = vsub.s32 4294967266, %v790_v49  ;;  %v6902_v7 = vsub.f32 1.0, %v5192_v61 }
  0xf5   :  { %v5487_v48 = vmul.f32 %v207_v5, %v167_v55  ;;  %v5491_v1 = vsel %vm669_vm5, nan, %v679_v34  ;;  %v5495_v46 = vsel %vm669_vm5, nan, %v1296_v54  ;;  %v5497_v56 = vand.u32 3, %v825_v25 }
  0xf6   :  { %v5485_v53 = vmul.f32 %v6902_v7, %v5207_v35  ;;  %v793_v45 = vshrl.u32 %v775_v11, %v791_v30  ;;  %v796_v31 = vadd.s32 127, %v795_v44  ;;  %v5499_v62 = vand.u32 3, %v808_v28 }
  0xf7   :  { %v1780_v61 = vshll.u32 %v5471_v18, 30  ;;  %v5502_v35 = vsel %vm1845_vm7, %v1844_v39, 0  ;;  %v138_v6 = vmul.f32 %v4608_v40, %v4737_v59  ;;  %v139_v57 = vmul.f32 %v4609_v9, %v4739_v60 }
  0xf8   :  { %v794_v63 = vor.u32 %v793_v45, %v792_v0  ;;  %v797_v42 = vshll.u32 %v796_v31, 23  ;;  %v140_v32 = vmul.f32 %v4610_v33, %v4745_v2  ;;  %v141_v27 = vmul.f32 %v5165_v13, %v5003_v22  ;;  %v6905_v22 = vld [vmem:[#allocation15_spill] sm:$0xff] }
  0xf9   :  { %v147_v47 = vmul.f32 %v4611_v37, %v4737_v59  ;;  %v148_v50 = vmul.f32 %v4612_v26, %v4739_v60  ;;  %143 = vst [vmem:[#allocation6 + $0x20] sm:$0xff] %v138_v6  ;;  %v149_v38 = vmul.f32 %v4613_v14, %v4745_v2  ;;  %v150_v4 = vmul.f32 %v5165_v13, %v5025_v15  ;;  %v6906_v60 = vld [vmem:[#allocation18_spill] sm:$0xff] }
  0xfa   :  { %v798_v58 = vor.u32 4788187, %v797_v42  ;;  %v801_v3 = vcvt.s32.f32 %v794_v63  ;;  %144 = vst [vmem:[#allocation6 + $0x28] sm:$0xff] %v139_v57  ;;  %v1452_v23 = vmul.f32 %v6904_v43, %v6903_v51  ;;  %v1453_v28 = vmul.f32 %v5476_v12, %v6905_v22 }
  0xfb   :  { %v1454_v59 = vmul.f32 %v5491_v1, %v5485_v53  ;;  %v1460_v39 = vmul.f32 %v6906_v60, %v6904_v43  ;;  %145 = vst [vmem:[#allocation6 + $0x30] sm:$0xff] %v140_v32  ;;  %v1461_v2 = vmul.f32 %v5480_v36, %v5476_v12  ;;  %v1462_v15 = vmul.f32 %v5495_v46, %v5491_v1 }
  0xfc   :  { %v799_v19 = vand.u32 2147483647, %v798_v58  ;;  %v1468_v13 = vmul.f32 %v6906_v60, %v6906_v60  ;;  %146 = vst [vmem:[#allocation6 + $0x38] sm:$0xff] %v141_v27  ;;  %v1472_v5 = vmul.f32 %v6904_v43, %v6904_v43  ;;  %v1469_v16 = vmul.f32 %v5480_v36, %v5480_v36 }
  0xfd   :  { %v1464_v55 = vadd.f32 %v1460_v39, %v1460_v39  ;;  %v1473_v34 = vmul.f32 %v5476_v12, %v5476_v12  ;;  %152 = vst [vmem:[#allocation6 + $0x40] sm:$0xff] %v147_v47  ;;  %v1465_v54 = vadd.f32 %v1461_v2, %v1461_v2  ;;  %v1466_v49 = vadd.f32 %v1462_v15, %v1462_v15 }
  0xfe   :  { %v802_v11 = vmul.f32 %v801_v3, %v799_v19  ;;  %v1470_v25 = vmul.f32 %v5495_v46, %v5495_v46  ;;  %153 = vst [vmem:[#allocation6 + $0x48] sm:$0xff] %v148_v50  ;;  %v1476_v44 = vsub.f32 %v1468_v13, %v1472_v5  ;;  %v1474_v32 = vmul.f32 %v5491_v1, %v5491_v1 }
  0xff   :  { %v1480_v30 = vmul.f32 %v1464_v55, %v6903_v51  ;;  %v1505_v0 = vmul.f32 %v1464_v55, %v6904_v43  ;;  %v1489_v7 = vmul.f32 %v1464_v55, %v6906_v60  ;;  %154 = vst [vmem:[#allocation6 + $0x50] sm:$0xff] %v149_v38  ;;  %v1481_v31 = vmul.f32 %v1465_v54, %v6905_v22 }
 0x100   :  { %v803_v45 = vxor.u32 2147483648, %v802_v11  ;;  %v1506_v63 = vmul.f32 %v1465_v54, %v5476_v12  ;;  %v1482_v42 = vmul.f32 %v1466_v49, %v5485_v53  ;;  %155 = vst [vmem:[#allocation6 + $0x58] sm:$0xff] %v150_v4  ;;  %v1507_v40 = vmul.f32 %v1466_v49, %v5491_v1 }
 0x101   :  { %v1493_v6 = vmul.f32 %v1476_v44, %v6904_v43  ;;  %v1477_v9 = vsub.f32 %v1469_v16, %v1473_v34  ;;  %v1490_v57 = vmul.f32 %v1465_v54, %v5480_v36  ;;  %1456 = vst [vmem:[#allocation5] sm:$0xff] %v1452_v23  ;;  %v1491_v27 = vmul.f32 %v1466_v49, %v5495_v46  ;;  %4504 = dma.vmem_to_hbm [thread:$0]  %s4497_s16, 1536, %s4499_s19, [#allocation7], %s4693_s14, %s4693_s14, %s4694_s15  }
 0x102   :  { %v804_v33 = vsel %vm683_vm1, %v803_v45, %v802_v11  ;;  %v1501_v37 = vmul.f32 %v1476_v44, %v6906_v60  ;;  %1457 = vst [vmem:[#allocation5 + $0x8] sm:$0xff] %v1453_v28  ;;  %v1478_v14 = vsub.f32 %v1470_v25, %v1474_v32  ;;  %v5563_v4 = vsub.s32 %v5453_v24, %v1780_v61 }
 0x103   :  { %v5554_v47 = vsel %vm5444_vm4, %v5199_v29, %v804_v33  ;;  %v1497_v26 = vadd.f32 %v1493_v6, %v1489_v7  ;;  %v1494_v50 = vmul.f32 %v1477_v9, %v5476_v12  ;;  %v1502_v58 = vmul.f32 %v1477_v9, %v5480_v36  ;;  %1458 = vst [vmem:[#allocation5 + $0x10] sm:$0xff] %v1454_v59 }
 0x104   :  { %v809_v3 = vmul.f32 %v5554_v47, %v5554_v47  ;;  %v1509_v38 = vsub.f32 %v1501_v37, %v1505_v0  ;;  %1485 = vst [vmem:[#allocation5 + $0x20] sm:$0xff] %v1480_v30  ;;  %v1495_v59 = vmul.f32 %v1478_v14, %v5491_v1  ;;  %vm831_vm8 = vcmp.eq.s32.totalorder %v5497_v56, 2 }
 0x105   :  { %v1513_v41 = vmul.f32 %v1497_v26, %v6903_v51  ;;  %v1538_v23 = vmul.f32 %v1497_v26, %v6904_v43  ;;  %v1498_v28 = vadd.f32 %v1494_v50, %v1490_v57  ;;  %v1522_v39 = vmul.f32 %v1497_v26, %v6906_v60  ;;  %1486 = vst [vmem:[#allocation5 + $0x28] sm:$0xff] %v1481_v31 }
 0x106   :  { %v810_v19 = vmul.f32 -0.001358992, %v809_v3  ;;  %v817_v2 = vmul.f32 -0.00019511016, %v809_v3  ;;  %v1526_v15 = vmul.f32 %v1509_v38, %v6904_v43  ;;  %1487 = vst [vmem:[#allocation5 + $0x30] sm:$0xff] %v1482_v42  ;;  %v1510_v61 = vsub.f32 %v1502_v58, %v1506_v63 }
 0x107   :  { %v1514_v13 = vmul.f32 %v1498_v28, %v6905_v22  ;;  %v1539_v24 = vmul.f32 %v1498_v28, %v5476_v12  ;;  %v1523_v55 = vmul.f32 %v1498_v28, %v5480_v36  ;;  %1518 = vst [vmem:[#allocation5 + $0x40] sm:$0xff] %v1513_v41  ;;  %v1499_v34 = vadd.f32 %v1495_v59, %v1491_v27 }
 0x108   :  { %v811_v5 = vadd.f32 0.041655596, %v810_v19  ;;  %v818_v16 = vadd.f32 0.008332121, %v817_v2  ;;  %v1530_v11 = vadd.f32 %v1526_v15, %v1522_v39  ;;  %vm1447_vm9 = vcmp.eq.s32.totalorder %v5499_v62, 2 }
 0x109   :  { %1519 = vst [vmem:[#allocation5 + $0x48] sm:$0xff] %v1514_v13  ;;  %v1527_v54 = vmul.f32 %v1510_v61, %v5476_v12  ;;  %v1503_v49 = vmul.f32 %v1478_v14, %v5495_v46  ;;  %v1534_v25 = vmul.f32 %v1509_v38, %v6906_v60  ;;  %v1535_v30 = vmul.f32 %v1510_v61, %v5480_v36 }
 0x10a   :  { %v812_v0 = vmul.f32 %v811_v5, %v809_v3  ;;  %v819_v44 = vmul.f32 %v818_v16, %v809_v3  ;;  %v1515_v7 = vmul.f32 %v1499_v34, %v5485_v53  ;;  %v1540_v45 = vmul.f32 %v1499_v34, %v5491_v1 }
 0x10b   :  { %vm828_vm10 = vcmp.eq.s32.totalorder %v5497_v56, 0  ;;  %vm1444_vm11 = vcmp.eq.s32.totalorder %v5499_v62, 0  ;;  %v1546_v31 = vmul.f32 %v1530_v11, %v6903_v51  ;;  %v1571_v63 = vmul.f32 %v1530_v11, %v6904_v43 }
 0x10c   :  { %v1531_v42 = vadd.f32 %v1527_v54, %v1523_v55  ;;  %v1511_v6 = vsub.f32 %v1503_v49, %v1507_v40  ;;  %v813_v9 = vadd.f32 -0.4999988, %v812_v0  ;;  %v820_v57 = vadd.f32 -0.16666654, %v819_v44  ;;  %1520 = vst [vmem:[#allocation5 + $0x50] sm:$0xff] %v1515_v7 }
 0x10d   :  { %vm827_vm12 = vcmp.lt.s32.totalorder %v5497_v56, 2  ;;  %vm1443_vm13 = vcmp.lt.s32.totalorder %v5499_v62, 2  ;;  %v1524_v33 = vmul.f32 %v1499_v34, %v5495_v46  ;;  %v1542_v32 = vsub.f32 %v1534_v25, %v1538_v23  ;;  %1551 = vst [vmem:[#allocation5 + $0x60] sm:$0xff] %v1546_v31 }
 0x10e   :  { %vm824_vm14 = vweird.f32 %v5199_v29  ;;  %v1547_v27 = vmul.f32 %v1531_v42, %v6905_v22  ;;  %v1572_v37 = vmul.f32 %v1531_v42, %v5476_v12  ;;  %v1528_v26 = vmul.f32 %v1511_v6, %v5491_v1 }
 0x10f   :  { %v1555_v40 = vmul.f32 %v1530_v11, %v6906_v60  ;;  %v814_v50 = vmul.f32 %v813_v9, %v809_v3  ;;  %v821_v58 = vmul.f32 %v820_v57, %v809_v3  ;;  %v1559_v14 = vmul.f32 %v1542_v32, %v6904_v43 }
 0x110   :  { %v1543_v38 = vsub.f32 %v1535_v30, %v1539_v24  ;;  %1552 = vst [vmem:[#allocation5 + $0x68] sm:$0xff] %v1547_v27  ;;  %v1532_v41 = vadd.f32 %v1528_v26, %v1524_v33  ;;  %v1556_v23 = vmul.f32 %v1531_v42, %v5480_v36  ;;  %v1536_v28 = vmul.f32 %v1511_v6, %v5495_v46 }
 0x111   :  { %v1567_v39 = vmul.f32 %v1542_v32, %v6906_v60  ;;  %v815_v19 = vadd.f32 1.0, %v814_v50  ;;  %v822_v2 = vadd.f32 1.0, %v821_v58  ;;  %v1563_v59 = vadd.f32 %v1559_v14, %v1555_v40 }
 0x112   :  { %v1560_v15 = vmul.f32 %v1543_v38, %v5476_v12  ;;  %v1548_v13 = vmul.f32 %v1532_v41, %v5485_v53  ;;  %v1573_v3 = vmul.f32 %v1532_v41, %v5491_v1  ;;  %v1544_v61 = vsub.f32 %v1536_v28, %v1540_v45 }
 0x113   :  { %v1557_v24 = vmul.f32 %v1532_v41, %v5495_v46  ;;  %v823_v55 = vmul.f32 %v822_v2, %v5554_v47  ;;  %v832_v5 = vxor.u32 2147483648, %v815_v19  ;;  %v1579_v16 = vmul.f32 %v1563_v59, %v6903_v51 }
 0x114   :  { %v1564_v34 = vadd.f32 %v1560_v15, %v1556_v23  ;;  %1553 = vst [vmem:[#allocation5 + $0x70] sm:$0xff] %v1548_v13  ;;  %v1561_v11 = vmul.f32 %v1544_v61, %v5491_v1  ;;  %v1575_v54 = vsub.f32 %v1567_v39, %v1571_v63  ;;  %v1588_v49 = vmul.f32 %v1563_v59, %v6906_v60 }
 0x115   :  { %v1568_v25 = vmul.f32 %v1543_v38, %v5480_v36  ;;  %v829_v30 = vxor.u32 2147483648, %v823_v55  ;;  %v833_v0 = vsel %vm831_vm8, %v832_v5, %v823_v55  ;;  %v1449_v44 = vsel %vm1447_vm9, %v832_v5, %v823_v55  ;;  %1584 = vst [vmem:[#allocation5 + $0x80] sm:$0xff] %v1579_v16 }
 0x116   :  { %v1580_v47 = vmul.f32 %v1564_v34, %v6905_v22  ;;  %v1565_v7 = vadd.f32 %v1561_v11, %v1557_v24  ;;  %v1592_v45 = vmul.f32 %v1575_v54, %v6904_v43  ;;  %v1589_v63 = vmul.f32 %v1564_v34, %v5480_v36 }
 0x117   :  { %v1576_v31 = vsub.f32 %v1568_v25, %v1572_v37  ;;  %v830_v42 = vsel %vm828_vm10, %v815_v19, %v829_v30  ;;  %v1446_v6 = vsel %vm1444_vm11, %v815_v19, %v829_v30  ;;  %v1569_v9 = vmul.f32 %v1544_v61, %v5495_v46 }
 0x118   :  { %1585 = vst [vmem:[#allocation5 + $0x88] sm:$0xff] %v1580_v47  ;;  %v1600_v57 = vmul.f32 %v1575_v54, %v6906_v60  ;;  %v834_v33 = vsel %vm827_vm12, %v830_v42, %v833_v0  ;;  %v1450_v32 = vsel %vm1443_vm13, %v1446_v6, %v1449_v44  ;;  %v1581_v27 = vmul.f32 %v1565_v7, %v5485_v53 }
 0x119   :  { %v1596_v37 = vadd.f32 %v1592_v45, %v1588_v49  ;;  %v5626_v26 = vsel %vm824_vm14, nan, %v834_v33  ;;  %v5630_v40 = vsel %vm824_vm14, nan, %v1450_v32  ;;  %v1593_v50 = vmul.f32 %v1576_v31, %v5476_v12 }
 0x11a   :  { %v1577_v58 = vsub.f32 %v1569_v9, %v1573_v3  ;;  %v1455_v56 = vmul.f32 %v5626_v26, %v5487_v48  ;;  %v1463_v62 = vmul.f32 %v5630_v40, %v5626_v26  ;;  %v1471_v14 = vmul.f32 %v5630_v40, %v5630_v40  ;;  %1586 = vst [vmem:[#allocation5 + $0x90] sm:$0xff] %v1581_v27 }
 0x11b   :  { %v1475_v38 = vmul.f32 %v5626_v26, %v5626_v26  ;;  %v1612_v41 = vmul.f32 %v1596_v37, %v6903_v51  ;;  %v1597_v23 = vadd.f32 %v1593_v50, %v1589_v63  ;;  %v1590_v28 = vmul.f32 %v1565_v7, %v5495_v46 }
 0x11c   :  { %v1594_v39 = vmul.f32 %v1577_v58, %v5491_v1  ;;  %1459 = vst [vmem:[#allocation5 + $0x18] sm:$0xff] %v1455_v56  ;;  %v1467_v19 = vadd.f32 %v1463_v62, %v1463_v62  ;;  %v1604_v15 = vmul.f32 %v1563_v59, %v6904_v43  ;;  %v1621_v13 = vmul.f32 %v1596_v37, %v6906_v60 }
 0x11d   :  { %v1479_v2 = vsub.f32 %v1471_v14, %v1475_v38  ;;  %1617 = vst [vmem:[#allocation5 + $0xa0] sm:$0xff] %v1612_v41  ;;  %v1613_v3 = vmul.f32 %v1597_v23, %v6905_v22  ;;  %v1601_v24 = vmul.f32 %v1576_v31, %v5480_v36  ;;  %v1605_v55 = vmul.f32 %v1564_v34, %v5476_v12 }
 0x11e   :  { %v1598_v61 = vadd.f32 %v1594_v39, %v1590_v28  ;;  %v1483_v5 = vmul.f32 %v1467_v19, %v5487_v48  ;;  %v1508_v16 = vmul.f32 %v1467_v19, %v5626_v26  ;;  %v1492_v11 = vmul.f32 %v1467_v19, %v5630_v40 }
 0x11f   :  { %v1496_v54 = vmul.f32 %v1479_v2, %v5626_v26  ;;  %v1504_v59 = vmul.f32 %v1479_v2, %v5630_v40  ;;  %1618 = vst [vmem:[#allocation5 + $0xa8] sm:$0xff] %v1613_v3  ;;  %v1608_v25 = vsub.f32 %v1600_v57, %v1604_v15  ;;  %v1609_v30 = vsub.f32 %v1601_v24, %v1605_v55 }
 0x120   :  { %v1614_v49 = vmul.f32 %v1598_v61, %v5485_v53  ;;  %1488 = vst [vmem:[#allocation5 + $0x38] sm:$0xff] %v1483_v5  ;;  %v1622_v44 = vmul.f32 %v1597_v23, %v5480_v36  ;;  %v1602_v34 = vmul.f32 %v1577_v58, %v5495_v46  ;;  %v1606_v47 = vmul.f32 %v1565_v7, %v5491_v1 }
 0x121   :  { %v1500_v0 = vadd.f32 %v1496_v54, %v1492_v11  ;;  %v1512_v45 = vsub.f32 %v1504_v59, %v1508_v16  ;;  %v1625_v31 = vmul.f32 %v1608_v25, %v6904_v43  ;;  %v1626_v63 = vmul.f32 %v1609_v30, %v5476_v12 }
 0x122   :  { %1619 = vst [vmem:[#allocation5 + $0xb0] sm:$0xff] %v1614_v49  ;;  %v1623_v42 = vmul.f32 %v1598_v61, %v5495_v46  ;;  %v1610_v33 = vsub.f32 %v1602_v34, %v1606_v47  ;;  %v1633_v56 = vmul.f32 %v1608_v25, %v6906_v60  ;;  %v1637_v62 = vmul.f32 %v1596_v37, %v6904_v43 }
 0x123   :  { %v1516_v6 = vmul.f32 %v1500_v0, %v5487_v48  ;;  %v1541_v9 = vmul.f32 %v1500_v0, %v5626_v26  ;;  %v1525_v57 = vmul.f32 %v1500_v0, %v5630_v40  ;;  %v1529_v32 = vmul.f32 %v1512_v45, %v5626_v26 }
 0x124   :  { %v1537_v27 = vmul.f32 %v1512_v45, %v5630_v40  ;;  %v1629_v7 = vadd.f32 %v1625_v31, %v1621_v13  ;;  %v1630_v50 = vadd.f32 %v1626_v63, %v1622_v44  ;;  %v1627_v58 = vmul.f32 %v1610_v33, %v5491_v1 }
 0x125   :  { %1521 = vst [vmem:[#allocation5 + $0x58] sm:$0xff] %v1516_v6  ;;  %v1634_v14 = vmul.f32 %v1609_v30, %v5480_v36  ;;  %v1533_v38 = vadd.f32 %v1529_v32, %v1525_v57  ;;  %v1641_v2 = vsub.f32 %v1633_v56, %v1637_v62  ;;  %v1638_v13 = vmul.f32 %v1597_v23, %v5476_v12 }
 0x126   :  { %v1545_v41 = vsub.f32 %v1537_v27, %v1541_v9  ;;  %v1645_v28 = vmul.f32 %v1629_v7, %v6903_v51  ;;  %v1646_v39 = vmul.f32 %v1630_v50, %v6905_v22  ;;  %v1631_v19 = vadd.f32 %v1627_v58, %v1623_v42 }
 0x127   :  { %v1654_v15 = vmul.f32 %v1629_v7, %v6906_v60  ;;  %v1549_v3 = vmul.f32 %v1533_v38, %v5487_v48  ;;  %v1574_v24 = vmul.f32 %v1533_v38, %v5626_v26  ;;  %v1558_v37 = vmul.f32 %v1533_v38, %v5630_v40 }
 0x128   :  { %v1562_v55 = vmul.f32 %v1545_v41, %v5626_v26  ;;  %1650 = vst [vmem:[#allocation5 + $0xc0] sm:$0xff] %v1645_v28  ;;  %v1570_v5 = vmul.f32 %v1545_v41, %v5630_v40  ;;  %v1647_v16 = vmul.f32 %v1631_v19, %v5485_v53  ;;  %v1658_v11 = vmul.f32 %v1641_v2, %v6904_v43 }
 0x129   :  { %1651 = vst [vmem:[#allocation5 + $0xc8] sm:$0xff] %v1646_v39  ;;  %v1642_v54 = vsub.f32 %v1634_v14, %v1638_v13  ;;  %v1655_v23 = vmul.f32 %v1630_v50, %v5480_v36  ;;  %v1635_v49 = vmul.f32 %v1610_v33, %v5495_v46  ;;  %v1639_v25 = vmul.f32 %v1598_v61, %v5491_v1 }
 0x12a   :  { %1554 = vst [vmem:[#allocation5 + $0x78] sm:$0xff] %v1549_v3  ;;  %v1566_v59 = vadd.f32 %v1562_v55, %v1558_v37  ;;  %v1578_v30 = vsub.f32 %v1570_v5, %v1574_v24  ;;  %v1662_v0 = vadd.f32 %v1658_v11, %v1654_v15  ;;  %v1656_v34 = vmul.f32 %v1631_v19, %v5495_v46  ;;  %v6907_v24 = vld [vmem:[#allocation14_spill] sm:$0xff] }
 0x12b   :  { %1652 = vst [vmem:[#allocation5 + $0xd0] sm:$0xff] %v1647_v16  ;;  %v1659_v44 = vmul.f32 %v1642_v54, %v5476_v12  ;;  %v1643_v63 = vsub.f32 %v1635_v49, %v1639_v25  ;;  %vm1782_vm15 = vcmp.lt.s32.totalorder %v5563_v4, 0  ;;  %v1783_v33 = vsub.s32 0, %v5563_v4 }
 0x12c   :  { %v1582_v47 = vmul.f32 %v1566_v59, %v5487_v48  ;;  %v1591_v45 = vmul.f32 %v1566_v59, %v5630_v40  ;;  %v1607_v31 = vmul.f32 %v1566_v59, %v5626_v26  ;;  %v1595_v42 = vmul.f32 %v1578_v30, %v5626_v26 }
 0x12d   :  { %v1603_v6 = vmul.f32 %v1578_v30, %v5630_v40  ;;  %v1666_v61 = vmul.f32 %v1662_v0, %v6903_v51  ;;  %v1663_v9 = vadd.f32 %v1659_v44, %v1655_v23  ;;  %v1660_v57 = vmul.f32 %v1643_v63, %v5491_v1 }
 0x12e   :  { %1587 = vst [vmem:[#allocation5 + $0x98] sm:$0xff] %v1582_v47  ;;  %v1848_v32 = vand.u32 31, %v5502_v35  ;;  %v1599_v27 = vadd.f32 %v1595_v42, %v1591_v45  ;;  %v1784_v56 = vsel %vm1782_vm15, %v1783_v33, %v5563_v4  ;;  %v1834_v62 = vand.u32 2147483647, %v5411_v20 }
 0x12f   :  { %v1611_v7 = vsub.f32 %v1603_v6, %v1607_v31  ;;  %1671 = vst [vmem:[#allocation5 + $0xe0] sm:$0xff] %v1666_v61  ;;  %v1667_v50 = vmul.f32 %v1663_v9, %v6905_v22  ;;  %v1664_v58 = vadd.f32 %v1660_v57, %v1656_v34  ;;  %v1785_v2 = vclz %v1784_v56 }
 0x130   :  { %v1615_v14 = vmul.f32 %v1599_v27, %v5487_v48  ;;  %v1624_v38 = vmul.f32 %v1599_v27, %v5630_v40  ;;  %v1640_v19 = vmul.f32 %v1599_v27, %v5626_v26  ;;  %v1849_v15 = vsub.s32 32, %v1848_v32 }
 0x131   :  { %v1628_v41 = vmul.f32 %v1611_v7, %v5626_v26  ;;  %1672 = vst [vmem:[#allocation5 + $0xe8] sm:$0xff] %v1667_v50  ;;  %v1636_v28 = vmul.f32 %v1611_v7, %v5630_v40  ;;  %v1668_v39 = vmul.f32 %v1664_v58, %v5485_v53  ;;  %vm1681_vm0 = vcmp.lt.s32.totalorder %v6907_v24, 0 }
 0x132   :  { %1620 = vst [vmem:[#allocation5 + $0xb8] sm:$0xff] %v1615_v14  ;;  %v1773_v37 = vadd.s32 %v5421_v52, %v5428_v17  ;;  %v4541_v55 = vadd.s32 4294967294, %v1785_v2  ;;  %v1803_v11 = vsub.s32 4, %v5471_v18  ;;  %v1841_v54 = vand.u32 8388607, %v1834_v62 }
 0x133   :  { %v1632_v13 = vadd.f32 %v1628_v41, %v1624_v38  ;;  %1673 = vst [vmem:[#allocation5 + $0xf0] sm:$0xff] %v1668_v39  ;;  %v1644_v3 = vsub.f32 %v1636_v28, %v1640_v19  ;;  %v6908_v23 = vmov 683565275   ;;  %v6909_v25 = vmov 2475754826  }
 0x134   :  { %vm4542_vm1 = vcmp.lt.s32.totalorder %v4541_v55, 0  ;;  %v1851_v49 = vshll.u32 %v6908_v23, %v1848_v32  ;;  %v1852_v30 = vshrl.u32 %v6909_v25, %v1849_v15  ;;  %v6910_v52 = vand.u32 2147483647, %v6907_v24 }
 0x135   :  { %v1648_v5 = vmul.f32 %v1632_v13, %v5487_v48  ;;  %v1657_v16 = vmul.f32 %v1632_v13, %v5630_v40  ;;  %v1661_v59 = vmul.f32 %v1644_v3, %v5626_v26  ;;  %v1788_v0 = vsel %vm4542_vm1, 0, %v4541_v55 }
 0x136   :  { %vm5718_vm2 = vcmp.le.f32.partialorder %v6910_v52, 0.7853982  ;;  %v1854_v44 = vshll.u32 %v6909_v25, %v1848_v32  ;;  %v6913_v34 = vmov 2131351028   ;;  %v1789_v31 = vsub.s32 32, %v1788_v0 }
 0x137   :  { %1653 = vst [vmem:[#allocation5 + $0xd8] sm:$0xff] %v1648_v5  ;;  %v1855_v47 = vshrl.u32 %v6913_v34, %v1849_v15  ;;  %v1665_v45 = vadd.f32 %v1661_v59, %v1657_v16  ;;  %v1790_v63 = vshll.u32 %v5563_v4, %v1788_v0  ;;  %v1793_v42 = vsub.s32 4294967266, %v1788_v0 }
 0x138   :  { %v1804_v6 = vsel %vm1681_vm0, %v1803_v11, %v5471_v18  ;;  %v1842_v61 = vor.u32 8388608, %v1841_v54  ;;  %v5729_v9 = vshrl.u32 %v5502_v35, 5  ;;  %v1857_v57 = vshll.u32 %v6913_v34, %v1848_v32 }
 0x139   :  { %v1669_v33 = vmul.f32 %v1665_v45, %v5487_v48  ;;  %v1791_v27 = vshrl.u32 %v1773_v37, %v1789_v31  ;;  %v1794_v7 = vadd.s32 127, %v1793_v42  ;;  %v1853_v50 = vor.u32 %v1852_v30, %v1851_v49 }
 0x13a   :  { %v1856_v58 = vor.u32 %v1855_v47, %v1854_v44  ;;  %v6914_v56 = vmov 2102212464   ;;  %v6915_v38 = vmov 920167782   ;;  %v6916_v39 = vmov 1326507024  }
 0x13b   :  { %v1858_v14 = vshrl.u32 %v6914_v56, %v1849_v15  ;;  %v1860_v4 = vshll.u32 %v6914_v56, %v1848_v32  ;;  %v1861_v41 = vshrl.u32 %v6915_v38, %v1849_v15  ;;  %1674 = vst [vmem:[#allocation5 + $0xf8] sm:$0xff] %v1669_v33  ;;  %v1792_v18 = vor.u32 %v1791_v27, %v1790_v63 }
 0x13c   :  { %v1795_v28 = vshll.u32 %v1794_v7, 23  ;;  %v1863_v35 = vshll.u32 %v6915_v38, %v1848_v32  ;;  %v1864_v19 = vshrl.u32 %v6916_v39, %v1849_v15  ;;  %v5740_v2 = vsel %vm5718_vm2, 0, %v1804_v6 }
 0x13d   :  { %v1859_v13 = vor.u32 %v1858_v14, %v1857_v57  ;;  %v1862_v3 = vor.u32 %v1861_v41, %v1860_v4  ;;  %vm1866_vm3 = vcmp.lt.s32.totalorder %v5729_v9, 1  ;;  %v1799_v55 = vcvt.s32.f32 %v1792_v18 }
 0x13e   :  { %v1796_v37 = vor.u32 4788187, %v1795_v28  ;;  %v1865_v5 = vor.u32 %v1864_v19, %v1863_v35  ;;  %vm1868_vm4 = vcmp.lt.s32.totalorder %v5729_v9, 3  ;;  %vm1867_vm5 = vcmp.lt.s32.totalorder %v5729_v9, 2 }
 0x13f   :  { %vm1869_vm6 = vcmp.lt.s32.totalorder %v5729_v9, 4  ;;  %v1874_v32 = vsel %vm1866_vm3, %v1853_v50, %v1856_v58  ;;  %v1850_v11 = vshrl.u32 %v6908_v23, %v1849_v15  ;;  %v1878_v59 = vsel %vm1866_vm3, %v1856_v58, %v1859_v13 }
 0x140   :  { %v1797_v16 = vand.u32 2147483647, %v1796_v37  ;;  %v1875_v54 = vsel %vm1869_vm6, %v1862_v3, 920167782  ;;  %v1823_v49 = vadd.s32 3, %v5740_v2  ;;  %v5754_v0 = vshll.u32 %v1842_v61, 8 }
 0x141   :  { %v1876_v30 = vsel %vm1868_vm4, %v1859_v13, %v1875_v54  ;;  %v1879_v52 = vsel %vm1869_vm6, %v1865_v5, 1326507024  ;;  %v1871_v47 = vsel %vm1869_vm6, %v1859_v13, 2102212464  ;;  %v1870_v14 = vsel %vm1866_vm3, %v1850_v11, %v1853_v50 }
 0x142   :  { %v1800_v44 = vmul.f32 %v1799_v55, %v1797_v16  ;;  %v1877_v45 = vsel %vm1867_vm5, %v1874_v32, %v1876_v30  ;;  %v1880_v15 = vsel %vm1868_vm4, %v1862_v3, %v1879_v52  ;;  %v1883_v63 = vand.u32 65535, %v5754_v0 }
 0x143   :  { %v1881_v31 = vsel %vm1867_vm5, %v1878_v59, %v1880_v15  ;;  %v1884_v42 = vshrl.u32 %v5754_v0, 16  ;;  %v1907_v6 = vand.u32 65535, %v1877_v45  ;;  %v1908_v27 = vshrl.u32 %v1877_v45, 16 }
 0x144   :  { %v1801_v57 = vxor.u32 2147483648, %v1800_v44  ;;  %v1885_v33 = vand.u32 65535, %v1881_v31  ;;  %v1886_v61 = vshrl.u32 %v1881_v31, 16  ;;  %v5764_v7 = vand.u32 3, %v1823_v49 }
 0x145   :  { %v1872_v4 = vsel %vm1868_vm4, %v1856_v58, %v1871_v47  ;;  %v1911_v41 = vmul.u32 %v1907_v6, %v1884_v42  ;;  %v1909_v3 = vmul.u32 %v1907_v6, %v1883_v63  ;;  %v1910_v37 = vmul.u32 %v1908_v27, %v1883_v63 }
 0x146   :  { %v1802_v18 = vsel %vm1681_vm0, %v1801_v57, %v1800_v44  ;;  %v1887_v28 = vmul.u32 %v1885_v33, %v1883_v63  ;;  %v1888_v35 = vmul.u32 %v1886_v61, %v1883_v63  ;;  %v1889_v19 = vmul.u32 %v1885_v33, %v1884_v42 }
 0x147   :  { %v1805_v13 = vsel %vm5718_vm2, %v6907_v24, %v1802_v18  ;;  %v5776_v55 = vmul.f32 9.0, %v4769_v21  ;;  %v1890_v5 = vmul.u32 %v1886_v61, %v1884_v42  ;;  %v1912_v11 = vmul.u32 %v1908_v27, %v1884_v42 }
 0x148   :  { %v1807_v50 = vmul.f32 %v1805_v13, %v1805_v13  ;;  %v1891_v32 = vshll.u32 %v1888_v35, 16  ;;  %v1893_v58 = vshll.u32 %v1889_v19, 16  ;;  %v1892_v16 = vshrl.u32 %v1888_v35, 16 }
 0x149   :  { %v1913_v54 = vshll.u32 %v1910_v37, 16  ;;  %v1915_v59 = vshll.u32 %v1911_v41, 16  ;;  %v1894_v44 = vshrl.u32 %v1889_v19, 16  ;;  %v1914_v6 = vshrl.u32 %v1910_v37, 16 }
 0x14a   :  { %v1808_v49 = vmul.f32 -0.001358992, %v1807_v50  ;;  %v1815_v30 = vmul.f32 -0.00019511016, %v1807_v50  ;;  %vm1895_vm7 = vc.u32 %v1887_v28, %v1891_v32  ;;  %v1897_v52 = vadd.s32 %v1891_v32, %v1887_v28 }
 0x14b   :  { %v1896_v17 = vsel %vm1895_vm7, 1, %v6897_v10  ;;  %vm1917_vm8 = vc.u32 %v1909_v3, %v1913_v54  ;;  %v1919_v47 = vadd.s32 %v1913_v54, %v1909_v3  ;;  %v2443_v18 = vand.u32 3, %v5740_v2 }
 0x14c   :  { %v1809_v45 = vadd.f32 0.041655596, %v1808_v49  ;;  %v1816_v15 = vadd.f32 0.008332121, %v1815_v30  ;;  %v1898_v31 = vadd.s32 %v1896_v17, %v1890_v5  ;;  %vm1899_vm9 = vc.u32 %v1897_v52, %v1893_v58 }
 0x14d   :  { %v1900_v63 = vsel %vm1899_vm9, 1, %v6897_v10  ;;  %v1918_v42 = vsel %vm1917_vm8, 1, %v6897_v10  ;;  %vm1921_vm10 = vc.u32 %v1919_v47, %v1915_v59  ;;  %v1916_v28 = vshrl.u32 %v1911_v41, 16 }
 0x14e   :  { %v1810_v57 = vmul.f32 %v1809_v45, %v1807_v50  ;;  %v1817_v33 = vmul.f32 %v1816_v15, %v1807_v50  ;;  %v1902_v61 = vadd.s32 %v1900_v63, %v1898_v31  ;;  %v1920_v27 = vadd.s32 %v1918_v42, %v1912_v11 }
 0x14f   :  { %v1922_v35 = vsel %vm1921_vm10, 1, %v6897_v10  ;;  %v1992_v19 = vand.u32 2139095040, %v5776_v55  ;;  %v1873_v37 = vsel %vm1867_vm5, %v1870_v14, %v1872_v4  ;;  %v5786_v54 = vadd.s32 %v1919_v47, %v1915_v59 }
 0x150   :  { %v1811_v3 = vadd.f32 -0.4999988, %v1810_v57  ;;  %v1818_v5 = vadd.f32 -0.16666654, %v1817_v33  ;;  %v1903_v32 = vadd.s32 %v1902_v61, %v1892_v16  ;;  %v1924_v58 = vadd.s32 %v1922_v35, %v1920_v27 }
 0x151   :  { %v1993_v49 = vshrl.u32 %v1992_v19, 23  ;;  %vm1825_vm11 = vcmp.lt.s32.totalorder %v5764_v7, 2  ;;  %vm1829_vm12 = vcmp.eq.s32.totalorder %v5764_v7, 2  ;;  %vm2448_vm13 = vcmp.eq.s32.totalorder %v2443_v18, 2 }
 0x152   :  { %v1812_v30 = vmul.f32 %v1811_v3, %v1807_v50  ;;  %v1819_v52 = vmul.f32 %v1818_v5, %v1807_v50  ;;  %v5788_v11 = vadd.s32 %v1903_v32, %v1894_v44  ;;  %v1925_v2 = vadd.s32 %v1924_v58, %v1914_v6 }
 0x153   :  { %v4546_v41 = vadd.s32 4294967169, %v1993_v49  ;;  %v1927_v9 = vmul.u32 %v5754_v0, %v1873_v37  ;;  %v5796_v4 = vmul.f32 9.0, %v5199_v29  ;;  %vm1826_vm15 = vcmp.eq.s32.totalorder %v5764_v7, 0 }
 0x154   :  { %v1813_v17 = vadd.f32 1.0, %v1812_v30  ;;  %v1820_v45 = vadd.f32 1.0, %v1819_v52  ;;  %v1926_v16 = vadd.s32 %v1925_v2, %v1916_v28  ;;  %vm1929_vm14 = vc.u32 %v5788_v11, %v5786_v54 }
 0x155   :  { %v1999_v14 = vadd.s32 1, %v4546_v41  ;;  %vm2444_vm0 = vcmp.lt.s32.totalorder %v2443_v18, 2  ;;  %vm2445_vm1 = vcmp.eq.s32.totalorder %v2443_v18, 0  ;;  %v6873_v47 = vand.u32 2147483647, %v5776_v55 }
 0x156   :  { %v1821_v50 = vmul.f32 %v1820_v45, %v1805_v13  ;;  %v1830_v59 = vxor.u32 2147483648, %v1813_v17  ;;  %v1930_v44 = vadd.s32 1, %v1926_v16  ;;  %vm1822_vm3 = vweird.f32 %v6907_v24 }
 0x157   :  { %vm2000_vm2 = vcmp.gt.s32.totalorder %v1999_v14, 0  ;;  %v2147_v42 = vand.u32 2139095040, %v5796_v4  ;;  %v1996_v24 = vand.u32 8388607, %v6873_v47 }
 0x158   :  { %v1827_v15 = vxor.u32 2147483648, %v1821_v50  ;;  %v1831_v0 = vsel %vm1829_vm12, %v1830_v59, %v1821_v50  ;;  %v2450_v31 = vsel %vm2448_vm13, %v1830_v59, %v1821_v50  ;;  %v1931_v63 = vsel %vm1929_vm14, %v1930_v44, %v1926_v16 }
 0x159   :  { %v1932_v6 = vadd.s32 %v1931_v63, %v1927_v9  ;;  %v2001_v13 = vsel %vm2000_vm2, %v1999_v14, 0  ;;  %v2148_v37 = vshrl.u32 %v2147_v42, 23  ;;  %v1997_v14 = vor.u32 8388608, %v1996_v24 }
 0x15a   :  { %v1828_v57 = vsel %vm1826_vm15, %v1813_v17, %v1827_v15  ;;  %v2447_v33 = vsel %vm2445_vm1, %v1813_v17, %v1827_v15  ;;  %v2003_v61 = vand.u32 31, %v2001_v13  ;;  %v5823_v30 = vshrl.u32 %v2001_v13, 5 }
 0x15b   :  { %v1832_v27 = vsel %vm1825_vm11, %v1828_v57, %v1831_v0  ;;  %v2451_v28 = vsel %vm2444_vm0, %v2447_v33, %v2450_v31  ;;  %v1933_v35 = vadd.s32 536870912, %v1932_v6  ;;  %v4549_v57 = vadd.s32 4294967169, %v2148_v37 }
 0x15c   :  { %v5808_v19 = vsel %vm1822_vm3, nan, %v1832_v27  ;;  %v5810_v3 = vsel %vm1822_vm3, nan, %v2451_v28  ;;  %v2004_v5 = vsub.s32 32, %v2003_v61  ;;  %v2006_v7 = vshll.u32 %v6908_v23, %v2003_v61 }
 0x15d   :  { %v2915_v32 = vmul.f32 %v5808_v19, %v6903_v51  ;;  %v2936_v58 = vmul.f32 %v5810_v3, %v6906_v60  ;;  %v2940_v18 = vmul.f32 %v5808_v19, %v6904_v43  ;;  %v5821_v49 = vshrl.u32 %v1933_v35, 30 }
 0x15e   :  { %v2007_v52 = vshrl.u32 %v6909_v25, %v2004_v5  ;;  %v2009_v2 = vshll.u32 %v6909_v25, %v2003_v61  ;;  %v2010_v41 = vshrl.u32 %v6913_v34, %v2004_v5  ;;  %v2012_v17 = vshll.u32 %v6913_v34, %v2003_v61 }
 0x15f   :  { %2920 = vst [vmem:[#allocation5 + $0x100] sm:$0xff] %v2915_v32  ;;  %v2013_v45 = vshrl.u32 %v6914_v56, %v2004_v5  ;;  %v5830_v16 = vsub.f32 %v2936_v58, %v2940_v18  ;;  %v1935_v9 = vshll.u32 %v5821_v49, 30  ;;  %v2015_v59 = vshll.u32 %v6914_v56, %v2003_v61 }
 0x160   :  { %v2008_v50 = vor.u32 %v2007_v52, %v2006_v7  ;;  %v2016_v44 = vshrl.u32 %v6915_v38, %v2004_v5  ;;  %v2011_v0 = vor.u32 %v2010_v41, %v2009_v2  ;;  %v2018_v63 = vshll.u32 %v6915_v38, %v2003_v61 }
 0x161   :  { %v1936_v15 = vsub.s32 %v1932_v6, %v1935_v9  ;;  %v2014_v31 = vor.u32 %v2013_v45, %v2012_v17  ;;  %v2019_v42 = vshrl.u32 %v6916_v39, %v2004_v5  ;;  %vm2021_vm4 = vcmp.lt.s32.totalorder %v5823_v30, 1 }
 0x162   :  { %v2017_v13 = vor.u32 %v2016_v44, %v2015_v59  ;;  %vm2023_vm6 = vcmp.lt.s32.totalorder %v5823_v30, 3  ;;  %vm2022_vm7 = vcmp.lt.s32.totalorder %v5823_v30, 2  ;;  %vm2024_vm8 = vcmp.lt.s32.totalorder %v5823_v30, 4 }
 0x163   :  { %vm1937_vm5 = vcmp.lt.s32.totalorder %v1936_v15, 0  ;;  %v1938_v33 = vsub.s32 0, %v1936_v15  ;;  %v2020_v27 = vor.u32 %v2019_v42, %v2018_v63  ;;  %v5841_v6 = vshll.u32 %v1997_v14, 8 }
 0x164   :  { %v2029_v61 = vsel %vm2021_vm4, %v2008_v50, %v2011_v0  ;;  %v2030_v35 = vsel %vm2024_vm8, %v2017_v13, 920167782  ;;  %v2033_v24 = vsel %vm2021_vm4, %v2011_v0, %v2014_v31  ;;  %v2154_v37 = vadd.s32 1, %v4549_v57 }
 0x165   :  { %v1939_v28 = vsel %vm1937_vm5, %v1938_v33, %v1936_v15  ;;  %v2031_v58 = vsel %vm2023_vm6, %v2014_v31, %v2030_v35  ;;  %v2034_v7 = vsel %vm2024_vm8, %v2020_v27, 1326507024  ;;  %v2038_v17 = vand.u32 65535, %v5841_v6 }
 0x166   :  { %v1940_v32 = vclz %v1939_v28  ;;  %v2035_v18 = vsel %vm2023_vm6, %v2017_v13, %v2034_v7  ;;  %v2032_v2 = vsel %vm2022_vm7, %v2029_v61, %v2031_v58  ;;  %v6872_v9 = vand.u32 2147483647, %v5796_v4 }
 0x167   :  { %v2036_v41 = vsel %vm2022_vm7, %v2033_v24, %v2035_v18  ;;  %v1928_v14 = vadd.s32 %v5786_v54, %v5788_v11  ;;  %vm2155_vm10 = vcmp.gt.s32.totalorder %v2154_v37, 0  ;;  %v2005_v63 = vshrl.u32 %v6908_v23, %v2004_v5 }
 0x168   :  { %v4544_v52 = vadd.s32 4294967294, %v1940_v32  ;;  %v2041_v45 = vshrl.u32 %v2036_v41, 16  ;;  %v2040_v59 = vand.u32 65535, %v2036_v41  ;;  %v2039_v13 = vshrl.u32 %v5841_v6, 16 }
 0x169   :  { %v2063_v42 = vshrl.u32 %v2032_v2, 16  ;;  %v2062_v61 = vand.u32 65535, %v2032_v2  ;;  %v5867_v35 = vand.u32 8388607, %v6872_v9  ;;  %v2156_v24 = vsel %vm2155_vm10, %v2154_v37, 0 }
 0x16a   :  { %vm4545_vm9 = vcmp.lt.s32.totalorder %v4544_v52, 0  ;;  %v2043_v28 = vmul.u32 %v2041_v45, %v2038_v17  ;;  %v2026_v32 = vsel %vm2024_vm8, %v2014_v31, 2102212464  ;;  %v2042_v58 = vmul.u32 %v2040_v59, %v2038_v17 }
 0x16b   :  { %v1943_v44 = vsel %vm4545_vm9, 0, %v4544_v52  ;;  %vm1836_vm11 = vcmp.lt.s32.totalorder %v5411_v20, 0  ;;  %v1958_v5 = vsub.s32 4, %v5821_v49  ;;  %v2044_v7 = vmul.u32 %v2040_v59, %v2039_v13 }
 0x16c   :  { %v1944_v57 = vsub.s32 32, %v1943_v44  ;;  %v1945_v33 = vshll.u32 %v1936_v15, %v1943_v44  ;;  %v1948_v27 = vsub.s32 4294967266, %v1943_v44  ;;  %v2025_v15 = vsel %vm2021_vm4, %v2005_v63, %v2008_v50 }
 0x16d   :  { %v2065_v18 = vmul.u32 %v2063_v42, %v2038_v17  ;;  %vm5877_vm12 = vcmp.le.f32.partialorder %v1834_v62, 0.7853982  ;;  %v2045_v41 = vmul.u32 %v2041_v45, %v2039_v13  ;;  %v2046_v31 = vshll.u32 %v2043_v28, 16 }
 0x16e   :  { %v1946_v54 = vshrl.u32 %v1928_v14, %v1944_v57  ;;  %v1949_v11 = vadd.s32 127, %v1948_v27  ;;  %v2027_v14 = vsel %vm2023_vm6, %v2011_v0, %v2026_v32  ;;  %v2048_v44 = vshll.u32 %v2044_v7, 16 }
 0x16f   :  { %v2064_v57 = vmul.u32 %v2062_v61, %v2038_v17  ;;  %v2066_v27 = vmul.u32 %v2062_v61, %v2039_v13  ;;  %vm2050_vm13 = vc.u32 %v2042_v58, %v2046_v31  ;;  %v2052_v59 = vadd.s32 %v2046_v31, %v2042_v58 }
 0x170   :  { %v1947_v37 = vor.u32 %v1946_v54, %v1945_v33  ;;  %v1950_v2 = vshll.u32 %v1949_v11, 23  ;;  %v2051_v63 = vsel %vm2050_vm13, 1, %v6897_v10  ;;  %v2067_v62 = vmul.u32 %v2063_v42, %v2039_v13 }
 0x171   :  { %v2068_v47 = vshll.u32 %v2065_v18, 16  ;;  %v2070_v29 = vshll.u32 %v2066_v27, 16  ;;  %v2047_v33 = vshrl.u32 %v2043_v28, 16  ;;  %v2053_v54 = vadd.s32 %v2051_v63, %v2045_v41 }
 0x172   :  { %v1951_v9 = vor.u32 4788187, %v1950_v2  ;;  %v1954_v50 = vcvt.s32.f32 %v1947_v37  ;;  %vm2054_vm14 = vc.u32 %v2052_v59, %v2048_v44  ;;  %v2158_v11 = vand.u32 31, %v2156_v24 }
 0x173   :  { %v2055_v45 = vsel %vm2054_vm14, 1, %v6897_v10  ;;  %vm2072_vm15 = vc.u32 %v2064_v57, %v2068_v47  ;;  %v2074_v0 = vadd.s32 %v2068_v47, %v2064_v57  ;;  %v2049_v61 = vshrl.u32 %v2044_v7, 16 }
 0x174   :  { %v1952_v21 = vand.u32 2147483647, %v1951_v9  ;;  %v2057_v32 = vadd.s32 %v2055_v45, %v2053_v54  ;;  %v2073_v37 = vsel %vm2072_vm15, 1, %v6897_v10  ;;  %v2069_v58 = vshrl.u32 %v2065_v18, 16 }
 0x175   :  { %v2075_v2 = vadd.s32 %v2073_v37, %v2067_v62  ;;  %vm2076_vm0 = vc.u32 %v2074_v0, %v2070_v29  ;;  %v5886_v13 = vsub.s32 32, %v2158_v11  ;;  %v1959_v9 = vsel %vm1836_vm11, %v1958_v5, %v5821_v49 }
 0x176   :  { %v1955_v17 = vmul.f32 %v1954_v50, %v1952_v21  ;;  %v2058_v28 = vadd.s32 %v2057_v32, %v2047_v33  ;;  %v2077_v41 = vsel %vm2076_vm0, 1, %v6897_v10  ;;  %v2071_v47 = vshrl.u32 %v2066_v27, 16 }
 0x177   :  { %v5892_v31 = vadd.s32 %v2074_v0, %v2070_v29  ;;  %v2079_v21 = vadd.s32 %v2077_v41, %v2075_v2  ;;  %v2164_v7 = vshll.u32 %v6909_v25, %v2158_v11  ;;  %v2028_v44 = vsel %vm2022_vm7, %v2025_v15, %v2027_v14 }
 0x178   :  { %v1956_v42 = vxor.u32 2147483648, %v1955_v17  ;;  %v5899_v57 = vadd.s32 %v2058_v28, %v2049_v61  ;;  %v2165_v49 = vshrl.u32 %v6913_v34, %v5886_v13  ;;  %v2167_v27 = vshll.u32 %v6913_v34, %v2158_v11 }
 0x179   :  { %v2080_v29 = vadd.s32 %v2079_v21, %v2069_v58  ;;  %v2168_v50 = vshrl.u32 %v6914_v56, %v5886_v13  ;;  %v5911_v59 = vsel %vm5877_vm12, 0, %v1959_v9  ;;  %v2152_v15 = vor.u32 8388608, %v5867_v35 }
 0x17a   :  { %v1957_v18 = vsel %vm1836_vm11, %v1956_v42, %v1955_v17  ;;  %v5914_v14 = vshrl.u32 %v2156_v24, 5  ;;  %v2082_v62 = vmul.u32 %v5841_v6, %v2028_v44  ;;  %vm2084_vm1 = vc.u32 %v5899_v57, %v5892_v31 }
 0x17b   :  { %v1960_v5 = vsel %vm5877_vm12, %v5411_v20, %v1957_v18  ;;  %v2081_v63 = vadd.s32 %v2080_v29, %v2071_v47  ;;  %v5919_v33 = vor.u32 %v2165_v49, %v2164_v7  ;;  %v2173_v0 = vshll.u32 %v6915_v38, %v2158_v11 }
 0x17c   :  { %v1962_v30 = vmul.f32 %v1960_v5, %v1960_v5  ;;  %v2174_v52 = vshrl.u32 %v6916_v39, %v5886_v13  ;;  %v5924_v61 = vor.u32 %v2168_v50, %v2167_v27  ;;  %v2170_v35 = vshll.u32 %v6914_v56, %v2158_v11 }
 0x17d   :  { %v2085_v17 = vadd.s32 1, %v2081_v63  ;;  %v2171_v6 = vshrl.u32 %v6915_v38, %v5886_v13  ;;  %vm2179_vm2 = vcmp.lt.s32.totalorder %v5914_v14, 4  ;;  %v1978_v58 = vadd.s32 3, %v5911_v59 }
 0x17e   :  { %v1963_v54 = vmul.f32 -0.001358992, %v1962_v30  ;;  %v1970_v45 = vmul.f32 -0.00019511016, %v1962_v30  ;;  %v2175_v37 = vor.u32 %v2174_v52, %v2173_v0  ;;  %v2161_v42 = vshll.u32 %v6908_v23, %v2158_v11 }
 0x17f   :  { %v2086_v2 = vsel %vm2084_vm1, %v2085_v17, %v2081_v63  ;;  %vm2176_vm3 = vcmp.lt.s32.totalorder %v5914_v14, 1  ;;  %vm2178_vm4 = vcmp.lt.s32.totalorder %v5914_v14, 3  ;;  %v2162_v47 = vshrl.u32 %v6909_v25, %v5886_v13 }
 0x180   :  { %v1964_v24 = vadd.f32 0.041655596, %v1963_v54  ;;  %v1971_v32 = vadd.f32 0.008332121, %v1970_v45  ;;  %v2087_v41 = vadd.s32 %v2086_v2, %v2082_v62  ;;  %v2172_v21 = vor.u32 %v2171_v6, %v2170_v35 }
 0x181   :  { %vm2177_vm5 = vcmp.lt.s32.totalorder %v5914_v14, 2  ;;  %v2189_v7 = vsel %vm2179_vm2, %v2175_v37, 1326507024  ;;  %v2188_v11 = vsel %vm2176_vm3, %v5919_v33, %v5924_v61  ;;  %v1979_v29 = vand.u32 3, %v1978_v58 }
 0x182   :  { %v1965_v9 = vmul.f32 %v1964_v24, %v1962_v30  ;;  %v1972_v28 = vmul.f32 %v1971_v32, %v1962_v30  ;;  %v2088_v49 = vadd.s32 536870912, %v2087_v41  ;;  %v2190_v27 = vsel %vm2178_vm4, %v2172_v21, %v2189_v7 }
 0x183   :  { %v5945_v50 = vshll.u32 %v2152_v15, 8  ;;  %v2163_v45 = vor.u32 %v2162_v47, %v2161_v42  ;;  %v2185_v0 = vsel %vm2179_vm2, %v2172_v21, 920167782  ;;  %v2191_v52 = vsel %vm2177_vm5, %v2188_v11, %v2190_v27 }
 0x184   :  { %v1966_v18 = vadd.f32 -0.4999988, %v1965_v9  ;;  %v1973_v44 = vadd.f32 -0.16666654, %v1972_v28  ;;  %v5947_v54 = vshrl.u32 %v2088_v49, 30  ;;  %vm1980_vm6 = vcmp.lt.s32.totalorder %v1979_v29, 2 }
 0x185   :  { %v2193_v17 = vand.u32 65535, %v5945_v50  ;;  %v2194_v15 = vshrl.u32 %v5945_v50, 16  ;;  %vm1984_vm7 = vcmp.eq.s32.totalorder %v1979_v29, 2  ;;  %v2196_v32 = vshrl.u32 %v2191_v52, 16 }
 0x186   :  { %v1967_v63 = vmul.f32 %v1966_v18, %v1962_v30  ;;  %v1974_v62 = vmul.f32 %v1973_v44, %v1962_v30  ;;  %v2090_v24 = vshll.u32 %v5947_v54, 30  ;;  %v2195_v30 = vand.u32 65535, %v2191_v52 }
 0x187   :  { %vm1981_vm8 = vcmp.eq.s32.totalorder %v1979_v29, 0  ;;  %v2184_v42 = vsel %vm2176_vm3, %v2163_v45, %v5919_v33  ;;  %v2186_v9 = vsel %vm2178_vm4, %v5924_v61, %v2185_v0  ;;  %v2198_v47 = vmul.u32 %v2196_v32, %v2193_v17 }
 0x188   :  { %v5954_v35 = vadd.f32 1.0, %v1967_v63  ;;  %v1975_v6 = vadd.f32 1.0, %v1974_v62  ;;  %v2091_v2 = vsub.s32 %v2087_v41, %v2090_v24  ;;  %v2197_v28 = vmul.u32 %v2195_v30, %v2193_v17 }
 0x189   :  { %v5971_v7 = vmul.u32 %v2195_v30, %v2194_v15  ;;  %vm1977_vm10 = vweird.f32 %v5411_v20  ;;  %v2201_v18 = vshll.u32 %v2198_v47, 16  ;;  %v2187_v49 = vsel %vm2177_vm5, %v2184_v42, %v2186_v9 }
 0x18a   :  { %v5958_v37 = vmul.f32 %v1975_v6, %v1960_v5  ;;  %v6876_v58 = vxor.u32 2147483648, %v5954_v35  ;;  %vm2092_vm9 = vcmp.lt.s32.totalorder %v2091_v2, 0  ;;  %v2093_v41 = vsub.s32 0, %v2091_v2 }
 0x18b   :  { %vm2205_vm11 = vc.u32 %v2197_v28, %v2201_v18  ;;  %v2203_v0 = vshll.u32 %v5971_v7, 16  ;;  %v2200_v6 = vmul.u32 %v2196_v32, %v2194_v15  ;;  %v2217_v24 = vand.u32 65535, %v2187_v49 }
 0x18c   :  { %v6877_v21 = vxor.u32 2147483648, %v5958_v37  ;;  %v1986_v5 = vsel %vm1984_vm7, %v6876_v58, %v5958_v37  ;;  %v2094_v27 = vsel %vm2092_vm9, %v2093_v41, %v2091_v2  ;;  %v2218_v30 = vshrl.u32 %v2187_v49, 16 }
 0x18d   :  { %v2095_v62 = vclz %v2094_v27  ;;  %v2206_v42 = vsel %vm2205_vm11, 1, %v6897_v10  ;;  %v2207_v29 = vadd.s32 %v2201_v18, %v2197_v28  ;;  %v5989_v9 = vand.u32 3, %v5911_v59 }
 0x18e   :  { %v1983_v44 = vsel %vm1981_vm8, %v5954_v35, %v6877_v21  ;;  %v2160_v41 = vshrl.u32 %v6908_v23, %v5886_v13  ;;  %v2208_v32 = vadd.s32 %v2206_v42, %v2200_v6  ;;  %v2221_v49 = vmul.u32 %v2217_v24, %v2194_v15 }
 0x18f   :  { %v1987_v11 = vsel %vm1980_vm6, %v1983_v44, %v1986_v5  ;;  %v4547_v58 = vadd.s32 4294967294, %v2095_v62  ;;  %v2083_v5 = vadd.s32 %v5892_v31, %v5899_v57  ;;  %vm2209_vm13 = vc.u32 %v2207_v29, %v2203_v0 }
 0x190   :  { %v5982_v63 = vsel %vm1977_vm10, nan, %v1987_v11  ;;  %v2220_v11 = vmul.u32 %v2218_v30, %v2193_v17  ;;  %v2210_v28 = vsel %vm2209_vm13, 1, %v6897_v10  ;;  %vm2599_vm14 = vcmp.eq.s32.totalorder %v5989_v9, 0 }
 0x191   :  { %v2916_v52 = vmul.f32 %v5982_v63, %v6905_v22  ;;  %vm4548_vm12 = vcmp.lt.s32.totalorder %v4547_v58, 0  ;;  %vm1991_vm15 = vcmp.lt.s32.totalorder %v5776_v55, 0  ;;  %v2219_v59 = vmul.u32 %v2217_v24, %v2193_v17  ;;  %v6919_v24 = vld [vmem:[#allocation11_spill] sm:$0xff] }
 0x192   :  { %v2098_v44 = vsel %vm4548_vm12, 0, %v4547_v58  ;;  %v2180_v13 = vsel %vm2176_vm3, %v2160_v41, %v2163_v45  ;;  %v2202_v18 = vshrl.u32 %v2198_v47, 16  ;;  %v2212_v58 = vadd.s32 %v2210_v28, %v2208_v32 }
 0x193   :  { %2921 = vst [vmem:[#allocation5 + $0x108] sm:$0xff] %v2916_v52  ;;  %v2099_v27 = vsub.s32 32, %v2098_v44  ;;  %v2100_v62 = vshll.u32 %v2091_v2, %v2098_v44  ;;  %v2103_v21 = vsub.s32 4294967266, %v2098_v44  ;;  %v2222_v0 = vmul.u32 %v2218_v30, %v2194_v15 }
 0x194   :  { %v2223_v52 = vshll.u32 %v2220_v11, 16  ;;  %v2225_v6 = vshll.u32 %v2221_v49, 16  ;;  %v2113_v29 = vsub.s32 4, %v5947_v54  ;;  %v2181_v44 = vsel %vm2179_vm2, %v5924_v61, 2102212464 }
 0x195   :  { %v2101_v31 = vshrl.u32 %v2083_v5, %v2099_v27  ;;  %v2104_v57 = vadd.s32 127, %v2103_v21  ;;  %v2204_v17 = vshrl.u32 %v5971_v7, 16  ;;  %v6006_v5 = vmul.f32 17.0, %v6919_v24 }
 0x196   :  { %vm2227_vm0 = vc.u32 %v2219_v59, %v2223_v52  ;;  %v2229_v21 = vadd.s32 %v2223_v52, %v2219_v59  ;;  %v2213_v15 = vadd.s32 %v2212_v58, %v2202_v18  ;;  %v2182_v41 = vsel %vm2178_vm4, %v5919_v33, %v2181_v44 }
 0x197   :  { %v2102_v42 = vor.u32 %v2101_v31, %v2100_v62  ;;  %v2105_v2 = vshll.u32 %v2104_v57, 23  ;;  %6920 = vst [vmem:[#allocation13_spill] sm:$0xff] %v6006_v5  ;;  %v2228_v30 = vsel %vm2227_vm0, 1, %v6897_v10  ;;  %v2224_v32 = vshrl.u32 %v2220_v11, 16 }
 0x198   :  { %v2230_v27 = vadd.s32 %v2228_v30, %v2222_v0  ;;  %vm2231_vm1 = vc.u32 %v2229_v21, %v2225_v6  ;;  %v2114_v7 = vsel %vm1991_vm15, %v2113_v29, %v5947_v54  ;;  %v3150_v28 = vand.u32 2139095040, %v6006_v5 }
 0x199   :  { %v2106_v45 = vor.u32 4788187, %v2105_v2  ;;  %v2109_v47 = vcvt.s32.f32 %v2102_v42  ;;  %v2232_v62 = vsel %vm2231_vm1, 1, %v6897_v10  ;;  %vm2602_vm2 = vcmp.eq.s32.totalorder %v5989_v9, 2 }
 0x19a   :  { %v6921_v59 = vand.u32 2147483647, %v5776_v55  ;;  %v2226_v33 = vshrl.u32 %v2221_v49, 16  ;;  %v2234_v11 = vadd.s32 %v2232_v62, %v2230_v27  ;;  %v2214_v18 = vadd.s32 %v2213_v15, %v2204_v17 }
 0x19b   :  { %v2107_v61 = vand.u32 2147483647, %v2106_v45  ;;  %v2233_v58 = vadd.s32 %v2229_v21, %v2225_v6  ;;  %v3151_v0 = vshrl.u32 %v3150_v28, 23  ;;  %vm2598_vm4 = vcmp.lt.s32.totalorder %v5989_v9, 2 }
 0x19c   :  { %vm6020_vm3 = vcmp.le.f32.partialorder %v6921_v59, 0.7853982  ;;  %v2183_v52 = vsel %vm2177_vm5, %v2180_v13, %v2182_v41  ;;  %v2235_v42 = vadd.s32 %v2234_v11, %v2224_v32  ;;  %v6924_v2 = vxor.u32 2147483648, %v5958_v37 }
 0x19d   :  { %v2110_v57 = vmul.f32 %v2109_v47, %v2107_v61  ;;  %v2116_v54 = vsel %vm6020_vm3, 0, %v2114_v7  ;;  %v6925_v29 = vxor.u32 2147483648, %v5954_v35  ;;  %v4564_v17 = vadd.s32 4294967169, %v3151_v0 }
 0x19e   :  { %v2601_v49 = vsel %vm2599_vm14, %v5954_v35, %v6924_v2  ;;  %v2236_v21 = vadd.s32 %v2235_v42, %v2226_v33  ;;  %v6878_v24 = vand.u32 2147483647, %v6006_v5  ;;  %v2237_v13 = vmul.u32 %v5945_v50, %v2183_v52 }
 0x19f   :  { %v2604_v6 = vsel %vm2602_vm2, %v6925_v29, %v5958_v37  ;;  %v2111_v44 = vxor.u32 2147483648, %v2110_v57  ;;  %vm2239_vm5 = vc.u32 %v2214_v18, %v2233_v58  ;;  %v3157_v45 = vadd.s32 1, %v4564_v17 }
 0x1a0   :  { %v2605_v47 = vsel %vm2598_vm4, %v2601_v49, %v2604_v6  ;;  %v2133_v15 = vadd.s32 3, %v2116_v54  ;;  %v2240_v35 = vadd.s32 1, %v2236_v21  ;;  %v3154_v41 = vand.u32 8388607, %v6878_v24 }
 0x1a1   :  { %v2112_v14 = vsel %vm1991_vm15, %v2111_v44, %v2110_v57  ;;  %vm3158_vm6 = vcmp.gt.s32.totalorder %v3157_v45, 0  ;;  %v6048_v27 = vsel %vm1977_vm10, nan, %v2605_v47  ;;  %v6052_v62 = vmul.f32 %v5808_v19, %v6906_v60 }
 0x1a2   :  { %v2115_v9 = vsel %vm6020_vm3, %v5776_v55, %v2112_v14  ;;  %v2241_v30 = vsel %vm2239_vm5, %v2240_v35, %v2236_v21  ;;  %v3159_v32 = vsel %vm3158_vm6, %v3157_v45, 0  ;;  %v6054_v28 = vand.u32 3, %v2133_v15 }
 0x1a3   :  { %v2117_v37 = vmul.f32 %v2115_v9, %v2115_v9  ;;  %v2242_v7 = vadd.s32 %v2241_v30, %v2237_v13  ;;  %v3161_v59 = vand.u32 31, %v3159_v32  ;;  %v6056_v11 = vand.u32 3, %v2116_v54 }
 0x1a4   :  { %v6060_v20 = vmul.f32 %v5810_v3, %v6904_v43  ;;  %v6064_v0 = vmul.f32 %v5830_v16, %v6906_v60  ;;  %v6068_v19 = vmul.f32 %v6048_v27, %v5480_v36  ;;  %v3155_v52 = vor.u32 8388608, %v3154_v41 }
 0x1a5   :  { %v2118_v50 = vmul.f32 -0.001358992, %v2117_v37  ;;  %v2125_v61 = vmul.f32 -0.00019511016, %v2117_v37  ;;  %v2243_v57 = vadd.s32 536870912, %v2242_v7  ;;  %vm2146_vm7 = vcmp.lt.s32.totalorder %v5796_v4, 0 }
 0x1a6   :  { %v6071_v49 = vshrl.u32 %v3159_v32, 5  ;;  %v6075_v3 = vmul.f32 %v5982_v63, %v5476_v12  ;;  %vm2136_vm8 = vcmp.eq.s32.totalorder %v6054_v28, 0  ;;  %vm2139_vm9 = vcmp.eq.s32.totalorder %v6054_v28, 2 }
 0x1a7   :  { %v2119_v31 = vadd.f32 0.041655596, %v2118_v50  ;;  %v2126_v33 = vadd.f32 0.008332121, %v2125_v61  ;;  %v2244_v54 = vshrl.u32 %v2243_v57, 30  ;;  %v6079_v29 = vsub.s32 32, %v3161_v59 }
 0x1a8   :  { %vm2135_vm10 = vcmp.lt.s32.totalorder %v6054_v28, 2  ;;  %vm2753_vm11 = vcmp.eq.s32.totalorder %v6056_v11, 0  ;;  %vm2132_vm12 = vweird.f32 %v5776_v55  ;;  %vm2752_vm13 = vcmp.lt.s32.totalorder %v6056_v11, 2 }
 0x1a9   :  { %v2120_v42 = vmul.f32 %v2119_v31, %v2117_v37  ;;  %v2127_v2 = vmul.f32 %v2126_v33, %v2117_v37  ;;  %v2245_v17 = vshll.u32 %v2244_v54, 30  ;;  %vm2756_vm14 = vcmp.eq.s32.totalorder %v6056_v11, 2 }
 0x1aa   :  { %v6926_v21 = vand.u32 2147483647, %v5796_v4  ;;  %v2238_v13 = vadd.s32 %v2233_v58, %v2214_v18  ;;  %v6092_v45 = vshll.u32 %v3155_v52, 8  ;;  %vm3179_vm0 = vcmp.lt.s32.totalorder %v6071_v49, 1 }
 0x1ab   :  { %v2121_v6 = vadd.f32 -0.4999988, %v2120_v42  ;;  %v2128_v44 = vadd.f32 -0.16666654, %v2127_v2  ;;  %v6094_v35 = vsub.s32 %v2242_v7, %v2245_v17  ;;  %v2268_v30 = vsub.s32 4, %v2244_v54 }
 0x1ac   :  { %vm6088_vm15 = vcmp.le.f32.partialorder %v6926_v21, 0.7853982  ;;  %v3167_v41 = vshll.u32 %v6909_v25, %v3161_v59  ;;  %v3176_v32 = vshll.u32 %v6915_v38, %v3161_v59  ;;  %v3177_v50 = vshrl.u32 %v6916_v39, %v6079_v29 }
 0x1ad   :  { %v2122_v47 = vmul.f32 %v2121_v6, %v2117_v37  ;;  %v2129_v15 = vmul.f32 %v2128_v44, %v2117_v37  ;;  %vm2247_vm1 = vcmp.lt.s32.totalorder %v6094_v35, 0  ;;  %v2248_v18 = vsub.s32 0, %v6094_v35 }
 0x1ae   :  { %v3168_v58 = vshrl.u32 %v6913_v34, %v6079_v29  ;;  %v3170_v37 = vshll.u32 %v6913_v34, %v3161_v59  ;;  %v3171_v7 = vshrl.u32 %v6914_v56, %v6079_v29  ;;  %v3173_v33 = vshll.u32 %v6914_v56, %v3161_v59 }
 0x1af   :  { %v2123_v61 = vadd.f32 1.0, %v2122_v47  ;;  %v2130_v31 = vadd.f32 1.0, %v2129_v15  ;;  %v2249_v42 = vsel %vm2247_vm1, %v2248_v18, %v6094_v35  ;;  %v3174_v2 = vshrl.u32 %v6915_v38, %v6079_v29 }
 0x1b0   :  { %v2250_v6 = vclz %v2249_v42  ;;  %v2269_v44 = vsel %vm2146_vm7, %v2268_v30, %v2244_v54  ;;  %v3164_v17 = vshll.u32 %v6908_v23, %v3161_v59  ;;  %v3165_v21 = vshrl.u32 %v6909_v25, %v6079_v29 }
 0x1b1   :  { %v2131_v57 = vmul.f32 %v2130_v31, %v2115_v9  ;;  %v2140_v52 = vxor.u32 2147483648, %v2123_v61  ;;  %v3178_v31 = vor.u32 %v3177_v50, %v3176_v32  ;;  %v6121_v24 = vor.u32 %v3168_v58, %v3167_v41 }
 0x1b2   :  { %v4550_v18 = vadd.s32 4294967294, %v2250_v6  ;;  %v6123_v42 = vor.u32 %v3171_v7, %v3170_v37  ;;  %vm3182_vm2 = vcmp.lt.s32.totalorder %v6071_v49, 4  ;;  %v2271_v30 = vsel %vm6088_vm15, 0, %v2269_v44 }
 0x1b3   :  { %v2137_v47 = vxor.u32 2147483648, %v2131_v57  ;;  %v2141_v15 = vsel %vm2139_vm9, %v2140_v52, %v2131_v57  ;;  %v2758_v9 = vsel %vm2756_vm14, %v2140_v52, %v2131_v57  ;;  %v3175_v5 = vor.u32 %v3174_v2, %v3173_v33 }
 0x1b4   :  { %vm4551_vm3 = vcmp.lt.s32.totalorder %v4550_v18, 0  ;;  %vm3181_vm4 = vcmp.lt.s32.totalorder %v6071_v49, 3  ;;  %v3192_v37 = vsel %vm3182_vm2, %v3178_v31, 1326507024  ;;  %vm3180_vm5 = vcmp.lt.s32.totalorder %v6071_v49, 2 }
 0x1b5   :  { %v2138_v59 = vsel %vm2136_vm8, %v2123_v61, %v2137_v47  ;;  %v2755_v54 = vsel %vm2753_vm11, %v2123_v61, %v2137_v47  ;;  %v2253_v61 = vsel %vm4551_vm3, 0, %v4550_v18  ;;  %v3191_v11 = vsel %vm3179_vm0, %v6121_v24, %v6123_v42 }
 0x1b6   :  { %v2142_v32 = vsel %vm2135_vm10, %v2138_v59, %v2141_v15  ;;  %v2759_v41 = vsel %vm2752_vm13, %v2755_v54, %v2758_v9  ;;  %v2254_v57 = vsub.s32 32, %v2253_v61  ;;  %v2255_v55 = vshll.u32 %v6094_v35, %v2253_v61 }
 0x1b7   :  { %v2143_v50 = vsel %vm2132_vm12, nan, %v2142_v32  ;;  %v2760_v58 = vsel %vm2132_vm12, nan, %v2759_v41  ;;  %v2258_v52 = vsub.s32 4294967266, %v2253_v61  ;;  %v2925_v2 = vmul.f32 %v5982_v63, %v5480_v36 }
 0x1b8   :  { %v2917_v7 = vmul.f32 %v2143_v50, %v5485_v53  ;;  %v2938_v28 = vmul.f32 %v2760_v58, %v5495_v46  ;;  %v2942_v33 = vmul.f32 %v2143_v50, %v5491_v1  ;;  %v2929_v6 = vmul.f32 %v6048_v27, %v5476_v12 }
 0x1b9   :  { %v2945_v44 = vsub.f32 %v6068_v19, %v6075_v3  ;;  %v3193_v47 = vsel %vm3181_vm4, %v3175_v5, %v3192_v37  ;;  %v2256_v15 = vshrl.u32 %v2238_v13, %v2254_v57  ;;  %v2259_v9 = vadd.s32 127, %v2258_v52 }
 0x1ba   :  { %2922 = vst [vmem:[#allocation5 + $0x110] sm:$0xff] %v2917_v7  ;;  %v6160_v31 = vor.u32 %v3165_v21, %v3164_v17  ;;  %v3194_v35 = vsel %vm3180_vm5, %v3191_v11, %v3193_v47  ;;  %v2946_v18 = vsub.f32 %v2938_v28, %v2942_v33  ;;  %v2288_v59 = vadd.s32 3, %v2271_v30 }
 0x1bb   :  { %v3188_v63 = vsel %vm3182_vm2, %v3175_v5, 920167782  ;;  %v6167_v27 = vand.u32 65535, %v6092_v45  ;;  %v2926_v19 = vmul.f32 %v2143_v50, %v5495_v46  ;;  %v2930_v3 = vmul.f32 %v2760_v58, %v5491_v1 }
 0x1bc   :  { %v2257_v54 = vor.u32 %v2256_v15, %v2255_v55  ;;  %v2260_v13 = vshll.u32 %v2259_v9, 23  ;;  %v2970_v17 = vmul.f32 %v2945_v44, %v5480_v36  ;;  %v6173_v21 = vshrl.u32 %v6092_v45, 16 }
 0x1bd   :  { %v3198_v32 = vand.u32 65535, %v3194_v35  ;;  %v3199_v41 = vshrl.u32 %v3194_v35, 16  ;;  %v6179_v5 = vsel %vm3179_vm0, %v6160_v31, %v6121_v24  ;;  %v6184_v50 = vsel %vm3181_vm4, %v6123_v42, %v3188_v63 }
 0x1be   :  { %v2261_v61 = vor.u32 4788187, %v2260_v13  ;;  %v2264_v37 = vcvt.s32.f32 %v2257_v54  ;;  %v2971_v58 = vmul.f32 %v2946_v18, %v5495_v46  ;;  %v6187_v7 = vand.u32 3, %v2288_v59 }
 0x1bf   :  { %v6189_v28 = vand.u32 3, %v2271_v30  ;;  %v6192_v11 = vmul.u32 %v3199_v41, %v6167_v27  ;;  %v2932_v57 = vadd.f32 %v6060_v20, %v6052_v62  ;;  %v2933_v55 = vadd.f32 %v2929_v6, %v2925_v2 }
 0x1c0   :  { %v2262_v33 = vand.u32 2147483647, %v2261_v61  ;;  %v2934_v52 = vadd.f32 %v2930_v3, %v2926_v19  ;;  %v6197_v47 = vmul.u32 %v3198_v32, %v6167_v27  ;;  %v6200_v15 = vmul.u32 %v3198_v32, %v6173_v21 }
 0x1c1   :  { %v6203_v9 = vmul.u32 %v3199_v41, %v6173_v21  ;;  %v2948_v59 = vmul.f32 %v2932_v57, %v6903_v51  ;;  %v2973_v63 = vmul.f32 %v2932_v57, %v6904_v43  ;;  %v2949_v62 = vmul.f32 %v2933_v55, %v6905_v22 }
 0x1c2   :  { %v2265_v35 = vmul.f32 %v2264_v37, %v2262_v33  ;;  %v2974_v20 = vmul.f32 %v2933_v55, %v5476_v12  ;;  %v2950_v2 = vmul.f32 %v2934_v52, %v5485_v53  ;;  %v2975_v6 = vmul.f32 %v2934_v52, %v5491_v1 }
 0x1c3   :  { %v2957_v19 = vmul.f32 %v2932_v57, %v6906_v60  ;;  %2953 = vst [vmem:[#allocation5 + $0x120] sm:$0xff] %v2948_v59  ;;  %v2961_v54 = vmul.f32 %v5830_v16, %v6904_v43  ;;  %v2958_v13 = vmul.f32 %v2933_v55, %v5480_v36  ;;  %v2962_v32 = vmul.f32 %v2945_v44, %v5476_v12 }
 0x1c4   :  { %v2266_v3 = vxor.u32 2147483648, %v2265_v35  ;;  %2954 = vst [vmem:[#allocation5 + $0x128] sm:$0xff] %v2949_v62  ;;  %v2959_v41 = vmul.f32 %v2934_v52, %v5495_v46  ;;  %v2963_v61 = vmul.f32 %v2946_v18, %v5491_v1  ;;  %v2977_v37 = vsub.f32 %v6064_v0, %v2973_v63 }
 0x1c5   :  { %v2978_v33 = vsub.f32 %v2970_v17, %v2974_v20  ;;  %2955 = vst [vmem:[#allocation5 + $0x130] sm:$0xff] %v2950_v2  ;;  %v2965_v59 = vadd.f32 %v2961_v54, %v2957_v19  ;;  %v2966_v30 = vadd.f32 %v2962_v32, %v2958_v13  ;;  %v2979_v39 = vsub.f32 %v2971_v58, %v2975_v6 }
 0x1c6   :  { %v2267_v57 = vsel %vm2146_vm7, %v2266_v3, %v2265_v35  ;;  %v2967_v44 = vadd.f32 %v2963_v61, %v2959_v41  ;;  %v2994_v55 = vmul.f32 %v2977_v37, %v6904_v43  ;;  %v3002_v13 = vmul.f32 %v2977_v37, %v6906_v60 }
 0x1c7   :  { %v6225_v16 = vsel %vm6088_vm15, %v5796_v4, %v2267_v57  ;;  %v2995_v18 = vmul.f32 %v2978_v33, %v5476_v12  ;;  %v2981_v17 = vmul.f32 %v2965_v59, %v6903_v51  ;;  %v3006_v52 = vmul.f32 %v2965_v59, %v6904_v43 }
 0x1c8   :  { %v2272_v0 = vmul.f32 %v6225_v16, %v6225_v16  ;;  %v2982_v35 = vmul.f32 %v2966_v30, %v6905_v22  ;;  %v3007_v58 = vmul.f32 %v2966_v30, %v5476_v12  ;;  %v2983_v14 = vmul.f32 %v2967_v44, %v5485_v53 }
 0x1c9   :  { %v3008_v63 = vmul.f32 %v2967_v44, %v5491_v1  ;;  %v2990_v62 = vmul.f32 %v2965_v59, %v6906_v60  ;;  %2986 = vst [vmem:[#allocation5 + $0x140] sm:$0xff] %v2981_v17  ;;  %v2991_v6 = vmul.f32 %v2966_v30, %v5480_v36  ;;  %v2992_v19 = vmul.f32 %v2967_v44, %v5495_v46 }
 0x1ca   :  { %v2273_v20 = vmul.f32 -0.001358992, %v2272_v0  ;;  %v2280_v2 = vmul.f32 -0.00019511016, %v2272_v0  ;;  %2987 = vst [vmem:[#allocation5 + $0x148] sm:$0xff] %v2982_v35  ;;  %v2996_v54 = vmul.f32 %v2979_v39, %v5491_v1  ;;  %v3003_v32 = vmul.f32 %v2978_v33, %v5480_v36 }
 0x1cb   :  { %v2998_v3 = vadd.f32 %v2994_v55, %v2990_v62  ;;  %2988 = vst [vmem:[#allocation5 + $0x150] sm:$0xff] %v2983_v14  ;;  %v2999_v57 = vadd.f32 %v2995_v18, %v2991_v6  ;;  %v3004_v59 = vmul.f32 %v2979_v39, %v5495_v46  ;;  %vm2294_vm6 = vcmp.eq.s32.totalorder %v6187_v7, 2 }
 0x1cc   :  { %v2274_v41 = vadd.f32 0.041655596, %v2273_v20  ;;  %v2281_v61 = vadd.f32 0.008332121, %v2280_v2  ;;  %vm2910_vm7 = vcmp.eq.s32.totalorder %v6189_v28, 2  ;;  %v3000_v55 = vadd.f32 %v2996_v54, %v2992_v19 }
 0x1cd   :  { %v3014_v30 = vmul.f32 %v2998_v3, %v6903_v51  ;;  %v3039_v44 = vmul.f32 %v2998_v3, %v6904_v43  ;;  %v3010_v17 = vsub.f32 %v3002_v13, %v3006_v52  ;;  %v3015_v33 = vmul.f32 %v2999_v57, %v6905_v22 }
 0x1ce   :  { %v2275_v35 = vmul.f32 %v2274_v41, %v2272_v0  ;;  %v2282_v37 = vmul.f32 %v2281_v61, %v2272_v0  ;;  %v3040_v62 = vmul.f32 %v2999_v57, %v5476_v12  ;;  %vm2291_vm8 = vcmp.eq.s32.totalorder %v6187_v7, 0 }
 0x1cf   :  { %vm2907_vm9 = vcmp.eq.s32.totalorder %v6189_v28, 0  ;;  %3019 = vst [vmem:[#allocation5 + $0x160] sm:$0xff] %v3014_v30  ;;  %v3016_v39 = vmul.f32 %v3000_v55, %v5485_v53  ;;  %v3041_v18 = vmul.f32 %v3000_v55, %v5491_v1  ;;  %v3023_v14 = vmul.f32 %v2998_v3, %v6906_v60 }
 0x1d0   :  { %v3027_v20 = vmul.f32 %v3010_v17, %v6904_v43  ;;  %v2276_v52 = vadd.f32 -0.4999988, %v2275_v35  ;;  %v2283_v2 = vadd.f32 -0.16666654, %v2282_v37  ;;  %vm2290_vm10 = vcmp.lt.s32.totalorder %v6187_v7, 2  ;;  %3020 = vst [vmem:[#allocation5 + $0x168] sm:$0xff] %v3015_v33 }
 0x1d1   :  { %vm2906_vm11 = vcmp.lt.s32.totalorder %v6189_v28, 2  ;;  %v3011_v6 = vsub.f32 %v3003_v32, %v3007_v58  ;;  %v3024_v19 = vmul.f32 %v2999_v57, %v5480_v36  ;;  %vm2287_vm12 = vweird.f32 %v5796_v4  ;;  %3021 = vst [vmem:[#allocation5 + $0x170] sm:$0xff] %v3016_v39 }
 0x1d2   :  { %v3031_v54 = vadd.f32 %v3027_v20, %v3023_v14  ;;  %v3012_v13 = vsub.f32 %v3004_v59, %v3008_v63  ;;  %v3025_v41 = vmul.f32 %v3000_v55, %v5495_v46  ;;  %v3035_v3 = vmul.f32 %v3010_v17, %v6906_v60 }
 0x1d3   :  { %v2277_v61 = vmul.f32 %v2276_v52, %v2272_v0  ;;  %v2284_v30 = vmul.f32 %v2283_v2, %v2272_v0  ;;  %v3028_v35 = vmul.f32 %v3011_v6, %v5476_v12  ;;  %v3036_v37 = vmul.f32 %v3011_v6, %v5480_v36 }
 0x1d4   :  { %v3047_v33 = vmul.f32 %v3031_v54, %v6903_v51  ;;  %v3029_v58 = vmul.f32 %v3012_v13, %v5491_v1  ;;  %v3043_v32 = vsub.f32 %v3035_v3, %v3039_v44  ;;  %v3056_v57 = vmul.f32 %v3031_v54, %v6906_v60 }
 0x1d5   :  { %v2278_v39 = vadd.f32 1.0, %v2277_v61  ;;  %v2285_v14 = vadd.f32 1.0, %v2284_v30  ;;  %v3032_v63 = vadd.f32 %v3028_v35, %v3024_v19  ;;  %v3044_v59 = vsub.f32 %v3036_v37, %v3040_v62 }
 0x1d6   :  { %3052 = vst [vmem:[#allocation5 + $0x180] sm:$0xff] %v3047_v33  ;;  %v3033_v55 = vadd.f32 %v3029_v58, %v3025_v41  ;;  %v3060_v17 = vmul.f32 %v3043_v32, %v6904_v43  ;;  %v3037_v0 = vmul.f32 %v3012_v13, %v5495_v46  ;;  %v3068_v20 = vmul.f32 %v3043_v32, %v6906_v60 }
 0x1d7   :  { %v2286_v52 = vmul.f32 %v2285_v14, %v6225_v16  ;;  %v2295_v2 = vxor.u32 2147483648, %v2278_v39  ;;  %v3048_v6 = vmul.f32 %v3032_v63, %v6905_v22  ;;  %v3057_v44 = vmul.f32 %v3032_v63, %v5480_v36 }
 0x1d8   :  { %v3049_v3 = vmul.f32 %v3033_v55, %v5485_v53  ;;  %v3064_v61 = vadd.f32 %v3060_v17, %v3056_v57  ;;  %v3061_v62 = vmul.f32 %v3044_v59, %v5476_v12  ;;  %v3045_v19 = vsub.f32 %v3037_v0, %v3041_v18 }
 0x1d9   :  { %v2292_v41 = vxor.u32 2147483648, %v2286_v52  ;;  %v2296_v30 = vsel %vm2294_vm6, %v2295_v2, %v2286_v52  ;;  %v2912_v13 = vsel %vm2910_vm7, %v2295_v2, %v2286_v52  ;;  %3053 = vst [vmem:[#allocation5 + $0x188] sm:$0xff] %v3048_v6  ;;  %v3058_v16 = vmul.f32 %v3033_v55, %v5495_v46 }
 0x1da   :  { %3054 = vst [vmem:[#allocation5 + $0x190] sm:$0xff] %v3049_v3  ;;  %v3080_v35 = vmul.f32 %v3064_v61, %v6903_v51  ;;  %v3065_v37 = vadd.f32 %v3061_v62, %v3057_v44  ;;  %v3062_v33 = vmul.f32 %v3045_v19, %v5491_v1  ;;  %v3072_v58 = vmul.f32 %v3031_v54, %v6904_v43 }
 0x1db   :  { %v2293_v18 = vsel %vm2291_vm8, %v2278_v39, %v2292_v41  ;;  %v2909_v32 = vsel %vm2907_vm9, %v2278_v39, %v2292_v41  ;;  %v3089_v57 = vmul.f32 %v3064_v61, %v6906_v60  ;;  %v3069_v14 = vmul.f32 %v3044_v59, %v5480_v36 }
 0x1dc   :  { %v2297_v17 = vsel %vm2290_vm10, %v2293_v18, %v2296_v30  ;;  %v2913_v0 = vsel %vm2906_vm11, %v2909_v32, %v2912_v13  ;;  %3085 = vst [vmem:[#allocation5 + $0x1a0] sm:$0xff] %v3080_v35  ;;  %v3081_v52 = vmul.f32 %v3065_v37, %v6905_v22  ;;  %v3066_v54 = vadd.f32 %v3062_v33, %v3058_v16 }
 0x1dd   :  { %v2298_v2 = vsel %vm2287_vm12, nan, %v2297_v17  ;;  %v2914_v39 = vsel %vm2287_vm12, nan, %v2913_v0  ;;  %v3076_v6 = vsub.f32 %v3068_v20, %v3072_v58  ;;  %v3073_v44 = vmul.f32 %v3032_v63, %v5476_v12 }
 0x1de   :  { %v2918_v59 = vmul.f32 %v2298_v2, %v5487_v48  ;;  %v2927_v7 = vmul.f32 %v2298_v2, %v5630_v40  ;;  %v2931_v28 = vmul.f32 %v2914_v39, %v5626_v26  ;;  %v2939_v3 = vmul.f32 %v2914_v39, %v5630_v40  ;;  %3086 = vst [vmem:[#allocation5 + $0x1a8] sm:$0xff] %v3081_v52 }
 0x1df   :  { %v2943_v62 = vmul.f32 %v2298_v2, %v5626_v26  ;;  %v3082_v41 = vmul.f32 %v3066_v54, %v5485_v53  ;;  %v3093_v30 = vmul.f32 %v3076_v6, %v6904_v43  ;;  %v3077_v4 = vsub.f32 %v3069_v14, %v3073_v44 }
 0x1e0   :  { %2923 = vst [vmem:[#allocation5 + $0x118] sm:$0xff] %v2918_v59  ;;  %v2935_v20 = vadd.f32 %v2931_v28, %v2927_v7  ;;  %v3090_v63 = vmul.f32 %v3065_v37, %v5480_v36  ;;  %v3070_v13 = vmul.f32 %v3045_v19, %v5495_v46  ;;  %v3074_v16 = vmul.f32 %v3033_v55, %v5491_v1 }
 0x1e1   :  { %v2947_v35 = vsub.f32 %v2939_v3, %v2943_v62  ;;  %3087 = vst [vmem:[#allocation5 + $0x1b0] sm:$0xff] %v3082_v41  ;;  %v3097_v33 = vadd.f32 %v3093_v30, %v3089_v57  ;;  %v3094_v58 = vmul.f32 %v3077_v4, %v5476_v12  ;;  %v3091_v18 = vmul.f32 %v3066_v54, %v5495_v46 }
 0x1e2   :  { %v2951_v32 = vmul.f32 %v2935_v20, %v5487_v48  ;;  %v2976_v17 = vmul.f32 %v2935_v20, %v5626_v26  ;;  %v2960_v14 = vmul.f32 %v2935_v20, %v5630_v40  ;;  %v3078_v0 = vsub.f32 %v3070_v13, %v3074_v16 }
 0x1e3   :  { %v2972_v52 = vmul.f32 %v2947_v35, %v5630_v40  ;;  %v2964_v19 = vmul.f32 %v2947_v35, %v5626_v26  ;;  %v3113_v55 = vmul.f32 %v3097_v33, %v6903_v51  ;;  %v3098_v2 = vadd.f32 %v3094_v58, %v3090_v63 }
 0x1e4   :  { %2956 = vst [vmem:[#allocation5 + $0x138] sm:$0xff] %v2951_v32  ;;  %v3095_v57 = vmul.f32 %v3078_v0, %v5491_v1  ;;  %v3101_v39 = vmul.f32 %v3076_v6, %v6906_v60  ;;  %v3105_v44 = vmul.f32 %v3064_v61, %v6904_v43  ;;  %v3122_v59 = vmul.f32 %v3097_v33, %v6906_v60 }
 0x1e5   :  { %v2968_v7 = vadd.f32 %v2964_v19, %v2960_v14  ;;  %v2980_v28 = vsub.f32 %v2972_v52, %v2976_v17  ;;  %3118 = vst [vmem:[#allocation5 + $0x1c0] sm:$0xff] %v3113_v55  ;;  %v3114_v3 = vmul.f32 %v3098_v2, %v6905_v22  ;;  %v3102_v62 = vmul.f32 %v3077_v4, %v5480_v36 }
 0x1e6   :  { %v3099_v41 = vadd.f32 %v3095_v57, %v3091_v18  ;;  %v3109_v30 = vsub.f32 %v3101_v39, %v3105_v44  ;;  %v3106_v20 = vmul.f32 %v3065_v37, %v5476_v12  ;;  %v3123_v63 = vmul.f32 %v3098_v2, %v5480_v36 }
 0x1e7   :  { %v2984_v13 = vmul.f32 %v2968_v7, %v5487_v48  ;;  %v3009_v6 = vmul.f32 %v2968_v7, %v5626_v26  ;;  %v2993_v61 = vmul.f32 %v2968_v7, %v5630_v40  ;;  %v2997_v16 = vmul.f32 %v2980_v28, %v5626_v26  ;;  %3119 = vst [vmem:[#allocation5 + $0x1c8] sm:$0xff] %v3114_v3 }
 0x1e8   :  { %v3005_v35 = vmul.f32 %v2980_v28, %v5630_v40  ;;  %v3115_v33 = vmul.f32 %v3099_v41, %v5485_v53  ;;  %v3126_v4 = vmul.f32 %v3109_v30, %v6904_v43  ;;  %v3110_v58 = vsub.f32 %v3102_v62, %v3106_v20 }
 0x1e9   :  { %2989 = vst [vmem:[#allocation5 + $0x158] sm:$0xff] %v2984_v13  ;;  %v3001_v37 = vadd.f32 %v2997_v16, %v2993_v61  ;;  %v3103_v18 = vmul.f32 %v3078_v0, %v5495_v46  ;;  %v3107_v32 = vmul.f32 %v3066_v54, %v5491_v1  ;;  %v3206_v17 = vshll.u32 %v6200_v15, 16 }
 0x1ea   :  { %v3013_v14 = vsub.f32 %v3005_v35, %v3009_v6  ;;  %3120 = vst [vmem:[#allocation5 + $0x1d0] sm:$0xff] %v3115_v33  ;;  %v3130_v52 = vadd.f32 %v3126_v4, %v3122_v59  ;;  %v3127_v19 = vmul.f32 %v3110_v58, %v5476_v12  ;;  %v3124_v55 = vmul.f32 %v3099_v41, %v5495_v46 }
 0x1eb   :  { %v3017_v2 = vmul.f32 %v3001_v37, %v5487_v48  ;;  %v3042_v57 = vmul.f32 %v3001_v37, %v5626_v26  ;;  %v3026_v39 = vmul.f32 %v3001_v37, %v5630_v40  ;;  %v3111_v44 = vsub.f32 %v3103_v18, %v3107_v32 }
 0x1ec   :  { %v3030_v0 = vmul.f32 %v3013_v14, %v5626_v26  ;;  %v3038_v54 = vmul.f32 %v3013_v14, %v5630_v40  ;;  %v3134_v7 = vmul.f32 %v3130_v52, %v6903_v51  ;;  %v3131_v28 = vadd.f32 %v3127_v19, %v3123_v63 }
 0x1ed   :  { %3022 = vst [vmem:[#allocation5 + $0x178] sm:$0xff] %v3017_v2  ;;  %v3128_v59 = vmul.f32 %v3111_v44, %v5491_v1  ;;  %v3190_v3 = vsel %vm3180_vm5, %v6179_v5, %v6184_v50  ;;  %v6929_v62 = vshll.u32 %v6192_v11, 16  ;;  %v3205_v52 = vshrl.u32 %v6192_v11, 16 }
 0x1ee   :  { %v3034_v20 = vadd.f32 %v3030_v0, %v3026_v39  ;;  %v3046_v13 = vsub.f32 %v3038_v54, %v3042_v57  ;;  %3139 = vst [vmem:[#allocation5 + $0x1e0] sm:$0xff] %v3134_v7  ;;  %v3135_v63 = vmul.f32 %v3131_v28, %v6905_v22  ;;  %v3220_v5 = vand.u32 65535, %v3190_v3 }
 0x1ef   :  { %vm3208_vm13 = vc.u32 %v6197_v47, %v6929_v62  ;;  %v6930_v41 = vmov %v6929_v62  ;;  %v3132_v61 = vadd.f32 %v3128_v59, %v3124_v55  ;;  %v3221_v18 = vshrl.u32 %v3190_v3, 16 }
 0x1f0   :  { %v3210_v30 = vadd.s32 %v6930_v41, %v6197_v47  ;;  %v3209_v6 = vsel %vm3208_vm13, 1, %v6897_v10  ;;  %v3050_v50 = vmul.f32 %v3034_v20, %v5487_v48  ;;  %v3059_v35 = vmul.f32 %v3034_v20, %v5630_v40  ;;  %3140 = vst [vmem:[#allocation5 + $0x1e8] sm:$0xff] %v3135_v63 }
 0x1f1   :  { %v3211_v16 = vadd.s32 %v3209_v6, %v6203_v9  ;;  %v3063_v33 = vmul.f32 %v3046_v13, %v5626_v26  ;;  %v3071_v47 = vmul.f32 %v3046_v13, %v5630_v40  ;;  %v3075_v4 = vmul.f32 %v3034_v20, %v5626_v26 }
 0x1f2   :  { %vm3212_vm14 = vc.u32 %v3210_v30, %v3206_v17  ;;  %v3136_v58 = vmul.f32 %v3132_v61, %v5485_v53  ;;  %3055 = vst [vmem:[#allocation5 + $0x198] sm:$0xff] %v3050_v50  ;;  %v3224_v32 = vmul.u32 %v3220_v5, %v6173_v21  ;;  %v6366_v17 = vmul.f32 17.0, %v4756_v8 }
 0x1f3   :  { %v3213_v37 = vsel %vm3212_vm14, 1, %v6897_v10  ;;  %v3067_v9 = vadd.f32 %v3063_v33, %v3059_v35  ;;  %v3079_v14 = vsub.f32 %v3071_v47, %v3075_v4  ;;  %v3222_v19 = vmul.u32 %v3220_v5, %v6167_v27 }
 0x1f4   :  { %3141 = vst [vmem:[#allocation5 + $0x1f0] sm:$0xff] %v3136_v58  ;;  %v3223_v55 = vmul.u32 %v3221_v18, %v6167_v27  ;;  %v3215_v44 = vadd.s32 %v3213_v37, %v3211_v16  ;;  %v3225_v54 = vmul.u32 %v3221_v18, %v6173_v21  ;;  %v3163_v11 = vshrl.u32 %v6908_v23, %v6079_v29 }
 0x1f5   :  { %v3083_v2 = vmul.f32 %v3067_v9, %v5487_v48  ;;  %v3092_v57 = vmul.f32 %v3067_v9, %v5630_v40  ;;  %v3108_v39 = vmul.f32 %v3067_v9, %v5626_v26  ;;  %v3096_v0 = vmul.f32 %v3079_v14, %v5626_v26 }
 0x1f6   :  { %v3104_v8 = vmul.f32 %v3079_v14, %v5630_v40  ;;  %v3226_v7 = vshll.u32 %v3223_v55, 16  ;;  %v3184_v27 = vsel %vm3182_vm2, %v6123_v42, 2102212464  ;;  %v3228_v28 = vshll.u32 %v3224_v32, 16 }
 0x1f7   :  { %3088 = vst [vmem:[#allocation5 + $0x1b8] sm:$0xff] %v3083_v2  ;;  %v3100_v59 = vadd.f32 %v3096_v0, %v3092_v57  ;;  %v3207_v41 = vshrl.u32 %v6200_v15, 16  ;;  %v3216_v30 = vadd.s32 %v3215_v44, %v3205_v52  ;;  %v3305_v21 = vand.u32 2139095040, %v6366_v17 }
 0x1f8   :  { %v3112_v3 = vsub.f32 %v3104_v8, %v3108_v39  ;;  %vm3230_vm15 = vc.u32 %v3222_v19, %v3226_v7  ;;  %v3232_v62 = vadd.s32 %v3226_v7, %v3222_v19  ;;  %v3227_v42 = vshrl.u32 %v3223_v55, 16 }
 0x1f9   :  { %v3231_v20 = vsel %vm3230_vm15, 1, %v6897_v10  ;;  %v3116_v13 = vmul.f32 %v3100_v59, %v5487_v48  ;;  %v3125_v29 = vmul.f32 %v3100_v59, %v5630_v40  ;;  %v3306_v61 = vshrl.u32 %v3305_v21, 23 }
 0x1fa   :  { %v3129_v63 = vmul.f32 %v3112_v3, %v5626_v26  ;;  %v3233_v6 = vadd.s32 %v3231_v20, %v3225_v54  ;;  %vm3234_vm1 = vc.u32 %v3232_v62, %v3228_v28  ;;  %v3183_v15 = vsel %vm3179_vm0, %v3163_v11, %v6160_v31 }
 0x1fb   :  { %3121 = vst [vmem:[#allocation5 + $0x1d8] sm:$0xff] %v3116_v13  ;;  %v3185_v5 = vsel %vm3181_vm4, %v6121_v24, %v3184_v27  ;;  %v3235_v50 = vsel %vm3234_vm1, 1, %v6897_v10  ;;  %v3229_v35 = vshrl.u32 %v3224_v32, 16  ;;  %v4567_v47 = vadd.s32 4294967169, %v3306_v61  ;;  %v6931_v24 = vld [vmem:[#allocation12_spill] sm:$0xff] }
 0x1fc   :  { %v3133_v16 = vadd.f32 %v3129_v63, %v3125_v29  ;;  %v3237_v33 = vadd.s32 %v3235_v50, %v3233_v6  ;;  %v6396_v58 = vadd.s32 %v3216_v30, %v3207_v41  ;;  %v6398_v37 = vadd.s32 %v3232_v62, %v3228_v28 }
 0x1fd   :  { %v3186_v18 = vsel %vm3180_vm5, %v3183_v15, %v3185_v5  ;;  %v3302_v31 = vand.u32 2147483647, %v6366_v17  ;;  %v3312_v14 = vadd.s32 1, %v4567_v47  ;;  %v6404_v52 = vmul.f32 17.0, %v6931_v24 }
 0x1fe   :  { %v3137_v4 = vmul.f32 %v3133_v16, %v5487_v48  ;;  %v3238_v9 = vadd.s32 %v3237_v33, %v3227_v42  ;;  %v3240_v19 = vmul.u32 %v6092_v45, %v3186_v18  ;;  %vm3242_vm2 = vc.u32 %v6396_v58, %v6398_v37 }
 0x1ff   :  { %vm3313_vm0 = vcmp.gt.s32.totalorder %v3312_v14, 0  ;;  %v3309_v49 = vand.u32 8388607, %v3302_v31  ;;  %v3460_v44 = vand.u32 2139095040, %v6404_v52  ;;  %v6932_v21 = vmov 1326507024  }
 0x200   :  { %3142 = vst [vmem:[#allocation5 + $0x1f8] sm:$0xff] %v3137_v4  ;;  %v3239_v32 = vadd.s32 %v3238_v9, %v3229_v35  ;;  %v3314_v55 = vsel %vm3313_vm0, %v3312_v14, 0 }
 0x201   :  { %v3316_v57 = vand.u32 31, %v3314_v55  ;;  %v6411_v39 = vshrl.u32 %v3314_v55, 5  ;;  %v3310_v59 = vor.u32 8388608, %v3309_v49  ;;  %v3461_v42 = vshrl.u32 %v3460_v44, 23 }
 0x202   :  { %v3243_v2 = vadd.s32 1, %v3239_v32 }
 0x203   :  { %v3317_v8 = vsub.s32 32, %v3316_v57  ;;  %v3319_v54 = vshll.u32 %v6908_v23, %v3316_v57  ;;  %v3322_v7 = vshll.u32 %v6909_v25, %v3316_v57  ;;  %v3325_v11 = vshll.u32 %v6913_v34, %v3316_v57 }
 0x204   :  { %v3244_v0 = vsel %vm3242_vm2, %v3243_v2, %v3239_v32  ;;  %v3328_v27 = vshll.u32 %v6914_v56, %v3316_v57  ;;  %v3331_v28 = vshll.u32 %v6915_v38, %v3316_v57  ;;  %vm3334_vm3 = vcmp.lt.s32.totalorder %v6411_v39, 1 }
 0x205   :  { %v3245_v45 = vadd.s32 %v3244_v0, %v3240_v19  ;;  %v3320_v3 = vshrl.u32 %v6909_v25, %v3317_v8  ;;  %v3323_v62 = vshrl.u32 %v6913_v34, %v3317_v8  ;;  %v3326_v41 = vshrl.u32 %v6914_v56, %v3317_v8 }
 0x206   :  { %v3329_v20 = vshrl.u32 %v6915_v38, %v3317_v8  ;;  %v3332_v13 = vshrl.u32 %v6932_v21, %v3317_v8  ;;  %vm3336_vm4 = vcmp.lt.s32.totalorder %v6411_v39, 3  ;;  %vm3335_vm5 = vcmp.lt.s32.totalorder %v6411_v39, 2 }
 0x207   :  { %v3246_v30 = vadd.s32 536870912, %v3245_v45  ;;  %v3321_v29 = vor.u32 %v3320_v3, %v3319_v54  ;;  %v3324_v63 = vor.u32 %v3323_v62, %v3322_v7  ;;  %v3327_v6 = vor.u32 %v3326_v41, %v3325_v11  ;;  %v6933_v41 = vld [vmem:[#allocation13_spill] sm:$0xff] }
 0x208   :  { %v3330_v16 = vor.u32 %v3329_v20, %v3328_v27  ;;  %v3333_v15 = vor.u32 %v3332_v13, %v3331_v28  ;;  %vm3337_vm6 = vcmp.lt.s32.totalorder %v6411_v39, 4  ;;  %v6430_v50 = vshll.u32 %v3310_v59, 8 }
 0x209   :  { %v3247_v61 = vshrl.u32 %v3246_v30, 30  ;;  %v3342_v5 = vsel %vm3334_vm3, %v3321_v29, %v3324_v63  ;;  %v3346_v4 = vsel %vm3334_vm3, %v3324_v63, %v3327_v6  ;;  %v4570_v9 = vadd.s32 4294967169, %v3461_v42 }
 0x20a   :  { %v3343_v33 = vsel %vm3337_vm6, %v3330_v16, 920167782  ;;  %v3347_v18 = vsel %vm3337_vm6, %v3333_v15, 1326507024  ;;  %v3351_v19 = vand.u32 65535, %v6430_v50  ;;  %v3352_v57 = vshrl.u32 %v6430_v50, 16 }
 0x20b   :  { %v3248_v35 = vshll.u32 %v3247_v61, 30  ;;  %v3344_v47 = vsel %vm3336_vm4, %v3327_v6, %v3343_v33  ;;  %v3348_v32 = vsel %vm3336_vm4, %v3330_v16, %v3347_v18  ;;  %v3318_v44 = vshrl.u32 %v6908_v23, %v3317_v8 }
 0x20c   :  { %v3345_v24 = vsel %vm3335_vm5, %v3342_v5, %v3344_v47  ;;  %v3349_v49 = vsel %vm3335_vm5, %v3346_v4, %v3348_v32  ;;  %v3467_v7 = vadd.s32 1, %v4570_v9  ;;  %v3339_v11 = vsel %vm3337_vm6, %v3327_v6, 2102212464 }
 0x20d   :  { %v3249_v14 = vsub.s32 %v3245_v45, %v3248_v35  ;;  %v3376_v55 = vshrl.u32 %v3345_v24, 16  ;;  %v3353_v0 = vand.u32 65535, %v3349_v49  ;;  %v3354_v54 = vshrl.u32 %v3349_v49, 16 }
 0x20e   :  { %v3375_v27 = vand.u32 65535, %v3345_v24  ;;  %vm3149_vm8 = vcmp.lt.s32.totalorder %v6933_v41, 0  ;;  %v3241_v30 = vadd.s32 %v6398_v37, %v6396_v58  ;;  %v3457_v8 = vand.u32 2147483647, %v6404_v52 }
 0x20f   :  { %vm3250_vm7 = vcmp.lt.s32.totalorder %v3249_v14, 0  ;;  %v3251_v2 = vsub.s32 0, %v3249_v14  ;;  %v3355_v59 = vmul.u32 %v3353_v0, %v3351_v19  ;;  %v3356_v3 = vmul.u32 %v3354_v54, %v3351_v19 }
 0x210   :  { %v3378_v62 = vmul.u32 %v3376_v55, %v3351_v19  ;;  %v3357_v20 = vmul.u32 %v3353_v0, %v3352_v57  ;;  %v3338_v42 = vsel %vm3334_vm3, %v3318_v44, %v3321_v29  ;;  %vm3468_vm9 = vcmp.gt.s32.totalorder %v3467_v7, 0 }
 0x211   :  { %v3252_v45 = vsel %vm3250_vm7, %v3251_v2, %v3249_v14  ;;  %v3359_v16 = vshll.u32 %v3356_v3, 16  ;;  %v3271_v6 = vsub.s32 4, %v3247_v61  ;;  %v3340_v15 = vsel %vm3336_vm4, %v3324_v63, %v3339_v11 }
 0x212   :  { %v3253_v28 = vclz %v3252_v45  ;;  %v3358_v5 = vmul.u32 %v3354_v54, %v3352_v57  ;;  %v3379_v35 = vmul.u32 %v3375_v27, %v3352_v57  ;;  %v3377_v33 = vmul.u32 %v3375_v27, %v3351_v19 }
 0x213   :  { %vm3363_vm11 = vc.u32 %v3355_v59, %v3359_v16  ;;  %v3381_v47 = vshll.u32 %v3378_v62, 16  ;;  %v3361_v37 = vshll.u32 %v3357_v20, 16  ;;  %v3365_v18 = vadd.s32 %v3359_v16, %v3355_v59 }
 0x214   :  { %v4565_v13 = vadd.s32 4294967294, %v3253_v28  ;;  %v3364_v4 = vsel %vm3363_vm11, 1, %v6897_v10  ;;  %v6934_v9 = vand.u32 2147483647, %v6933_v41  ;;  %v3469_v2 = vsel %vm3468_vm9, %v3467_v7, 0 }
 0x215   :  { %v3272_v19 = vsel %vm3149_vm8, %v3271_v6, %v3247_v61  ;;  %v3366_v49 = vadd.s32 %v3364_v4, %v3358_v5  ;;  %v3380_v44 = vmul.u32 %v3376_v55, %v3352_v57  ;;  %v3383_v0 = vshll.u32 %v3379_v35, 16 }
 0x216   :  { %vm4566_vm10 = vcmp.lt.s32.totalorder %v4565_v13, 0  ;;  %vm6462_vm12 = vcmp.le.f32.partialorder %v6934_v9, 0.7853982  ;;  %v3341_v11 = vsel %vm3335_vm5, %v3338_v42, %v3340_v15  ;;  %v3382_v27 = vshrl.u32 %v3378_v62, 16 }
 0x217   :  { %v3256_v58 = vsel %vm4566_vm10, 0, %v4565_v13  ;;  %v3360_v28 = vshrl.u32 %v3356_v3, 16  ;;  %vm3367_vm13 = vc.u32 %v3365_v18, %v3361_v37  ;;  %vm3385_vm14 = vc.u32 %v3377_v33, %v3381_v47 }
 0x218   :  { %v3257_v24 = vsub.s32 32, %v3256_v58  ;;  %v3258_v32 = vshll.u32 %v3249_v14, %v3256_v58  ;;  %v3261_v63 = vsub.s32 4294967266, %v3256_v58  ;;  %v3387_v59 = vadd.s32 %v3381_v47, %v3377_v33 }
 0x219   :  { %v3368_v7 = vsel %vm3367_vm13, 1, %v6897_v10  ;;  %v3386_v16 = vsel %vm3385_vm14, 1, %v6897_v10  ;;  %v3362_v61 = vshrl.u32 %v3357_v20, 16  ;;  %v3471_v42 = vand.u32 31, %v3469_v2 }
 0x21a   :  { %v3259_v54 = vshrl.u32 %v3241_v30, %v3257_v24  ;;  %v3262_v45 = vadd.s32 127, %v3261_v63  ;;  %v3370_v6 = vadd.s32 %v3368_v7, %v3366_v49  ;;  %v3388_v55 = vadd.s32 %v3386_v16, %v3380_v44 }
 0x21b   :  { %vm3389_vm15 = vc.u32 %v3387_v59, %v3383_v0  ;;  %v3384_v3 = vshrl.u32 %v3379_v35, 16  ;;  %v6474_v5 = vshrl.u32 %v3469_v2, 5  ;;  %v6476_v47 = vadd.s32 %v3387_v59, %v3383_v0 }
 0x21c   :  { %v3260_v14 = vor.u32 %v3259_v54, %v3258_v32  ;;  %v3263_v13 = vshll.u32 %v3262_v45, 23  ;;  %v3390_v39 = vsel %vm3389_vm15, 1, %v6897_v10  ;;  %v3371_v62 = vadd.s32 %v3370_v6, %v3360_v28 }
 0x21d   :  { %v3392_v15 = vadd.s32 %v3390_v39, %v3388_v55  ;;  %v3464_v58 = vand.u32 8388607, %v3457_v8  ;;  %v6480_v20 = vsub.s32 32, %v3471_v42  ;;  %v3274_v37 = vsel %vm6462_vm12, 0, %v3272_v19 }
 0x21e   :  { %v3264_v57 = vor.u32 4788187, %v3263_v13  ;;  %v3267_v30 = vcvt.s32.f32 %v3260_v14  ;;  %v6484_v4 = vadd.s32 %v3371_v62, %v3362_v61  ;;  %v3395_v9 = vmul.u32 %v6430_v50, %v3341_v11 }
 0x21f   :  { %v3393_v18 = vadd.s32 %v3392_v15, %v3382_v27  ;;  %v3477_v24 = vshll.u32 %v6909_v25, %v3471_v42  ;;  %v3478_v32 = vshrl.u32 %v6913_v34, %v6480_v20  ;;  %v3480_v63 = vshll.u32 %v6913_v34, %v3471_v42 }
 0x220   :  { %v3265_v33 = vand.u32 2147483647, %v3264_v57  ;;  %v3481_v49 = vshrl.u32 %v6914_v56, %v6480_v20  ;;  %v3483_v44 = vshll.u32 %v6914_v56, %v3471_v42  ;;  %vm3489_vm1 = vcmp.lt.s32.totalorder %v6474_v5, 1 }
 0x221   :  { %v3394_v2 = vadd.s32 %v3393_v18, %v3384_v3  ;;  %vm3397_vm0 = vc.u32 %v6484_v4, %v6476_v47  ;;  %v3474_v50 = vshll.u32 %v6908_v23, %v3471_v42  ;;  %v3484_v0 = vshrl.u32 %v6915_v38, %v6480_v20 }
 0x222   :  { %v3268_v35 = vmul.f32 %v3267_v30, %v3265_v33  ;;  %v3475_v45 = vshrl.u32 %v6909_v25, %v6480_v20  ;;  %v3486_v11 = vshll.u32 %v6915_v38, %v3471_v42  ;;  %v3487_v27 = vshrl.u32 %v6932_v21, %v6480_v20 }
 0x223   :  { %v3398_v54 = vadd.s32 1, %v3394_v2  ;;  %v6507_v59 = vor.u32 %v3478_v32, %v3477_v24  ;;  %v6509_v14 = vor.u32 %v3481_v49, %v3480_v63  ;;  %vm3492_vm2 = vcmp.lt.s32.totalorder %v6474_v5, 4 }
 0x224   :  { %v3269_v19 = vxor.u32 2147483648, %v3268_v35  ;;  %v3485_v16 = vor.u32 %v3484_v0, %v3483_v44  ;;  %v3488_v61 = vor.u32 %v3487_v27, %v3486_v11  ;;  %v3465_v57 = vor.u32 8388608, %v3464_v58 }
 0x225   :  { %v3399_v7 = vsel %vm3397_vm0, %v3398_v54, %v3394_v2  ;;  %vm3491_vm3 = vcmp.lt.s32.totalorder %v6474_v5, 3  ;;  %v3291_v30 = vadd.s32 3, %v3274_v37  ;;  %v6516_v39 = vor.u32 %v3475_v45, %v3474_v50 }
 0x226   :  { %v3270_v28 = vsel %vm3149_vm8, %v3269_v19, %v3268_v35  ;;  %v3400_v55 = vadd.s32 %v3399_v7, %v3395_v9  ;;  %vm3490_vm4 = vcmp.lt.s32.totalorder %v6474_v5, 2  ;;  %v3502_v42 = vsel %vm3492_vm2, %v3488_v61, 1326507024 }
 0x227   :  { %v3273_v13 = vsel %vm6462_vm12, %v6933_v41, %v3270_v28  ;;  %v3501_v15 = vsel %vm3489_vm1, %v6507_v59, %v6509_v14  ;;  %v3498_v33 = vsel %vm3492_vm2, %v3485_v16, 920167782  ;;  %v3503_v58 = vsel %vm3491_vm3, %v3485_v16, %v3502_v42 }
 0x228   :  { %v3275_v6 = vmul.f32 %v3273_v13, %v3273_v13  ;;  %v3401_v29 = vadd.s32 536870912, %v3400_v55  ;;  %v3292_v24 = vand.u32 3, %v3291_v30  ;;  %v3497_v32 = vsel %vm3489_vm1, %v6516_v39, %v6507_v59 }
 0x229   :  { %v3504_v63 = vsel %vm3490_vm4, %v3501_v15, %v3503_v58  ;;  %v6537_v2 = vshll.u32 %v3465_v57, 8  ;;  %v3499_v50 = vsel %vm3491_vm3, %v6509_v14, %v3498_v33  ;;  %v3911_v7 = vand.u32 3, %v3274_v37 }
 0x22a   :  { %v3276_v62 = vmul.f32 -0.001358992, %v3275_v6  ;;  %v3283_v3 = vmul.f32 -0.00019511016, %v3275_v6  ;;  %v6529_v35 = vshrl.u32 %v3401_v29, 30  ;;  %v3508_v45 = vand.u32 65535, %v3504_v63 }
 0x22b   :  { %v6544_v0 = vand.u32 65535, %v6537_v2  ;;  %v6547_v54 = vshrl.u32 %v6537_v2, 16  ;;  %v3509_v11 = vshrl.u32 %v3504_v63, 16  ;;  %v6551_v61 = vsel %vm3490_vm4, %v3497_v32, %v3499_v50 }
 0x22c   :  { %v3277_v18 = vadd.f32 0.041655596, %v3276_v62  ;;  %v3284_v9 = vadd.f32 0.008332121, %v3283_v3  ;;  %v3403_v19 = vshll.u32 %v6529_v35, 30  ;;  %vm3290_vm6 = vweird.f32 %v6933_v41 }
 0x22d   :  { %v3510_v57 = vmul.u32 %v3508_v45, %v6544_v0  ;;  %v6555_v30 = vmul.u32 %v3509_v11, %v6544_v0  ;;  %v6558_v42 = vmul.u32 %v3508_v45, %v6547_v54  ;;  %vm3293_vm7 = vcmp.lt.s32.totalorder %v3292_v24, 2 }
 0x22e   :  { %v3278_v49 = vmul.f32 %v3277_v18, %v3275_v6  ;;  %v3285_v44 = vmul.f32 %v3284_v9, %v3275_v6  ;;  %v3404_v16 = vsub.s32 %v3400_v55, %v3403_v19  ;;  %vm3294_vm8 = vcmp.eq.s32.totalorder %v3292_v24, 0 }
 0x22f   :  { %v3514_v37 = vshll.u32 %v6555_v30, 16  ;;  %vm3297_vm9 = vcmp.eq.s32.totalorder %v3292_v24, 2  ;;  %vm3916_vm10 = vcmp.eq.s32.totalorder %v3911_v7, 2  ;;  %v3531_v18 = vshrl.u32 %v6551_v61, 16 }
 0x230   :  { %v3279_v27 = vadd.f32 -0.4999988, %v3278_v49  ;;  %v3286_v28 = vadd.f32 -0.16666654, %v3285_v44  ;;  %vm3405_vm5 = vcmp.lt.s32.totalorder %v3404_v16, 0  ;;  %v3406_v29 = vsub.s32 0, %v3404_v16 }
 0x231   :  { %vm3518_vm11 = vc.u32 %v3510_v57, %v3514_v37  ;;  %v3520_v63 = vadd.s32 %v3514_v37, %v3510_v57  ;;  %vm3912_vm12 = vcmp.lt.s32.totalorder %v3911_v7, 2  ;;  %vm3913_vm13 = vcmp.eq.s32.totalorder %v3911_v7, 0 }
 0x232   :  { %v3280_v62 = vmul.f32 %v3279_v27, %v3275_v6  ;;  %v3287_v3 = vmul.f32 %v3286_v28, %v3275_v6  ;;  %v3407_v33 = vsel %vm3405_vm5, %v3406_v29, %v3404_v16  ;;  %v3516_v6 = vshll.u32 %v6558_v42, 16 }
 0x233   :  { %v3408_v58 = vclz %v3407_v33  ;;  %v3513_v44 = vmul.u32 %v3509_v11, %v6547_v54  ;;  %v3519_v27 = vsel %vm3518_vm11, 1, %v6897_v10  ;;  %v3396_v28 = vadd.s32 %v6476_v47, %v6484_v4 }
 0x234   :  { %v3281_v55 = vadd.f32 1.0, %v3280_v62  ;;  %v3288_v15 = vadd.f32 1.0, %v3287_v3  ;;  %v6570_v62 = vmul.u32 %v3531_v18, %v6544_v0  ;;  %vm3522_vm15 = vc.u32 %v3520_v63, %v3516_v6 }
 0x235   :  { %v4568_v49 = vadd.s32 4294967294, %v3408_v58  ;;  %v3521_v33 = vadd.s32 %v3519_v27, %v3513_v44  ;;  %v3523_v24 = vsel %vm3522_vm15, 1, %v6897_v10  ;;  %v3515_v6 = vshrl.u32 %v6555_v30, 16 }
 0x236   :  { %v3289_v9 = vmul.f32 %v3288_v15, %v3273_v13  ;;  %v3298_v32 = vxor.u32 2147483648, %v3281_v55  ;;  %v3530_v13 = vand.u32 65535, %v6551_v61  ;;  %vm3304_vm0 = vcmp.lt.s32.totalorder %v6366_v17, 0 }
 0x237   :  { %vm4569_vm14 = vcmp.lt.s32.totalorder %v4568_v49, 0  ;;  %v3525_v44 = vadd.s32 %v3523_v24, %v3521_v33  ;;  %v3494_v30 = vsel %vm3492_vm2, %v6509_v14, 2102212464  ;;  %v3537_v14 = vshrl.u32 %v6570_v62, 16 }
 0x238   :  { %v3295_v19 = vxor.u32 2147483648, %v3289_v9  ;;  %v3299_v50 = vsel %vm3297_vm9, %v3298_v32, %v3289_v9  ;;  %v3918_v45 = vsel %vm3916_vm10, %v3298_v32, %v3289_v9  ;;  %v3411_v29 = vsel %vm4569_vm14, 0, %v4568_v49 }
 0x239   :  { %v3412_v15 = vsub.s32 32, %v3411_v29  ;;  %v3413_v61 = vshll.u32 %v3404_v16, %v3411_v29  ;;  %v3416_v58 = vsub.s32 4294967266, %v3411_v29  ;;  %v3534_v32 = vmul.u32 %v3530_v13, %v6547_v54 }
 0x23a   :  { %v3296_v57 = vsel %vm3294_vm8, %v3281_v55, %v3295_v19  ;;  %v3915_v3 = vsel %vm3913_vm13, %v3281_v55, %v3295_v19  ;;  %v3532_v63 = vmul.u32 %v3530_v13, %v6544_v0  ;;  %v3536_v16 = vshll.u32 %v6570_v62, 16 }
 0x23b   :  { %v3300_v11 = vsel %vm3293_vm7, %v3296_v57, %v3299_v50  ;;  %v3919_v37 = vsel %vm3912_vm12, %v3915_v3, %v3918_v45  ;;  %v3414_v9 = vshrl.u32 %v3396_v28, %v3412_v15  ;;  %v3417_v7 = vadd.s32 127, %v3416_v58  ;;  %v6937_v57 = vld [vmem:[#allocation16_spill] sm:$0xff] }
 0x23c   :  { %v6577_v47 = vsel %vm3290_vm6, nan, %v3300_v11  ;;  %v6581_v4 = vsel %vm3290_vm6, nan, %v3919_v37  ;;  %v3473_v19 = vshrl.u32 %v6908_v23, %v6480_v20  ;;  %v3535_v50 = vmul.u32 %v3531_v18, %v6547_v54 }
 0x23d   :  { %v4383_v55 = vmul.f32 %v6577_v47, %v6903_v51  ;;  %v3415_v49 = vor.u32 %v3414_v9, %v3413_v61  ;;  %v3418_v41 = vshll.u32 %v3417_v7, 23  ;;  %v3538_v28 = vshll.u32 %v3534_v32, 16 }
 0x23e   :  { %v3426_v0 = vsub.s32 4, %v6529_v35  ;;  %vm3540_vm5 = vc.u32 %v3532_v63, %v3536_v16  ;;  %v3542_v13 = vadd.s32 %v3536_v16, %v3532_v63  ;;  %v6599_v3 = vmul.f32 17.0, %v6937_v57 }
 0x23f   :  { %4388 = vst [vmem:[#allocation5 + $0x200] sm:$0xff] %v4383_v55  ;;  %v3419_v45 = vor.u32 4788187, %v3418_v41  ;;  %v3422_v27 = vcvt.s32.f32 %v3415_v49  ;;  %v3517_v11 = vshrl.u32 %v6558_v42, 16  ;;  %v3526_v20 = vadd.s32 %v3525_v44, %v3515_v6 }
 0x240   :  { %v3541_v54 = vsel %vm3540_vm5, 1, %v6897_v10  ;;  %v3493_v18 = vsel %vm3489_vm1, %v3473_v19, %v6516_v39  ;;  %vm3544_vm2 = vc.u32 %v3542_v13, %v3538_v28  ;;  %v3495_v42 = vsel %vm3491_vm3, %v6507_v59, %v3494_v30 }
 0x241   :  { %v3420_v29 = vand.u32 2147483647, %v3419_v45  ;;  %v3543_v37 = vadd.s32 %v3541_v54, %v3535_v50  ;;  %v3545_v33 = vsel %vm3544_vm2, 1, %v6897_v10  ;;  %v3615_v61 = vand.u32 2139095040, %v6599_v3 }
 0x242   :  { %vm3303_vm1 = vcmp.le.f32.partialorder %v3302_v31, 0.7853982  ;;  %v3427_v39 = vsel %vm3304_vm0, %v3426_v0, %v6529_v35  ;;  %v3539_v62 = vshrl.u32 %v3534_v32, 16  ;;  %v6623_v55 = vadd.s32 %v3526_v20, %v3517_v11 }
 0x243   :  { %v3423_v15 = vmul.f32 %v3422_v27, %v3420_v29  ;;  %v3547_v58 = vadd.s32 %v3545_v33, %v3543_v37  ;;  %v6625_v24 = vadd.s32 %v3542_v13, %v3538_v28  ;;  %v3616_v9 = vshrl.u32 %v3615_v61, 23 }
 0x244   :  { %v3496_v7 = vsel %vm3490_vm4, %v3493_v18, %v3495_v42  ;;  %v6631_v35 = vsel %vm3303_vm1, 0, %v3427_v39  ;;  %v3612_v54 = vand.u32 2147483647, %v6599_v3  ;;  %vm3445_vm6 = vweird.f32 %v6366_v17 }
 0x245   :  { %v3424_v59 = vxor.u32 2147483648, %v3423_v15  ;;  %v3548_v31 = vadd.s32 %v3547_v58, %v3537_v14  ;;  %v4573_v32 = vadd.s32 4294967169, %v3616_v9  ;;  %v3550_v44 = vmul.u32 %v6537_v2, %v3496_v7 }
 0x246   :  { %vm3552_vm3 = vc.u32 %v6623_v55, %v6625_v24  ;;  %v3446_v5 = vadd.s32 3, %v6631_v35  ;;  %vm6713_vm5 = vcmp.le.f32.partialorder %v3457_v8, 0.7853982 }
 0x247   :  { %v3425_v6 = vsel %vm3304_vm0, %v3424_v59, %v3423_v15  ;;  %v3549_v49 = vadd.s32 %v3548_v31, %v3539_v62  ;;  %v3622_v16 = vadd.s32 1, %v4573_v32  ;;  %v3619_v62 = vand.u32 8388607, %v3612_v54 }
 0x248   :  { %v3428_v63 = vsel %vm3303_vm1, %v6366_v17, %v3425_v6  ;;  %v3447_v57 = vand.u32 3, %v3446_v5  ;;  %vm3459_vm0 = vcmp.lt.s32.totalorder %v6404_v52, 0  ;;  %v4408_v17 = vmul.f32 %v6577_v47, %v6904_v43 }
 0x249   :  { %v3430_v41 = vmul.f32 %v3428_v63, %v3428_v63  ;;  %v3553_v19 = vadd.s32 1, %v3549_v49  ;;  %vm3623_vm4 = vcmp.gt.s32.totalorder %v3622_v16, 0 }
 0x24a   :  { %v3624_v30 = vsel %vm3623_vm4, %v3622_v16, 0  ;;  %vm3448_vm7 = vcmp.lt.s32.totalorder %v3447_v57, 2  ;;  %vm3452_vm8 = vcmp.eq.s32.totalorder %v3447_v57, 2  ;;  %vm3449_vm10 = vcmp.eq.s32.totalorder %v3447_v57, 0 }
 0x24b   :  { %v3431_v50 = vmul.f32 -0.001358992, %v3430_v41  ;;  %v3438_v45 = vmul.f32 -0.00019511016, %v3430_v41  ;;  %v3554_v27 = vsel %vm3552_vm3, %v3553_v19, %v3549_v49  ;;  %v3626_v29 = vand.u32 31, %v3624_v30 }
 0x24c   :  { %v3555_v13 = vadd.s32 %v3554_v27, %v3550_v44  ;;  %v6648_v58 = vshrl.u32 %v3624_v30, 5 }
 0x24d   :  { %v3432_v28 = vadd.f32 0.041655596, %v3431_v50  ;;  %v3439_v0 = vadd.f32 0.008332121, %v3438_v45  ;;  %v6639_v18 = vsub.s32 32, %v3626_v29  ;;  %v3638_v42 = vshll.u32 %v6914_v56, %v3626_v29 }
 0x24e   :  { %v3556_v2 = vadd.s32 536870912, %v3555_v13  ;;  %v3629_v59 = vshll.u32 %v6908_v23, %v3626_v29  ;;  %v3632_v9 = vshll.u32 %v6909_v25, %v3626_v29  ;;  %v3635_v49 = vshll.u32 %v6913_v34, %v3626_v29 }
 0x24f   :  { %v3433_v11 = vmul.f32 %v3432_v28, %v3430_v41  ;;  %v3440_v20 = vmul.f32 %v3439_v0, %v3430_v41  ;;  %v3639_v7 = vshrl.u32 %v6915_v38, %v6639_v18  ;;  %v3633_v44 = vshrl.u32 %v6913_v34, %v6639_v18 }
 0x250   :  { %v6641_v15 = vshrl.u32 %v3556_v2, 30  ;;  %v3636_v16 = vshrl.u32 %v6914_v56, %v6639_v18  ;;  %v3641_v27 = vshll.u32 %v6915_v38, %v3626_v29  ;;  %v3642_v30 = vshrl.u32 %v6932_v21, %v6639_v18 }
 0x251   :  { %v3434_v14 = vadd.f32 -0.4999988, %v3433_v11  ;;  %v3441_v37 = vadd.f32 -0.16666654, %v3440_v20  ;;  %v3640_v5 = vor.u32 %v3639_v7, %v3638_v42  ;;  %vm3647_vm11 = vcmp.lt.s32.totalorder %v6648_v58, 4 }
 0x252   :  { %v3558_v39 = vshll.u32 %v6641_v15, 30  ;;  %v3637_v11 = vor.u32 %v3636_v16, %v3635_v49  ;;  %vm3644_vm12 = vcmp.lt.s32.totalorder %v6648_v58, 1  ;;  %vm3646_vm13 = vcmp.lt.s32.totalorder %v6648_v58, 3 }
 0x253   :  { %v3435_v33 = vmul.f32 %v3434_v14, %v3430_v41  ;;  %v3442_v61 = vmul.f32 %v3441_v37, %v3430_v41  ;;  %v3630_v41 = vshrl.u32 %v6909_v25, %v6639_v18  ;;  %v3653_v21 = vsel %vm3647_vm11, %v3640_v5, 920167782 }
 0x254   :  { %v3559_v32 = vsub.s32 %v3555_v13, %v3558_v39  ;;  %v3634_v13 = vor.u32 %v3633_v44, %v3632_v9  ;;  %v3643_v2 = vor.u32 %v3642_v30, %v3641_v27  ;;  %vm3645_vm14 = vcmp.lt.s32.totalorder %v6648_v58, 2 }
 0x255   :  { %v6654_v31 = vadd.f32 1.0, %v3435_v33  ;;  %v3443_v6 = vadd.f32 1.0, %v3442_v61  ;;  %v3631_v0 = vor.u32 %v3630_v41, %v3629_v59  ;;  %v3654_v57 = vsel %vm3646_vm13, %v3637_v11, %v3653_v21 }
 0x256   :  { %vm3560_vm9 = vcmp.lt.s32.totalorder %v3559_v32, 0  ;;  %v3561_v45 = vsub.s32 0, %v3559_v32  ;;  %v3551_v61 = vadd.s32 %v6625_v24, %v6623_v55  ;;  %v3657_v59 = vsel %vm3647_vm11, %v3643_v2, 1326507024 }
 0x257   :  { %v6663_v19 = vmul.f32 %v3443_v6, %v3428_v63  ;;  %v3453_v50 = vxor.u32 2147483648, %v6654_v31  ;;  %v3620_v63 = vor.u32 8388608, %v3619_v62  ;;  %v3652_v33 = vsel %vm3644_vm12, %v3631_v0, %v3634_v13 }
 0x258   :  { %v3562_v56 = vsel %vm3560_vm9, %v3561_v45, %v3559_v32  ;;  %v3656_v62 = vsel %vm3644_vm12, %v3634_v13, %v3637_v11  ;;  %v3655_v49 = vsel %vm3645_vm14, %v3652_v33, %v3654_v57  ;;  %v3658_v41 = vsel %vm3646_vm13, %v3640_v5, %v3657_v59 }
 0x259   :  { %v3450_v25 = vxor.u32 2147483648, %v6663_v19  ;;  %v3454_v34 = vsel %vm3452_vm8, %v3453_v50, %v6663_v19  ;;  %v3563_v28 = vclz %v3562_v56  ;;  %v6687_v37 = vshll.u32 %v3620_v63, 8 }
 0x25a   :  { %v3685_v44 = vand.u32 65535, %v3655_v49  ;;  %v3659_v27 = vsel %vm3645_vm14, %v3656_v62, %v3658_v41  ;;  %v3581_v33 = vsub.s32 4, %v6641_v15  ;;  %v3649_v57 = vsel %vm3647_vm11, %v3637_v11, 2102212464 }
 0x25b   :  { %v3451_v38 = vsel %vm3449_vm10, %v6654_v31, %v3450_v25  ;;  %v4571_v20 = vadd.s32 4294967294, %v3563_v28  ;;  %v3661_v55 = vand.u32 65535, %v6687_v37  ;;  %v3662_v24 = vshrl.u32 %v6687_v37, 16 }
 0x25c   :  { %v3455_v29 = vsel %vm3448_vm7, %v3451_v38, %v3454_v34  ;;  %v3663_v56 = vand.u32 65535, %v3659_v27  ;;  %v3664_v63 = vshrl.u32 %v3659_v27, 16  ;;  %v3628_v28 = vshrl.u32 %v6908_v23, %v6639_v18 }
 0x25d   :  { %v6685_v14 = vsel %vm3445_vm6, nan, %v3455_v29  ;;  %vm4572_vm15 = vcmp.lt.s32.totalorder %v4571_v20, 0  ;;  %v3689_v21 = vmul.u32 %v3685_v44, %v3662_v24  ;;  %v3650_v41 = vsel %vm3646_vm13, %v3634_v13, %v3649_v57 }
 0x25e   :  { %v4384_v42 = vmul.f32 %v6685_v14, %v6905_v22  ;;  %v3566_v39 = vsel %vm4572_vm15, 0, %v4571_v20  ;;  %v3665_v2 = vmul.u32 %v3663_v56, %v3661_v55  ;;  %v3668_v62 = vmul.u32 %v3664_v63, %v3662_v24 }
 0x25f   :  { %v3567_v9 = vsub.s32 32, %v3566_v39  ;;  %v3568_v7 = vshll.u32 %v3559_v32, %v3566_v39  ;;  %v3571_v6 = vsub.s32 4294967266, %v3566_v39  ;;  %v3686_v32 = vshrl.u32 %v3655_v49, 16 }
 0x260   :  { %4389 = vst [vmem:[#allocation5 + $0x208] sm:$0xff] %v4384_v42  ;;  %v3666_v42 = vmul.u32 %v3664_v63, %v3661_v55  ;;  %v3687_v39 = vmul.u32 %v3685_v44, %v3661_v55  ;;  %v3648_v23 = vsel %vm3644_vm12, %v3628_v28, %v3631_v0  ;;  %v3582_v28 = vsel %vm3459_vm0, %v3581_v33, %v6641_v15 }
 0x261   :  { %v3569_v16 = vshrl.u32 %v3551_v61, %v3567_v9  ;;  %v3572_v45 = vadd.s32 127, %v3571_v6  ;;  %v3688_v38 = vmul.u32 %v3686_v32, %v3661_v55  ;;  %v3667_v61 = vmul.u32 %v3663_v56, %v3662_v24 }
 0x262   :  { %v3669_v59 = vshll.u32 %v3666_v42, 16  ;;  %v3693_v6 = vshll.u32 %v3689_v21, 16  ;;  %vm3600_vm12 = vweird.f32 %v6404_v52 }
 0x263   :  { %v3570_v30 = vor.u32 %v3569_v16, %v3568_v7  ;;  %v3573_v34 = vshll.u32 %v3572_v45, 23  ;;  %v3691_v9 = vshll.u32 %v3688_v38, 16  ;;  %v3671_v18 = vshll.u32 %v3667_v61, 16 }
 0x264   :  { %v3690_v7 = vmul.u32 %v3686_v32, %v3662_v24  ;;  %vm3673_vm2 = vc.u32 %v3665_v2, %v3669_v59  ;;  %v3675_v16 = vadd.s32 %v3669_v59, %v3665_v2  ;;  %v3670_v45 = vshrl.u32 %v3666_v42, 16 }
 0x265   :  { %v3574_v29 = vor.u32 4788187, %v3573_v34  ;;  %v3577_v20 = vcvt.s32.f32 %v3570_v30  ;;  %v3674_v11 = vsel %vm3673_vm2, 1, %v6897_v10  ;;  %vm3695_vm1 = vc.u32 %v3687_v39, %v3691_v9 }
 0x266   :  { %v3697_v55 = vadd.s32 %v3691_v9, %v3687_v39  ;;  %v3676_v27 = vadd.s32 %v3674_v11, %v3668_v62  ;;  %vm3677_vm3 = vc.u32 %v3675_v16, %v3671_v18  ;;  %v3696_v30 = vsel %vm3695_vm1, 1, %v6897_v10 }
 0x267   :  { %v3575_v8 = vand.u32 2147483647, %v3574_v29  ;;  %v3678_v0 = vsel %vm3677_vm3, 1, %v6897_v10  ;;  %v3692_v24 = vshrl.u32 %v3688_v38, 16  ;;  %v3698_v32 = vadd.s32 %v3696_v30, %v3690_v7 }
 0x268   :  { %vm3699_vm4 = vc.u32 %v3697_v55, %v3693_v6  ;;  %v3672_v34 = vshrl.u32 %v3667_v61, 16  ;;  %v3680_v56 = vadd.s32 %v3678_v0, %v3676_v27  ;;  %v3701_v57 = vadd.s32 %v3697_v55, %v3693_v6 }
 0x269   :  { %v3578_v49 = vmul.f32 %v3577_v20, %v3575_v8  ;;  %v3700_v63 = vsel %vm3699_vm4, 1, %v6897_v10  ;;  %v3694_v20 = vshrl.u32 %v3689_v21, 16  ;;  %v3651_v39 = vsel %vm3645_vm14, %v3648_v23, %v3650_v41 }
 0x26a   :  { %v3702_v2 = vadd.s32 %v3700_v63, %v3698_v32  ;;  %v3681_v42 = vadd.s32 %v3680_v56, %v3670_v45  ;;  %v3584_v10 = vsel %vm6713_vm5, 0, %v3582_v28  ;;  %v3705_v18 = vmul.u32 %v6687_v37, %v3651_v39 }
 0x26b   :  { %v3579_v44 = vxor.u32 2147483648, %v3578_v49  ;;  %v3601_v21 = vadd.s32 3, %v3584_v10  ;;  %v4065_v0 = vand.u32 3, %v6631_v35  ;;  %vm3614_vm3 = vcmp.lt.s32.totalorder %v6599_v3, 0 }
 0x26c   :  { %v3703_v61 = vadd.s32 %v3702_v2, %v3692_v24  ;;  %v3682_v59 = vadd.s32 %v3681_v42, %v3672_v34 }
 0x26d   :  { %v3580_v13 = vsel %vm3459_vm0, %v3579_v44, %v3578_v49  ;;  %v3602_v45 = vand.u32 3, %v3601_v21  ;;  %vm4067_vm11 = vcmp.eq.s32.totalorder %v4065_v0, 0  ;;  %vm4070_vm13 = vcmp.eq.s32.totalorder %v4065_v0, 2 }
 0x26e   :  { %v3583_v29 = vsel %vm6713_vm5, %v6404_v52, %v3580_v13  ;;  %v3704_v15 = vadd.s32 %v3703_v61, %v3694_v20  ;;  %vm3707_vm7 = vc.u32 %v3682_v59, %v3701_v57  ;;  %v4219_v13 = vand.u32 3, %v3584_v10 }
 0x26f   :  { %v3585_v38 = vmul.f32 %v3583_v29, %v3583_v29  ;;  %vm3607_vm8 = vcmp.eq.s32.totalorder %v3602_v45, 2  ;;  %vm3604_vm9 = vcmp.eq.s32.totalorder %v3602_v45, 0  ;;  %vm3603_vm10 = vcmp.lt.s32.totalorder %v3602_v45, 2 }
 0x270   :  { %v3708_v7 = vadd.s32 1, %v3704_v15  ;;  %vm4221_vm15 = vcmp.eq.s32.totalorder %v4219_v13, 0  ;;  %vm4224_vm0 = vcmp.eq.s32.totalorder %v4219_v13, 2  ;;  %vm4066_vm5 = vcmp.lt.s32.totalorder %v4065_v0, 2 }
 0x271   :  { %v3586_v8 = vmul.f32 -0.001358992, %v3585_v38  ;;  %v3593_v62 = vmul.f32 -0.00019511016, %v3585_v38  ;;  %v4072_v42 = vsel %vm4070_vm13, %v3453_v50, %v6663_v19  ;;  %vm4220_vm2 = vcmp.lt.s32.totalorder %v4219_v13, 2 }
 0x272   :  { %v3709_v16 = vsel %vm3707_vm7, %v3708_v7, %v3704_v15  ;;  %v4392_v7 = vmul.f32 %v6577_v47, %v6906_v60 }
 0x273   :  { %v3587_v33 = vadd.f32 0.041655596, %v3586_v8  ;;  %v3594_v9 = vadd.f32 0.008332121, %v3593_v62  ;;  %v3710_v41 = vadd.s32 %v3709_v16, %v3705_v18 }
 0x275   :  { %v3588_v49 = vmul.f32 %v3587_v33, %v3585_v38  ;;  %v3595_v6 = vmul.f32 %v3594_v9, %v3585_v38  ;;  %v3711_v55 = vadd.s32 536870912, %v3710_v41  ;;  %v3706_v9 = vadd.s32 %v3701_v57, %v3682_v59 }
 0x276   :  { %v4404_v57 = vmul.f32 %v6581_v4, %v6906_v60  ;;  %v4393_v59 = vmul.f32 %v6685_v14, %v5480_v36 }
 0x277   :  { %v3589_v58 = vadd.f32 -0.4999988, %v3588_v49  ;;  %v3596_v23 = vadd.f32 -0.16666654, %v3595_v6  ;;  %v6743_v30 = vshrl.u32 %v3711_v55, 30  ;;  %v4396_v49 = vmul.f32 %v6581_v4, %v6904_v43 }
 0x278   :  { %v4412_v13 = vsub.f32 %v4404_v57, %v4408_v17 }
 0x279   :  { %v3590_v5 = vmul.f32 %v3589_v58, %v3585_v38  ;;  %v3597_v11 = vmul.f32 %v3596_v23, %v3585_v38  ;;  %v3713_v32 = vshll.u32 %v6743_v30, 30  ;;  %v4069_v38 = vsel %vm4067_vm11, %v6654_v31, %v3450_v25 }
 0x27a   :  { %v4073_v62 = vsel %vm4066_vm5, %v4069_v38, %v4072_v42  ;;  %v4409_v23 = vmul.f32 %v6685_v14, %v5476_v12  ;;  %v3736_v55 = vsub.s32 4, %v6743_v30  ;;  %v4400_v0 = vadd.f32 %v4396_v49, %v4392_v7 }
 0x27b   :  { %v3591_v44 = vadd.f32 1.0, %v3590_v5  ;;  %v3598_v27 = vadd.f32 1.0, %v3597_v11  ;;  %v3714_v63 = vsub.s32 %v3710_v41, %v3713_v32  ;;  %v4074_v18 = vsel %vm3445_vm6, nan, %v4073_v62 }
 0x27c   :  { %v4397_v52 = vmul.f32 %v4074_v18, %v5476_v12  ;;  %v4405_v58 = vmul.f32 %v4074_v18, %v5480_v36  ;;  %vm6782_vm6 = vcmp.le.f32.partialorder %v3612_v54, 0.7853982  ;;  %v4416_v54 = vmul.f32 %v4400_v0, %v6903_v51 }
 0x27d   :  { %v3599_v37 = vmul.f32 %v3598_v27, %v3583_v29  ;;  %v3608_v24 = vxor.u32 2147483648, %v3591_v44  ;;  %vm3715_vm14 = vcmp.lt.s32.totalorder %v3714_v63, 0  ;;  %v3716_v20 = vsub.s32 0, %v3714_v63 }
 0x27e   :  { %4421 = vst [vmem:[#allocation5 + $0x220] sm:$0xff] %v4416_v54  ;;  %v4441_v62 = vmul.f32 %v4400_v0, %v6904_v43 }
 0x27f   :  { %v3605_v34 = vxor.u32 2147483648, %v3599_v37  ;;  %v3609_v56 = vsel %vm3607_vm8, %v3608_v24, %v3599_v37  ;;  %v3717_v29 = vsel %vm3715_vm14, %v3716_v20, %v3714_v63  ;;  %v4226_v10 = vsel %vm4224_vm0, %v3608_v24, %v3599_v37 }
 0x280   :  { %v3718_v8 = vclz %v3717_v29  ;;  %v4401_v37 = vadd.f32 %v4397_v52, %v4393_v59  ;;  %v4429_v29 = vmul.f32 %v4412_v13, %v6904_v43 }
 0x281   :  { %v3606_v28 = vsel %vm3604_vm9, %v3591_v44, %v3605_v34  ;;  %v4223_v61 = vsel %vm4221_vm15, %v3591_v44, %v3605_v34  ;;  %v4413_v34 = vsub.f32 %v4405_v58, %v4409_v23 }
 0x282   :  { %v3610_v2 = vsel %vm3603_vm10, %v3606_v28, %v3609_v56  ;;  %v4574_v15 = vadd.s32 4294967294, %v3718_v8  ;;  %v4227_v33 = vsel %vm4220_vm2, %v4223_v61, %v4226_v10  ;;  %v4417_v28 = vmul.f32 %v4401_v37, %v6905_v22 }
 0x283   :  { %v3611_v35 = vsel %vm3600_vm12, nan, %v3610_v2  ;;  %v4228_v31 = vsel %vm3600_vm12, nan, %v4227_v33  ;;  %v4426_v38 = vmul.f32 %v4401_v37, %v5480_v36  ;;  %v4430_v42 = vmul.f32 %v4413_v34, %v5476_v12 }
 0x284   :  { %v4385_v39 = vmul.f32 %v3611_v35, %v5485_v53  ;;  %vm4575_vm1 = vcmp.lt.s32.totalorder %v4574_v15, 0  ;;  %v4394_v41 = vmul.f32 %v3611_v35, %v5495_v46  ;;  %v4398_v45 = vmul.f32 %v4228_v31, %v5491_v1  ;;  %4422 = vst [vmem:[#allocation5 + $0x228] sm:$0xff] %v4417_v28 }
 0x285   :  { %v3721_v25 = vsel %vm4575_vm1, 0, %v4574_v15  ;;  %v4406_v4 = vmul.f32 %v4228_v31, %v5495_v46  ;;  %v4410_v47 = vmul.f32 %v3611_v35, %v5491_v1  ;;  %v4425_v35 = vmul.f32 %v4400_v0, %v6906_v60 }
 0x286   :  { %4390 = vst [vmem:[#allocation5 + $0x210] sm:$0xff] %v4385_v39  ;;  %v3722_v19 = vsub.s32 32, %v3721_v25  ;;  %v3723_v50 = vshll.u32 %v3714_v63, %v3721_v25  ;;  %v3726_v21 = vsub.s32 4294967266, %v3721_v25  ;;  %v4402_v24 = vadd.f32 %v4398_v45, %v4394_v41 }
 0x287   :  { %v4414_v56 = vsub.f32 %v4406_v4, %v4410_v47  ;;  %v3737_v63 = vsel %vm3614_vm3, %v3736_v55, %v6743_v30  ;;  %v4437_v61 = vmul.f32 %v4412_v13, %v6906_v60  ;;  %v4433_v8 = vadd.f32 %v4429_v29, %v4425_v35 }
 0x288   :  { %v3724_v6 = vshrl.u32 %v3706_v9, %v3722_v19  ;;  %v3727_v16 = vadd.s32 127, %v3726_v21  ;;  %v4418_v20 = vmul.f32 %v4402_v24, %v5485_v53  ;;  %v4427_v39 = vmul.f32 %v4402_v24, %v5495_v46 }
 0x289   :  { %v4431_v30 = vmul.f32 %v4414_v56, %v5491_v1  ;;  %v4438_v15 = vmul.f32 %v4413_v34, %v5480_v36  ;;  %v4434_v33 = vadd.f32 %v4430_v42, %v4426_v38  ;;  %v4442_v18 = vmul.f32 %v4401_v37, %v5476_v12 }
 0x28a   :  { %v3725_v5 = vor.u32 %v3724_v6, %v3723_v50  ;;  %v3728_v11 = vshll.u32 %v3727_v16, 23  ;;  %4423 = vst [vmem:[#allocation5 + $0x230] sm:$0xff] %v4418_v20  ;;  %v4439_v25 = vmul.f32 %v4414_v56, %v5495_v46  ;;  %v4449_v19 = vmul.f32 %v4433_v8, %v6903_v51 }
 0x28b   :  { %v4435_v9 = vadd.f32 %v4431_v30, %v4427_v39  ;;  %v4445_v50 = vsub.f32 %v4437_v61, %v4441_v62  ;;  %v4458_v21 = vmul.f32 %v4433_v8, %v6906_v60  ;;  %v4450_v49 = vmul.f32 %v4434_v33, %v6905_v22 }
 0x28c   :  { %v3729_v27 = vor.u32 4788187, %v3728_v11  ;;  %v3732_v14 = vcvt.s32.f32 %v3725_v5  ;;  %v4446_v17 = vsub.f32 %v4438_v15, %v4442_v18  ;;  %4454 = vst [vmem:[#allocation5 + $0x240] sm:$0xff] %v4449_v19  ;;  %v4459_v6 = vmul.f32 %v4434_v33, %v5480_v36 }
 0x28d   :  { %v4451_v57 = vmul.f32 %v4435_v9, %v5485_v53  ;;  %v4462_v52 = vmul.f32 %v4445_v50, %v6904_v43  ;;  %v4443_v16 = vmul.f32 %v4402_v24, %v5491_v1  ;;  %v3739_v60 = vsel %vm6782_vm6, 0, %v3737_v63  ;;  %4455 = vst [vmem:[#allocation5 + $0x248] sm:$0xff] %v4450_v49 }
 0x28e   :  { %v3730_v32 = vand.u32 2147483647, %v3729_v27  ;;  %v4463_v58 = vmul.f32 %v4446_v17, %v5476_v12  ;;  %v4460_v23 = vmul.f32 %v4435_v9, %v5495_v46  ;;  %v3756_v27 = vadd.s32 3, %v3739_v60 }
 0x28f   :  { %4456 = vst [vmem:[#allocation5 + $0x250] sm:$0xff] %v4451_v57  ;;  %v4466_v4 = vadd.f32 %v4462_v52, %v4458_v21  ;;  %v4447_v47 = vsub.f32 %v4439_v25, %v4443_v16  ;;  %v4373_v13 = vand.u32 3, %v3739_v60  ;;  %vm3755_vm12 = vweird.f32 %v6599_v3 }
 0x290   :  { %v3733_v2 = vmul.f32 %v3732_v14, %v3730_v32  ;;  %v4467_v5 = vadd.f32 %v4463_v58, %v4459_v6  ;;  %v3757_v32 = vand.u32 3, %v3756_v27 }
 0x291   :  { %v4470_v36 = vmul.f32 %v4466_v4, %v6903_v51  ;;  %v4464_v55 = vmul.f32 %v4447_v47, %v5491_v1  ;;  %vm4378_vm7 = vcmp.eq.s32.totalorder %v4373_v13, 2  ;;  %vm4375_vm10 = vcmp.eq.s32.totalorder %v4373_v13, 0 }
 0x292   :  { %v3734_v10 = vxor.u32 2147483648, %v3733_v2  ;;  %v4471_v44 = vmul.f32 %v4467_v5, %v6905_v22  ;;  %vm3762_vm4 = vcmp.eq.s32.totalorder %v3757_v32, 2  ;;  %vm3758_vm8 = vcmp.lt.s32.totalorder %v3757_v32, 2 }
 0x293   :  { %4475 = vst [vmem:[#allocation5 + $0x260] sm:$0xff] %v4470_v36  ;;  %v4468_v12 = vadd.f32 %v4464_v55, %v4460_v23  ;;  %vm3759_vm9 = vcmp.eq.s32.totalorder %v3757_v32, 0  ;;  %vm4374_vm11 = vcmp.lt.s32.totalorder %v4373_v13, 2 }
 0x294   :  { %v3735_v31 = vsel %vm3614_vm3, %v3734_v10, %v3733_v2  ;;  %4476 = vst [vmem:[#allocation5 + $0x268] sm:$0xff] %v4471_v44 }
 0x295   :  { %v3738_v7 = vsel %vm6782_vm6, %v6599_v3, %v3735_v31  ;;  %v4472_v24 = vmul.f32 %v4468_v12, %v5485_v53 }
 0x296   :  { %v3740_v59 = vmul.f32 %v3738_v7, %v3738_v7 }
 0x297   :  { %4477 = vst [vmem:[#allocation5 + $0x270] sm:$0xff] %v4472_v24 }
 0x298   :  { %v3741_v41 = vmul.f32 -0.001358992, %v3740_v59  ;;  %v3748_v45 = vmul.f32 -0.00019511016, %v3740_v59 }
 0x29a   :  { %v3742_v11 = vadd.f32 0.041655596, %v3741_v41  ;;  %v3749_v43 = vadd.f32 0.008332121, %v3748_v45 }
 0x29c   :  { %v3743_v14 = vmul.f32 %v3742_v11, %v3740_v59  ;;  %v3750_v0 = vmul.f32 %v3749_v43, %v3740_v59 }
 0x29e   :  { %v3744_v46 = vadd.f32 -0.4999988, %v3743_v14  ;;  %v3751_v37 = vadd.f32 -0.16666654, %v3750_v0 }
 0x2a0   :  { %v3745_v34 = vmul.f32 %v3744_v46, %v3740_v59  ;;  %v3752_v56 = vmul.f32 %v3751_v37, %v3740_v59 }
 0x2a2   :  { %v3746_v51 = vadd.f32 1.0, %v3745_v34  ;;  %v3753_v63 = vadd.f32 1.0, %v3752_v56 }
 0x2a4   :  { %v3754_v1 = vmul.f32 %v3753_v63, %v3738_v7  ;;  %v3763_v22 = vxor.u32 2147483648, %v3746_v51 }
 0x2a6   :  { %v3760_v54 = vxor.u32 2147483648, %v3754_v1  ;;  %v3764_v28 = vsel %vm3762_vm4, %v3763_v22, %v3754_v1  ;;  %v4380_v20 = vsel %vm4378_vm7, %v3763_v22, %v3754_v1 }
 0x2a8   :  { %v3761_v53 = vsel %vm3759_vm9, %v3746_v51, %v3760_v54  ;;  %v4377_v2 = vsel %vm4375_vm10, %v3746_v51, %v3760_v54 }
 0x2a9   :  { %v3765_v35 = vsel %vm3758_vm8, %v3761_v53, %v3764_v28  ;;  %v4381_v29 = vsel %vm4374_vm11, %v4377_v2, %v4380_v20 }
 0x2aa   :  { %v3766_v38 = vsel %vm3755_vm12, nan, %v3765_v35  ;;  %v4382_v42 = vsel %vm3755_vm12, nan, %v4381_v29 }
 0x2ab   :  { %v4386_v39 = vmul.f32 %v3766_v38, %v5487_v48  ;;  %v4395_v30 = vmul.f32 %v3766_v38, %v5630_v40  ;;  %v4399_v61 = vmul.f32 %v4382_v42, %v5626_v26  ;;  %v4407_v10 = vmul.f32 %v4382_v42, %v5630_v40 }
 0x2ac   :  { %v4411_v8 = vmul.f32 %v3766_v38, %v5626_v26 }
 0x2ad   :  { %4391 = vst [vmem:[#allocation5 + $0x218] sm:$0xff] %v4386_v39  ;;  %v4403_v62 = vadd.f32 %v4399_v61, %v4395_v30 }
 0x2ae   :  { %v4415_v15 = vsub.f32 %v4407_v10, %v4411_v8 }
 0x2af   :  { %v4419_v3 = vmul.f32 %v4403_v62, %v5487_v48  ;;  %v4428_v33 = vmul.f32 %v4403_v62, %v5630_v40  ;;  %v4444_v9 = vmul.f32 %v4403_v62, %v5626_v26 }
 0x2b0   :  { %v4432_v18 = vmul.f32 %v4415_v15, %v5626_v26  ;;  %v4440_v25 = vmul.f32 %v4415_v15, %v5630_v40 }
 0x2b1   :  { %4424 = vst [vmem:[#allocation5 + $0x238] sm:$0xff] %v4419_v3 }
 0x2b2   :  { %v4436_v31 = vadd.f32 %v4432_v18, %v4428_v33  ;;  %v4448_v19 = vsub.f32 %v4440_v25, %v4444_v9 }
 0x2b4   :  { %v4452_v50 = vmul.f32 %v4436_v31, %v5487_v48  ;;  %v4461_v21 = vmul.f32 %v4436_v31, %v5630_v40  ;;  %v4465_v7 = vmul.f32 %v4448_v19, %v5626_v26 }
 0x2b6   :  { %4457 = vst [vmem:[#allocation5 + $0x258] sm:$0xff] %v4452_v50  ;;  %v4469_v49 = vadd.f32 %v4465_v7, %v4461_v21 }
 0x2b8   :  { %v4473_v57 = vmul.f32 %v4469_v49, %v5487_v48 }
 0x2ba   :  { %4478 = vst [vmem:[#allocation5 + $0x278] sm:$0xff] %v4473_v57 }
 0x2bb   :  { %4491 = dma.vmem_to_hbm [thread:$0]  %s4484_s20, 10240, %s4486_s23, [#allocation4], %s4693_s14, %s4693_s14, %s4694_s15  }
 0x2bc   :  { %4688 = dma.done.wait [#allocation4], 10240  }
 0x2bd   :  { %4689 = vsyncadd [#allocation4], 4294957056 }
 0x2be   :  { %4690 = dma.done.wait [#allocation7], 1536  }
 0x2bf   :  { %4691 = vsyncadd [#allocation7], 4294965760 }
 0x2c0   :  { %4513 = vsyncpa [#allocation3], 1 }
 0x2c1   :  { %4514 = vsyncpa [#allocation4], 1 }
 0x2c2   :  { %4515 = vsyncpa [#allocation7], 1 }

</bundles_post_ra>
